<compile_context>
chip_gen: v5e
topology: v5e:2x2
jax: 0.10.0
libtpu: 0.0.40
codegen_flags: <defaults>
</compile_context>

<pallas_src>
import math
from collections import namedtuple
from functools import partial

import jax
import jax.numpy as jnp
from jax.experimental import pallas as pl
from jax.experimental.pallas import tpu as pltpu

BN_EPS = 1e-5

BlockCfg = namedtuple("BlockCfg", ["kernel", "stride", "use_res"])


def _round_up(a, b):
    return -(-a // b) * b


# ---------------------------------------------------------------------------
# Pallas kernels
# ---------------------------------------------------------------------------

def _matmul_bn_act_kernel(x_ref, w_ref, scale_ref, bias_ref, o_ref, *, act):
    # x: (tm, K), w: (K, Cout), scale/bias: (1, Cout)
    x = x_ref[...].astype(jnp.bfloat16)
    w = w_ref[...].astype(jnp.bfloat16)
    y = jnp.dot(x, w, preferred_element_type=jnp.float32)
    y = y * scale_ref[...] + bias_ref[...]
    if act == "silu":
        y = y * jax.nn.sigmoid(y)
    o_ref[...] = y.astype(o_ref.dtype)


def matmul_bn_act(x, w, scale, bias, act):
    M, K = x.shape
    Cout = w.shape[1]
    tm = min(256, _round_up(M, 8))
    Mp = _round_up(M, tm)
    if Mp != M:
        x = jnp.pad(x, ((0, Mp - M), (0, 0)))
    y = pl.pallas_call(
        partial(_matmul_bn_act_kernel, act=act),
        out_shape=jax.ShapeDtypeStruct((Mp, Cout), x.dtype),
        grid=(Mp // tm,),
        in_specs=[
            pl.BlockSpec((tm, K), lambda i: (i, 0)),
            pl.BlockSpec((K, Cout), lambda i: (0, 0)),
            pl.BlockSpec((1, Cout), lambda i: (0, 0)),
            pl.BlockSpec((1, Cout), lambda i: (0, 0)),
        ],
        out_specs=pl.BlockSpec((tm, Cout), lambda i: (i, 0)),
        compiler_params=pltpu.CompilerParams(
            dimension_semantics=("parallel",)),
    )(x, w, scale, bias)
    if Mp != M:
        y = y[:M]
    return y


def _dw_kernel(p_ref, w_ref, scale_ref, bias_ref, o_ref, *,
               k, stride, out_h, out_w, phase_rows):
    # p_ref: (1, nph*phase_rows, Wq, C) phases stacked along rows
    # w_ref: (k*k, C) taps, scale/bias: (1, C)
    xin = p_ref[0].astype(jnp.float32)
    w = w_ref[...].astype(jnp.float32)
    acc = None
    for kh in range(k):
        for kw in range(k):
            ph = (kh % stride) * stride + (kw % stride)
            q, r = kh // stride, kw // stride
            row0 = ph * phase_rows + q
            tap = xin[row0:row0 + out_h, r:r + out_w, :]
            t = kh * k + kw
            contrib = tap * w[t:t + 1, :]
            acc = contrib if acc is None else acc + contrib
    y = acc * scale_ref[...] + bias_ref[...]
    y = y * jax.nn.sigmoid(y)                       # SiLU
    o_ref[0] = y.astype(o_ref.dtype)


def _se_gate_kernel(x_ref, w1_ref, w2_ref, o_ref, acc_ref, *, inv_hw):
    # x: (N, thw, C); acc: (N, C) f32 scratch; out: (N, C) gate
    @pl.when(pl.program_id(0) == 0)
    def _():
        acc_ref[...] = jnp.zeros_like(acc_ref)

    acc_ref[...] += jnp.sum(x_ref[...].astype(jnp.float32), axis=1)

    @pl.when(pl.program_id(0) == pl.num_programs(0) - 1)
    def _():
        pooled = acc_ref[...] * inv_hw
        s = jnp.dot(pooled, w1_ref[...].astype(jnp.float32),
                    preferred_element_type=jnp.float32)
        s = s * jax.nn.sigmoid(s)                   # SiLU
        s = jnp.dot(s, w2_ref[...].astype(jnp.float32),
                    preferred_element_type=jnp.float32)
        o_ref[...] = jax.nn.sigmoid(s).astype(o_ref.dtype)


def _se_proj_kernel(x_ref, g_ref, w_ref, scale_ref, bias_ref, o_ref):
    # fused: SE gating * x, 1x1 projection conv (matmul), BN
    xg = x_ref[0].astype(jnp.float32) * g_ref[0]
    y = jnp.dot(xg.astype(jnp.bfloat16), w_ref[...].astype(jnp.bfloat16),
                preferred_element_type=jnp.float32)
    y = y * scale_ref[...] + bias_ref[...]
    o_ref[0] = y.astype(o_ref.dtype)


def _se_proj_res_kernel(x_ref, g_ref, w_ref, scale_ref, bias_ref, r_ref, o_ref):
    # fused: SE gating * x, 1x1 projection conv, BN, residual add
    xg = x_ref[0].astype(jnp.float32) * g_ref[0]
    y = jnp.dot(xg.astype(jnp.bfloat16), w_ref[...].astype(jnp.bfloat16),
                preferred_element_type=jnp.float32)
    y = y * scale_ref[...] + bias_ref[...]
    y = y + r_ref[0].astype(jnp.float32)
    o_ref[0] = y.astype(o_ref.dtype)


def _avgpool_linear_kernel(x_ref, w_ref, b_ref, o_ref, acc_ref, *, inv_hw):
    # x: (N, thw, C); acc: (N, C) f32; w: (C, ncls); b: (1, ncls)
    @pl.when(pl.program_id(0) == 0)
    def _():
        acc_ref[...] = jnp.zeros_like(acc_ref)

    acc_ref[...] += jnp.sum(x_ref[...].astype(jnp.float32), axis=1)

    @pl.when(pl.program_id(0) == pl.num_programs(0) - 1)
    def _():
        pooled = acc_ref[...] * inv_hw
        y = jnp.dot(pooled, w_ref[...].astype(jnp.float32),
                    preferred_element_type=jnp.float32) + b_ref[...]
        o_ref[...] = y.astype(o_ref.dtype)


# ---------------------------------------------------------------------------
# Wrappers (pure-JAX glue: padding / reshapes / weight re-layout)
# ---------------------------------------------------------------------------

def extract_patches(x, k, stride, pad):
    # x: (N, H, W, C) -> (k*k, N, Ho, Wo, C)  (only used for the 3-ch stem)
    N, H, W, C = x.shape
    xp = jnp.pad(x, ((0, 0), (pad, pad), (pad, pad), (0, 0)))
    Ho = (H + 2 * pad - k) // stride + 1
    Wo = (W + 2 * pad - k) // stride + 1
    taps = []
    for kh in range(k):
        for kw in range(k):
            taps.append(xp[:, kh:kh + stride * Ho:stride,
                           kw:kw + stride * Wo:stride, :])
    return jnp.stack(taps, axis=0), Ho, Wo


def conv_bn_act(x, w_oihw, bn_scale, bn_bias, stride, act):
    # dense (groups=1) conv, PyTorch weight layout (Cout, Cin, kH, kW)
    cout, cin, k, _ = w_oihw.shape
    patches, Ho, Wo = extract_patches(x, k, stride, (k - 1) // 2)
    N = x.shape[0]
    T = k * k
    xm = jnp.transpose(patches, (1, 2, 3, 0, 4)).reshape(N * Ho * Wo, T * cin)
    wm = jnp.transpose(w_oihw, (2, 3, 1, 0)).reshape(T * cin, cout)
    y = matmul_bn_act(xm, wm, bn_scale.reshape(1, -1), bn_bias.reshape(1, -1), act)
    return y.reshape(N, Ho, Wo, cout)


def conv1x1_bn_act(x, w_oihw, bn_scale, bn_bias, act):
    N, H, W, cin = x.shape
    cout = w_oihw.shape[0]
    xm = x.reshape(N * H * W, cin)
    wm = w_oihw.reshape(cout, cin).T
    y = matmul_bn_act(xm, wm, bn_scale.reshape(1, -1), bn_bias.reshape(1, -1), act)
    return y.reshape(N, H, W, cout)


def dwconv_bn_silu(x, w_oihw, bn_scale, bn_bias, k, stride):
    # depthwise conv, PyTorch weight layout (C, 1, kH, kW); phase-decomposed
    N, H, W, C = x.shape
    p = (k - 1) // 2
    Ho = (H + 2 * p - k) // stride + 1
    Wo = (W + 2 * p - k) // stride + 1
    ext = (k - 1) // stride
    Hq, Wq = Ho + ext, Wo + ext
    Hn, Wn = stride * Hq, stride * Wq
    xp = jnp.pad(x, ((0, 0), (p, Hn - H - p), (p, Wn - W - p), (0, 0)))
    nph = stride * stride
    phase_list = [xp[:, a::stride, b::stride, :]
                  for a in range(stride) for b in range(stride)]
    pcat = jnp.concatenate(phase_list, axis=1) if nph > 1 else phase_list[0]
    # pcat: (N, nph*Hq, Wq, C)
    wt = jnp.transpose(w_oihw.reshape(C, k, k), (1, 2, 0)).reshape(k * k, C)
    out = pl.pallas_call(
        partial(_dw_kernel, k=k, stride=stride, out_h=Ho, out_w=Wo, phase_rows=Hq),
        out_shape=jax.ShapeDtypeStruct((N, Ho, Wo, C), x.dtype),
        grid=(N,),
        in_specs=[
            pl.BlockSpec((1, nph * Hq, Wq, C), lambda n: (n, 0, 0, 0)),
            pl.BlockSpec((k * k, C), lambda n: (0, 0)),
            pl.BlockSpec((1, C), lambda n: (0, 0)),
            pl.BlockSpec((1, C), lambda n: (0, 0)),
        ],
        out_specs=pl.BlockSpec((1, Ho, Wo, C), lambda n: (n, 0, 0, 0)),
        compiler_params=pltpu.CompilerParams(
            dimension_semantics=("parallel",)),
    )(pcat, wt, bn_scale.reshape(1, -1), bn_bias.reshape(1, -1))
    return out


def se_gate(x, w1_oihw, w2_oihw):
    # Produces the SE gate (N, C) = sigmoid(fc2(silu(fc1(avgpool(x)))))
    N, H, W, C = x.shape
    HW = H * W
    csq = w1_oihw.shape[0]
    w1 = w1_oihw.reshape(csq, C).T     # (C, Csq)
    w2 = w2_oihw.reshape(C, csq).T     # (Csq, C)
    thw = min(512, _round_up(HW, 8))
    HWp = _round_up(HW, thw)
    x3 = x.reshape(N, HW, C)
    if HWp != HW:
        x3 = jnp.pad(x3, ((0, 0), (0, HWp - HW), (0, 0)))
    gate = pl.pallas_call(
        partial(_se_gate_kernel, inv_hw=1.0 / HW),
        out_shape=jax.ShapeDtypeStruct((N, C), jnp.float32),
        grid=(HWp // thw,),
        in_specs=[
            pl.BlockSpec((N, thw, C), lambda i: (0, i, 0)),
            pl.BlockSpec((C, csq), lambda i: (0, 0)),
            pl.BlockSpec((csq, C), lambda i: (0, 0)),
        ],
        out_specs=pl.BlockSpec((N, C), lambda i: (0, 0)),
        scratch_shapes=[pltpu.VMEM((N, C), jnp.float32)],
        compiler_params=pltpu.CompilerParams(
            dimension_semantics=("arbitrary",)),
    )(x3, w1, w2)
    return gate


def se_proj_residual(x, gate, w_oihw, bn_scale, bn_bias, residual):
    # Fused: (x * gate) @ W_proj  -> BN -> (+ residual)
    N, H, W, Cexp = x.shape
    cout = w_oihw.shape[0]
    wm = w_oihw.reshape(cout, Cexp).T
    HW = H * W
    tm = min(256, _round_up(HW, 8))
    HWp = _round_up(HW, tm)
    x3 = x.reshape(N, HW, Cexp)
    if HWp != HW:
        x3 = jnp.pad(x3, ((0, 0), (0, HWp - HW), (0, 0)))
    gate3 = gate.reshape(N, 1, Cexp)

    args = [x3, gate3, wm, bn_scale.reshape(1, -1), bn_bias.reshape(1, -1)]
    in_specs = [
        pl.BlockSpec((1, tm, Cexp), lambda n, i: (n, i, 0)),
        pl.BlockSpec((1, 1, Cexp), lambda n, i: (n, 0, 0)),
        pl.BlockSpec((Cexp, cout), lambda n, i: (0, 0)),
        pl.BlockSpec((1, cout), lambda n, i: (0, 0)),
        pl.BlockSpec((1, cout), lambda n, i: (0, 0)),
    ]
    if residual is not None:
        r3 = residual.reshape(N, HW, cout)
        if HWp != HW:
            r3 = jnp.pad(r3, ((0, 0), (0, HWp - HW), (0, 0)))
        args.append(r3)
        in_specs.append(pl.BlockSpec((1, tm, cout), lambda n, i: (n, i, 0)))
        kernel = _se_proj_res_kernel
    else:
        kernel = _se_proj_kernel

    y = pl.pallas_call(
        kernel,
        out_shape=jax.ShapeDtypeStruct((N, HWp, cout), x.dtype),
        grid=(N, HWp // tm),
        in_specs=in_specs,
        out_specs=pl.BlockSpec((1, tm, cout), lambda n, i: (n, i, 0)),
        compiler_params=pltpu.CompilerParams(
            dimension_semantics=("parallel", "parallel")),
    )(*args)
    if HWp != HW:
        y = y[:, :HW, :]
    return y.reshape(N, H, W, cout)


def avgpool_classifier(x, w, b):
    N, H, W, C = x.shape
    HW = H * W
    ncls = w.shape[1]
    thw = min(512, _round_up(HW, 8))
    HWp = _round_up(HW, thw)
    x3 = x.reshape(N, HW, C)
    if HWp != HW:
        x3 = jnp.pad(x3, ((0, 0), (0, HWp - HW), (0, 0)))
    return pl.pallas_call(
        partial(_avgpool_linear_kernel, inv_hw=1.0 / HW),
        out_shape=jax.ShapeDtypeStruct((N, ncls), x.dtype),
        grid=(HWp // thw,),
        in_specs=[
            pl.BlockSpec((N, thw, C), lambda i: (0, i, 0)),
            pl.BlockSpec((C, ncls), lambda i: (0, 0)),
            pl.BlockSpec((1, ncls), lambda i: (0, 0)),
        ],
        out_specs=pl.BlockSpec((N, ncls), lambda i: (0, 0)),
        scratch_shapes=[pltpu.VMEM((N, C), jnp.float32)],
        compiler_params=pltpu.CompilerParams(
            dimension_semantics=("arbitrary",)),
    )(x3, w, b)


# ---------------------------------------------------------------------------
# Config / deterministic parameter construction (mirrors the PyTorch __init__)
# ---------------------------------------------------------------------------

def _make_divisible(v, divisor=8, min_value=None):
    if min_value is None:
        min_value = divisor
    new_v = max(min_value, int(v + divisor / 2) // divisor * divisor)
    if new_v < 0.9 * v:
        new_v += divisor
    return new_v


def _adjust_channels(channels, mult):
    return _make_divisible(channels * mult, 8)


class MBCfg:
    def __init__(self, expand_ratio, kernel, stride, input_channels,
                 out_channels, num_layers, width_mult=1.0, depth_mult=1.0):
        self.expand_ratio = expand_ratio
        self.kernel = kernel
        self.stride = stride
        self.input_channels = _adjust_channels(input_channels, width_mult)
        self.out_channels = _adjust_channels(out_channels, width_mult)
        self.num_layers = int(math.ceil(num_layers * depth_mult))


def _kaiming_normal_conv(key, cout, cin_per_group, kh, kw):
    # nn.init.kaiming_normal_(w, mode='fan_out'): fan_out = cout * kh * kw
    fan_out = cout * kh * kw
    std = math.sqrt(2.0 / fan_out)
    return std * jax.random.normal(key, (cout, cin_per_group, kh, kw), dtype=jnp.float32)


def _bn_fold(c):
    # eval-mode BN with gamma=1, beta=0, running_mean=0, running_var=1
    scale = jnp.full((c,), 1.0 / math.sqrt(1.0 + BN_EPS), jnp.float32)
    bias = jnp.zeros((c,), jnp.float32)
    return scale, bias


def build_params(key, settings, num_classes):
    keys = iter(jax.random.split(key, 256))
    params = {}

    first_c = settings[0].input_channels
    s, b = _bn_fold(first_c)
    params["stem"] = {"w": _kaiming_normal_conv(next(keys), first_c, 3, 3, 3),
                      "scale": s, "bias": b}

    blocks = []
    cfgs = []
    for cnf in settings:
        for layer_idx in range(cnf.num_layers):
            cin = cnf.input_channels if layer_idx == 0 else cnf.out_channels
            stride = cnf.stride if layer_idx == 0 else 1
            cout = cnf.out_channels
            cexp = _adjust_channels(cin, cnf.expand_ratio)
            csq = max(1, cin // 4)
            blk = {}
            if cexp != cin:
                s, b = _bn_fold(cexp)
                blk["expand"] = {"w": _kaiming_normal_conv(next(keys), cexp, cin, 1, 1),
                                 "scale": s, "bias": b}
            s, b = _bn_fold(cexp)
            blk["dw"] = {"w": _kaiming_normal_conv(next(keys), cexp, 1,
                                                   cnf.kernel, cnf.kernel),
                         "scale": s, "bias": b}
            blk["se"] = {"w1": _kaiming_normal_conv(next(keys), csq, cexp, 1, 1),
                         "w2": _kaiming_normal_conv(next(keys), cexp, csq, 1, 1)}
            s, b = _bn_fold(cout)
            blk["proj"] = {"w": _kaiming_normal_conv(next(keys), cout, cexp, 1, 1),
                           "scale": s, "bias": b}
            blocks.append(blk)
            cfgs.append(BlockCfg(kernel=cnf.kernel, stride=stride,
                                 use_res=(stride == 1 and cin == cout)))
    params["blocks"] = blocks

    last_in = settings[-1].out_channels
    last_out = 4 * last_in
    s, b = _bn_fold(last_out)
    params["head"] = {"w": _kaiming_normal_conv(next(keys), last_out, last_in, 1, 1),
                      "scale": s, "bias": b}

    init_range = 1.0 / math.sqrt(num_classes)
    cw = jax.random.uniform(next(keys), (num_classes, last_out), jnp.float32,
                            minval=-init_range, maxval=init_range)
    params["classifier"] = {"w": cw.T,                           # (C, num_classes)
                            "b": jnp.zeros((1, num_classes), jnp.float32)}
    return params, tuple(cfgs)


# ---------------------------------------------------------------------------
# Forward pass (cfgs is a STATIC tuple of BlockCfg, not part of the pytree)
# ---------------------------------------------------------------------------

def efficientnet_forward(params, x_nchw, cfgs):
    x = jnp.transpose(x_nchw, (0, 2, 3, 1))  # NCHW -> NHWC
    st = params["stem"]
    x = conv_bn_act(x, st["w"], st["scale"], st["bias"], stride=2, act="silu")

    for blk, cfg in zip(params["blocks"], cfgs):
        res = x
        h = x
        if "expand" in blk:
            e = blk["expand"]
            h = conv1x1_bn_act(h, e["w"], e["scale"], e["bias"], act="silu")
        d = blk["dw"]
        h = dwconv_bn_silu(h, d["w"], d["scale"], d["bias"], cfg.kernel, cfg.stride)
        gate = se_gate(h, blk["se"]["w1"], blk["se"]["w2"])
        p = blk["proj"]
        # TODO(synk): StochasticDepth is identity in eval mode; omitted.
        h = se_proj_residual(h, gate, p["w"], p["scale"], p["bias"],
                             res if cfg.use_res else None)
        x = h

    hd = params["head"]
    x = conv1x1_bn_act(x, hd["w"], hd["scale"], hd["bias"], act="silu")
    # TODO(synk): nn.Dropout before the Linear is identity at inference.
    cls = params["classifier"]
    return avgpool_classifier(x, cls["w"], cls["b"])


if __name__ == "__main__":
    key = jax.random.PRNGKey(0)
    k_param, k_in = jax.random.split(key)

    # Small EfficientNet-style config (width_mult=1, depth_mult=1)
    settings = [
        MBCfg(expand_ratio=1, kernel=3, stride=1, input_channels=16,
              out_channels=16, num_layers=1),
        MBCfg(expand_ratio=4, kernel=3, stride=2, input_channels=16,
              out_channels=24, num_layers=2),
    ]
    num_classes = 10
    params, cfgs = build_params(k_param, settings, num_classes)

    x = jax.random.normal(k_in, (2, 3, 16, 16), dtype=jnp.float32)  # NCHW

    fwd = jax.jit(lambda p, xx: efficientnet_forward(p, xx, cfgs))
    out = fwd(params, x)
    jax.block_until_ready(out)
    assert out.shape == (2, num_classes)
    assert bool(jnp.all(jnp.isfinite(out)))
    print("KERNEL_OK")
</pallas_src>

<mosaic_0001>
module attributes {stable_mosaic.version = 11 : i64} {
  func.func @_matmul_bn_act_kernel(%arg0: i32, %arg1: memref<128x27xf32, #tpu.memory_space<vmem>>, %arg2: memref<27x16xf32, #tpu.memory_space<vmem>>, %arg3: memref<1x16xf32, #tpu.memory_space<vmem>>, %arg4: memref<1x16xf32, #tpu.memory_space<vmem>>, %arg5: memref<128x16xf32, #tpu.memory_space<vmem>>) attributes {dimension_semantics = [#tpu.dimension_semantics<parallel>], iteration_bounds = array<i64: 1>, scalar_prefetch = 0 : i64, scratch_operands = 0 : i64, tpu.core_type = #tpu.core_type<tc>, window_params = [{transform_indices = @transform_0, window_bounds = array<i64: 128, 27>}, {pipeline_mode = #tpu.pipeline_mode<synchronous>, transform_indices = @transform_1, window_bounds = array<i64: 27, 16>}, {pipeline_mode = #tpu.pipeline_mode<synchronous>, transform_indices = @transform_2, window_bounds = array<i64: 1, 16>}, {pipeline_mode = #tpu.pipeline_mode<synchronous>, transform_indices = @transform_3, window_bounds = array<i64: 1, 16>}, {transform_indices = @transform_4, window_bounds = array<i64: 128, 16>}]} {
    %c0 = arith.constant 0 : index
    %c0_0 = arith.constant 0 : index
    %0 = vector.load %arg1[%c0, %c0_0] : memref<128x27xf32, #tpu.memory_space<vmem>>, vector<128x27xf32>
    %1 = arith.truncf %0 : vector<128x27xf32> to vector<128x27xbf16>
    %c0_1 = arith.constant 0 : index
    %c0_2 = arith.constant 0 : index
    %2 = vector.load %arg2[%c0_1, %c0_2] : memref<27x16xf32, #tpu.memory_space<vmem>>, vector<27x16xf32>
    %3 = arith.truncf %2 : vector<27x16xf32> to vector<27x16xbf16>
    %cst = arith.constant dense<0.000000e+00> : vector<128x16xf32>
    %4 = tpu.matmul %1, %3, %cst {dimension_numbers = #tpu.dot_dimension_numbers<[1], [0], [0], [1], [0, 0, 1, 1], [], []>} : vector<128x27xbf16>, vector<27x16xbf16>, vector<128x16xf32> -> vector<128x16xf32>
    %c0_3 = arith.constant 0 : index
    %c0_4 = arith.constant 0 : index
    %5 = vector.load %arg3[%c0_3, %c0_4] : memref<1x16xf32, #tpu.memory_space<vmem>>, vector<1x16xf32>
    %6 = vector.broadcast %5 : vector<1x16xf32> to vector<128x16xf32>
    %7 = arith.mulf %4, %6 : vector<128x16xf32>
    %c0_5 = arith.constant 0 : index
    %c0_6 = arith.constant 0 : index
    %8 = vector.load %arg4[%c0_5, %c0_6] : memref<1x16xf32, #tpu.memory_space<vmem>>, vector<1x16xf32>
    %9 = vector.broadcast %8 : vector<1x16xf32> to vector<128x16xf32>
    %10 = arith.addf %7, %9 : vector<128x16xf32>
    %11 = arith.negf %10 : vector<128x16xf32>
    %12 = math.exp %11 : vector<128x16xf32>
    %cst_7 = arith.constant 1.000000e+00 : f32
    %13 = vector.broadcast %cst_7 : f32 to vector<128x16xf32>
    %14 = arith.addf %13, %12 : vector<128x16xf32>
    %15 = arith.divf %13, %14 : vector<128x16xf32>
    %16 = arith.mulf %10, %15 : vector<128x16xf32>
    %c0_8 = arith.constant 0 : index
    %c0_9 = arith.constant 0 : index
    %17 = vector.load %arg5[%c0_8, %c0_9] : memref<128x16xf32, #tpu.memory_space<vmem>>, vector<128x16xf32>
    tpu.vector_store %arg5[%c0_8, %c0_9], %16 {strides = array<i32>} : memref<128x16xf32, #tpu.memory_space<vmem>>, vector<128x16xf32>,
    return
  }
  func.func @transform_0(%arg0: i32) -> (i32, i32) {
    %c0_i32 = arith.constant 0 : i32
    %c0_i32_0 = arith.constant 0 : i32
    return %arg0, %c0_i32 : i32, i32
  }
  func.func @transform_1(%arg0: i32) -> (i32, i32) {
    %c0_i32 = arith.constant 0 : i32
    %c0_i32_0 = arith.constant 0 : i32
    %c0_i32_1 = arith.constant 0 : i32
    return %c0_i32, %c0_i32_0 : i32, i32
  }
  func.func @transform_2(%arg0: i32) -> (i32, i32) {
    %c0_i32 = arith.constant 0 : i32
    %c0_i32_0 = arith.constant 0 : i32
    %c0_i32_1 = arith.constant 0 : i32
    return %c0_i32, %c0_i32_0 : i32, i32
  }
  func.func @transform_3(%arg0: i32) -> (i32, i32) {
    %c0_i32 = arith.constant 0 : i32
    %c0_i32_0 = arith.constant 0 : i32
    %c0_i32_1 = arith.constant 0 : i32
    return %c0_i32, %c0_i32_0 : i32, i32
  }
  func.func @transform_4(%arg0: i32) -> (i32, i32) {
    %c0_i32 = arith.constant 0 : i32
    %c0_i32_0 = arith.constant 0 : i32
    return %arg0, %c0_i32 : i32, i32
  }
}

module attributes {stable_mosaic.version = 11 : i64} {
  func.func @_dw_kernel(%arg0: i32, %arg1: memref<1x10x10x16xf32, #tpu.memory_space<vmem>>, %arg2: memref<9x16xf32, #tpu.memory_space<vmem>>, %arg3: memref<1x16xf32, #tpu.memory_space<vmem>>, %arg4: memref<1x16xf32, #tpu.memory_space<vmem>>, %arg5: memref<1x8x8x16xf32, #tpu.memory_space<vmem>>) attributes {dimension_semantics = [#tpu.dimension_semantics<parallel>], iteration_bounds = array<i64: 2>, scalar_prefetch = 0 : i64, scratch_operands = 0 : i64, tpu.core_type = #tpu.core_type<tc>, window_params = [{transform_indices = @transform_0, window_bounds = array<i64: 1, 10, 10, 16>}, {pipeline_mode = #tpu.pipeline_mode<synchronous>, transform_indices = @transform_1, window_bounds = array<i64: 9, 16>}, {pipeline_mode = #tpu.pipeline_mode<synchronous>, transform_indices = @transform_2, window_bounds = array<i64: 1, 16>}, {pipeline_mode = #tpu.pipeline_mode<synchronous>, transform_indices = @transform_3, window_bounds = array<i64: 1, 16>}, {transform_indices = @transform_4, window_bounds = array<i64: 1, 8, 8, 16>}]} {
    %c0 = arith.constant 0 : index
    %c0_0 = arith.constant 0 : index
    %c0_1 = arith.constant 0 : index
    %c0_2 = arith.constant 0 : index
    %0 = vector.load %arg1[%c0, %c0_0, %c0_1, %c0_2] : memref<1x10x10x16xf32, #tpu.memory_space<vmem>>, vector<1x10x10x16xf32>
    %1 = vector.shape_cast %0 : vector<1x10x10x16xf32> to vector<10x10x16xf32>
    %c0_3 = arith.constant 0 : index
    %c0_4 = arith.constant 0 : index
    %2 = vector.load %arg2[%c0_3, %c0_4] : memref<9x16xf32, #tpu.memory_space<vmem>>, vector<9x16xf32>
    %3 = vector.extract_strided_slice %1 {offsets = [0, 0, 0], sizes = [8, 8, 16], strides = [1, 1, 1]} : vector<10x10x16xf32> to vector<8x8x16xf32>
    %4 = vector.extract_strided_slice %2 {offsets = [0, 0], sizes = [1, 16], strides = [1, 1]} : vector<9x16xf32> to vector<1x16xf32>
    %5 = vector.shape_cast %4 : vector<1x16xf32> to vector<1x1x16xf32>
    %6 = vector.broadcast %5 : vector<1x1x16xf32> to vector<8x8x16xf32>
    %7 = arith.mulf %3, %6 : vector<8x8x16xf32>
    %8 = vector.extract_strided_slice %1 {offsets = [0, 1, 0], sizes = [8, 8, 16], strides = [1, 1, 1]} : vector<10x10x16xf32> to vector<8x8x16xf32>
    %9 = vector.extract_strided_slice %2 {offsets = [1, 0], sizes = [1, 16], strides = [1, 1]} : vector<9x16xf32> to vector<1x16xf32>
    %10 = vector.shape_cast %9 : vector<1x16xf32> to vector<1x1x16xf32>
    %11 = vector.broadcast %10 : vector<1x1x16xf32> to vector<8x8x16xf32>
    %12 = arith.mulf %8, %11 : vector<8x8x16xf32>
    %13 = arith.addf %7, %12 : vector<8x8x16xf32>
    %14 = vector.extract_strided_slice %1 {offsets = [0, 2, 0], sizes = [8, 8, 16], strides = [1, 1, 1]} : vector<10x10x16xf32> to vector<8x8x16xf32>
    %15 = vector.extract_strided_slice %2 {offsets = [2, 0], sizes = [1, 16], strides = [1, 1]} : vector<9x16xf32> to vector<1x16xf32>
    %16 = vector.shape_cast %15 : vector<1x16xf32> to vector<1x1x16xf32>
    %17 = vector.broadcast %16 : vector<1x1x16xf32> to vector<8x8x16xf32>
    %18 = arith.mulf %14, %17 : vector<8x8x16xf32>
    %19 = arith.addf %13, %18 : vector<8x8x16xf32>
    %20 = vector.extract_strided_slice %1 {offsets = [1, 0, 0], sizes = [8, 8, 16], strides = [1, 1, 1]} : vector<10x10x16xf32> to vector<8x8x16xf32>
    %21 = vector.extract_strided_slice %2 {offsets = [3, 0], sizes = [1, 16], strides = [1, 1]} : vector<9x16xf32> to vector<1x16xf32>
    %22 = vector.shape_cast %21 : vector<1x16xf32> to vector<1x1x16xf32>
    %23 = vector.broadcast %22 : vector<1x1x16xf32> to vector<8x8x16xf32>
    %24 = arith.mulf %20, %23 : vector<8x8x16xf32>
    %25 = arith.addf %19, %24 : vector<8x8x16xf32>
    %26 = vector.extract_strided_slice %1 {offsets = [1, 1, 0], sizes = [8, 8, 16], strides = [1, 1, 1]} : vector<10x10x16xf32> to vector<8x8x16xf32>
    %27 = vector.extract_strided_slice %2 {offsets = [4, 0], sizes = [1, 16], strides = [1, 1]} : vector<9x16xf32> to vector<1x16xf32>
    %28 = vector.shape_cast %27 : vector<1x16xf32> to vector<1x1x16xf32>
    %29 = vector.broadcast %28 : vector<1x1x16xf32> to vector<8x8x16xf32>
    %30 = arith.mulf %26, %29 : vector<8x8x16xf32>
    %31 = arith.addf %25, %30 : vector<8x8x16xf32>
    %32 = vector.extract_strided_slice %1 {offsets = [1, 2, 0], sizes = [8, 8, 16], strides = [1, 1, 1]} : vector<10x10x16xf32> to vector<8x8x16xf32>
    %33 = vector.extract_strided_slice %2 {offsets = [5, 0], sizes = [1, 16], strides = [1, 1]} : vector<9x16xf32> to vector<1x16xf32>
    %34 = vector.shape_cast %33 : vector<1x16xf32> to vector<1x1x16xf32>
    %35 = vector.broadcast %34 : vector<1x1x16xf32> to vector<8x8x16xf32>
    %36 = arith.mulf %32, %35 : vector<8x8x16xf32>
    %37 = arith.addf %31, %36 : vector<8x8x16xf32>
    %38 = vector.extract_strided_slice %1 {offsets = [2, 0, 0], sizes = [8, 8, 16], strides = [1, 1, 1]} : vector<10x10x16xf32> to vector<8x8x16xf32>
    %39 = vector.extract_strided_slice %2 {offsets = [6, 0], sizes = [1, 16], strides = [1, 1]} : vector<9x16xf32> to vector<1x16xf32>
    %40 = vector.shape_cast %39 : vector<1x16xf32> to vector<1x1x16xf32>
    %41 = vector.broadcast %40 : vector<1x1x16xf32> to vector<8x8x16xf32>
    %42 = arith.mulf %38, %41 : vector<8x8x16xf32>
    %43 = arith.addf %37, %42 : vector<8x8x16xf32>
    %44 = vector.extract_strided_slice %1 {offsets = [2, 1, 0], sizes = [8, 8, 16], strides = [1, 1, 1]} : vector<10x10x16xf32> to vector<8x8x16xf32>
    %45 = vector.extract_strided_slice %2 {offsets = [7, 0], sizes = [1, 16], strides = [1, 1]} : vector<9x16xf32> to vector<1x16xf32>
    %46 = vector.shape_cast %45 : vector<1x16xf32> to vector<1x1x16xf32>
    %47 = vector.broadcast %46 : vector<1x1x16xf32> to vector<8x8x16xf32>
    %48 = arith.mulf %44, %47 : vector<8x8x16xf32>
    %49 = arith.addf %43, %48 : vector<8x8x16xf32>
    %50 = vector.extract_strided_slice %1 {offsets = [2, 2, 0], sizes = [8, 8, 16], strides = [1, 1, 1]} : vector<10x10x16xf32> to vector<8x8x16xf32>
    %51 = vector.extract_strided_slice %2 {offsets = [8, 0], sizes = [1, 16], strides = [1, 1]} : vector<9x16xf32> to vector<1x16xf32>
    %52 = vector.shape_cast %51 : vector<1x16xf32> to vector<1x1x16xf32>
    %53 = vector.broadcast %52 : vector<1x1x16xf32> to vector<8x8x16xf32>
    %54 = arith.mulf %50, %53 : vector<8x8x16xf32>
    %55 = arith.addf %49, %54 : vector<8x8x16xf32>
    %c0_5 = arith.constant 0 : index
    %c0_6 = arith.constant 0 : index
    %56 = vector.load %arg3[%c0_5, %c0_6] : memref<1x16xf32, #tpu.memory_space<vmem>>, vector<1x16xf32>
    %57 = vector.shape_cast %56 : vector<1x16xf32> to vector<1x1x16xf32>
    %58 = vector.broadcast %57 : vector<1x1x16xf32> to vector<8x8x16xf32>
    %59 = arith.mulf %55, %58 : vector<8x8x16xf32>
    %c0_7 = arith.constant 0 : index
    %c0_8 = arith.constant 0 : index
    %60 = vector.load %arg4[%c0_7, %c0_8] : memref<1x16xf32, #tpu.memory_space<vmem>>, vector<1x16xf32>
    %61 = vector.shape_cast %60 : vector<1x16xf32> to vector<1x1x16xf32>
    %62 = vector.broadcast %61 : vector<1x1x16xf32> to vector<8x8x16xf32>
    %63 = arith.addf %59, %62 : vector<8x8x16xf32>
    %64 = arith.negf %63 : vector<8x8x16xf32>
    %65 = math.exp %64 : vector<8x8x16xf32>
    %cst = arith.constant 1.000000e+00 : f32
    %66 = vector.broadcast %cst : f32 to vector<8x8x16xf32>
    %67 = arith.addf %66, %65 : vector<8x8x16xf32>
    %68 = arith.divf %66, %67 : vector<8x8x16xf32>
    %69 = arith.mulf %63, %68 : vector<8x8x16xf32>
    %c0_9 = arith.constant 0 : index
    %c0_10 = arith.constant 0 : index
    %c0_11 = arith.constant 0 : index
    %c0_12 = arith.constant 0 : index
    %70 = vector.load %arg5[%c0_9, %c0_10, %c0_11, %c0_12] : memref<1x8x8x16xf32, #tpu.memory_space<vmem>>, vector<1x8x8x16xf32>
    %71 = vector.shape_cast %70 : vector<1x8x8x16xf32> to vector<8x8x16xf32>
    %72 = vector.shape_cast %69 : vector<8x8x16xf32> to vector<1x8x8x16xf32>
    tpu.vector_store %arg5[%c0_9, %c0_10, %c0_11, %c0_12], %72 {strides = array<i32>} : memref<1x8x8x16xf32, #tpu.memory_space<vmem>>, vector<1x8x8x16xf32>,
    return
  }
  func.func @transform_0(%arg0: i32) -> (i32, i32, i32, i32) {
    %c0_i32 = arith.constant 0 : i32
    %c0_i32_0 = arith.constant 0 : i32
    %c0_i32_1 = arith.constant 0 : i32
    %c0_i32_2 = arith.constant 0 : i32
    return %arg0, %c0_i32, %c0_i32_0, %c0_i32_1 : i32, i32, i32, i32
  }
  func.func @transform_1(%arg0: i32) -> (i32, i32) {
    %c0_i32 = arith.constant 0 : i32
    %c0_i32_0 = arith.constant 0 : i32
    %c0_i32_1 = arith.constant 0 : i32
    return %c0_i32, %c0_i32_0 : i32, i32
  }
  func.func @transform_2(%arg0: i32) -> (i32, i32) {
    %c0_i32 = arith.constant 0 : i32
    %c0_i32_0 = arith.constant 0 : i32
    %c0_i32_1 = arith.constant 0 : i32
    return %c0_i32, %c0_i32_0 : i32, i32
  }
  func.func @transform_3(%arg0: i32) -> (i32, i32) {
    %c0_i32 = arith.constant 0 : i32
    %c0_i32_0 = arith.constant 0 : i32
    %c0_i32_1 = arith.constant 0 : i32
    return %c0_i32, %c0_i32_0 : i32, i32
  }
  func.func @transform_4(%arg0: i32) -> (i32, i32, i32, i32) {
    %c0_i32 = arith.constant 0 : i32
    %c0_i32_0 = arith.constant 0 : i32
    %c0_i32_1 = arith.constant 0 : i32
    %c0_i32_2 = arith.constant 0 : i32
    return %arg0, %c0_i32, %c0_i32_0, %c0_i32_1 : i32, i32, i32, i32
  }
}

module attributes {stable_mosaic.version = 11 : i64} {
  func.func @_se_proj_res_kernel(%arg0: i32, %arg1: i32, %arg2: memref<1x64x16xf32, #tpu.memory_space<vmem>>, %arg3: memref<1x1x16xf32, #tpu.memory_space<vmem>>, %arg4: memref<16x16xf32, #tpu.memory_space<vmem>>, %arg5: memref<1x16xf32, #tpu.memory_space<vmem>>, %arg6: memref<1x16xf32, #tpu.memory_space<vmem>>, %arg7: memref<1x64x16xf32, #tpu.memory_space<vmem>>, %arg8: memref<1x64x16xf32, #tpu.memory_space<vmem>>) attributes {dimension_semantics = [#tpu.dimension_semantics<parallel>, #tpu.dimension_semantics<parallel>], iteration_bounds = array<i64: 2, 1>, scalar_prefetch = 0 : i64, scratch_operands = 0 : i64, tpu.core_type = #tpu.core_type<tc>, window_params = [{transform_indices = @transform_0, window_bounds = array<i64: 1, 64, 16>}, {transform_indices = @transform_1, window_bounds = array<i64: 1, 1, 16>}, {pipeline_mode = #tpu.pipeline_mode<synchronous>, transform_indices = @transform_2, window_bounds = array<i64: 16, 16>}, {pipeline_mode = #tpu.pipeline_mode<synchronous>, transform_indices = @transform_3, window_bounds = array<i64: 1, 16>}, {pipeline_mode = #tpu.pipeline_mode<synchronous>, transform_indices = @transform_4, window_bounds = array<i64: 1, 16>}, {transform_indices = @transform_5, window_bounds = array<i64: 1, 64, 16>}, {transform_indices = @transform_6, window_bounds = array<i64: 1, 64, 16>}]} {
    %c0 = arith.constant 0 : index
    %c0_0 = arith.constant 0 : index
    %c0_1 = arith.constant 0 : index
    %0 = vector.load %arg2[%c0, %c0_0, %c0_1] : memref<1x64x16xf32, #tpu.memory_space<vmem>>, vector<1x64x16xf32>
    %1 = vector.shape_cast %0 : vector<1x64x16xf32> to vector<64x16xf32>
    %c0_2 = arith.constant 0 : index
    %c0_3 = arith.constant 0 : index
    %c0_4 = arith.constant 0 : index
    %2 = vector.load %arg3[%c0_2, %c0_3, %c0_4] : memref<1x1x16xf32, #tpu.memory_space<vmem>>, vector<1x1x16xf32>
    %3 = vector.shape_cast %2 : vector<1x1x16xf32> to vector<1x16xf32>
    %4 = vector.broadcast %3 : vector<1x16xf32> to vector<64x16xf32>
    %5 = arith.mulf %1, %4 : vector<64x16xf32>
    %6 = arith.truncf %5 : vector<64x16xf32> to vector<64x16xbf16>
    %c0_5 = arith.constant 0 : index
    %c0_6 = arith.constant 0 : index
    %7 = vector.load %arg4[%c0_5, %c0_6] : memref<16x16xf32, #tpu.memory_space<vmem>>, vector<16x16xf32>
    %8 = arith.truncf %7 : vector<16x16xf32> to vector<16x16xbf16>
    %cst = arith.constant dense<0.000000e+00> : vector<64x16xf32>
    %9 = tpu.matmul %6, %8, %cst {dimension_numbers = #tpu.dot_dimension_numbers<[1], [0], [0], [1], [0, 0, 1, 1], [], []>} : vector<64x16xbf16>, vector<16x16xbf16>, vector<64x16xf32> -> vector<64x16xf32>
    %c0_7 = arith.constant 0 : index
    %c0_8 = arith.constant 0 : index
    %10 = vector.load %arg5[%c0_7, %c0_8] : memref<1x16xf32, #tpu.memory_space<vmem>>, vector<1x16xf32>
    %11 = vector.broadcast %10 : vector<1x16xf32> to vector<64x16xf32>
    %12 = arith.mulf %9, %11 : vector<64x16xf32>
    %c0_9 = arith.constant 0 : index
    %c0_10 = arith.constant 0 : index
    %13 = vector.load %arg6[%c0_9, %c0_10] : memref<1x16xf32, #tpu.memory_space<vmem>>, vector<1x16xf32>
    %14 = vector.broadcast %13 : vector<1x16xf32> to vector<64x16xf32>
    %15 = arith.addf %12, %14 : vector<64x16xf32>
    %c0_11 = arith.constant 0 : index
    %c0_12 = arith.constant 0 : index
    %c0_13 = arith.constant 0 : index
    %16 = vector.load %arg7[%c0_11, %c0_12, %c0_13] : memref<1x64x16xf32, #tpu.memory_space<vmem>>, vector<1x64x16xf32>
    %17 = vector.shape_cast %16 : vector<1x64x16xf32> to vector<64x16xf32>
    %18 = arith.addf %15, %17 : vector<64x16xf32>
    %c0_14 = arith.constant 0 : index
    %c0_15 = arith.constant 0 : index
    %c0_16 = arith.constant 0 : index
    %19 = vector.load %arg8[%c0_14, %c0_15, %c0_16] : memref<1x64x16xf32, #tpu.memory_space<vmem>>, vector<1x64x16xf32>
    %20 = vector.shape_cast %19 : vector<1x64x16xf32> to vector<64x16xf32>
    %21 = vector.shape_cast %18 : vector<64x16xf32> to vector<1x64x16xf32>
    tpu.vector_store %arg8[%c0_14, %c0_15, %c0_16], %21 {strides = array<i32>} : memref<1x64x16xf32, #tpu.memory_space<vmem>>, vector<1x64x16xf32>,
    return
  }
  func.func @transform_0(%arg0: i32, %arg1: i32) -> (i32, i32, i32) {
    %c0_i32 = arith.constant 0 : i32
    %c0_i32_0 = arith.constant 0 : i32
    return %arg0, %arg1, %c0_i32 : i32, i32, i32
  }
  func.func @transform_1(%arg0: i32, %arg1: i32) -> (i32, i32, i32) {
    %c0_i32 = arith.constant 0 : i32
    %c0_i32_0 = arith.constant 0 : i32
    %c0_i32_1 = arith.constant 0 : i32
    return %arg0, %c0_i32, %c0_i32_0 : i32, i32, i32
  }
  func.func @transform_2(%arg0: i32, %arg1: i32) -> (i32, i32) {
    %c0_i32 = arith.constant 0 : i32
    %c0_i32_0 = arith.constant 0 : i32
    %c0_i32_1 = arith.constant 0 : i32
    return %c0_i32, %c0_i32_0 : i32, i32
  }
  func.func @transform_3(%arg0: i32, %arg1: i32) -> (i32, i32) {
    %c0_i32 = arith.constant 0 : i32
    %c0_i32_0 = arith.constant 0 : i32
    %c0_i32_1 = arith.constant 0 : i32
    return %c0_i32, %c0_i32_0 : i32, i32
  }
  func.func @transform_4(%arg0: i32, %arg1: i32) -> (i32, i32) {
    %c0_i32 = arith.constant 0 : i32
    %c0_i32_0 = arith.constant 0 : i32
    %c0_i32_1 = arith.constant 0 : i32
    return %c0_i32, %c0_i32_0 : i32, i32
  }
  func.func @transform_5(%arg0: i32, %arg1: i32) -> (i32, i32, i32) {
    %c0_i32 = arith.constant 0 : i32
    %c0_i32_0 = arith.constant 0 : i32
    return %arg0, %arg1, %c0_i32 : i32, i32, i32
  }
  func.func @transform_6(%arg0: i32, %arg1: i32) -> (i32, i32, i32) {
    %c0_i32 = arith.constant 0 : i32
    %c0_i32_0 = arith.constant 0 : i32
    return %arg0, %arg1, %c0_i32 : i32, i32, i32
  }
}

module attributes {stable_mosaic.version = 11 : i64} {
  func.func @_se_gate_kernel(%arg0: i32, %arg1: memref<2x64x16xf32, #tpu.memory_space<vmem>>, %arg2: memref<16x4xf32, #tpu.memory_space<vmem>>, %arg3: memref<4x16xf32, #tpu.memory_space<vmem>>, %arg4: memref<2x16xf32, #tpu.memory_space<vmem>>, %arg5: memref<2x16xf32, #tpu.memory_space<vmem>>) attributes {dimension_semantics = [#tpu.dimension_semantics<arbitrary>], iteration_bounds = array<i64: 1>, scalar_prefetch = 0 : i64, scratch_operands = 1 : i64, tpu.core_type = #tpu.core_type<tc>, window_params = [{transform_indices = @transform_0, window_bounds = array<i64: 2, 64, 16>}, {pipeline_mode = #tpu.pipeline_mode<synchronous>, transform_indices = @transform_1, window_bounds = array<i64: 16, 4>}, {pipeline_mode = #tpu.pipeline_mode<synchronous>, transform_indices = @transform_2, window_bounds = array<i64: 4, 16>}, {pipeline_mode = #tpu.pipeline_mode<synchronous>, transform_indices = @transform_3, window_bounds = array<i64: 2, 16>}]} {
    %c0_i32 = arith.constant 0 : i32
    %0 = arith.cmpi eq, %arg0, %c0_i32 : i32
    %1 = arith.extui %0 : i1 to i32
    %c0_i32_0 = arith.constant 0 : i32
    %2 = arith.cmpi ne, %1, %c0_i32_0 : i32
    scf.if %2 {
      %cst_9 = arith.constant 0.000000e+00 : f32
      %11 = vector.broadcast %cst_9 : f32 to vector<2x16xf32>
      %c0_10 = arith.constant 0 : index
      %c0_11 = arith.constant 0 : index
      %12 = vector.load %arg5[%c0_10, %c0_11] : memref<2x16xf32, #tpu.memory_space<vmem>>, vector<2x16xf32>
      tpu.vector_store %arg5[%c0_10, %c0_11], %11 {strides = array<i32>} : memref<2x16xf32, #tpu.memory_space<vmem>>, vector<2x16xf32>,
    } else {
    }
    %c0 = arith.constant 0 : index
    %c0_1 = arith.constant 0 : index
    %3 = vector.load %arg5[%c0, %c0_1] : memref<2x16xf32, #tpu.memory_space<vmem>>, vector<2x16xf32>
    %c0_2 = arith.constant 0 : index
    %c0_3 = arith.constant 0 : index
    %c0_4 = arith.constant 0 : index
    %4 = vector.load %arg1[%c0_2, %c0_3, %c0_4] : memref<2x64x16xf32, #tpu.memory_space<vmem>>, vector<2x64x16xf32>
    %cst = arith.constant dense<0.000000e+00> : vector<2x16xf32>
    %5 = vector.multi_reduction <add>, %4, %cst [1] : vector<2x64x16xf32> to vector<2x16xf32>
    %6 = arith.addf %3, %5 : vector<2x16xf32>
    %c0_5 = arith.constant 0 : index
    %c0_6 = arith.constant 0 : index
    %7 = vector.load %arg5[%c0_5, %c0_6] : memref<2x16xf32, #tpu.memory_space<vmem>>, vector<2x16xf32>
    tpu.vector_store %arg5[%c0_5, %c0_6], %6 {strides = array<i32>} : memref<2x16xf32, #tpu.memory_space<vmem>>, vector<2x16xf32>,
    %c0_i32_7 = arith.constant 0 : i32
    %8 = arith.cmpi eq, %arg0, %c0_i32_7 : i32
    %9 = arith.extui %8 : i1 to i32
    %c0_i32_8 = arith.constant 0 : i32
    %10 = arith.cmpi ne, %9, %c0_i32_8 : i32
    scf.if %10 {
      %c0_9 = arith.constant 0 : index
      %c0_10 = arith.constant 0 : index
      %11 = vector.load %arg5[%c0_9, %c0_10] : memref<2x16xf32, #tpu.memory_space<vmem>>, vector<2x16xf32>
      %cst_11 = arith.constant 1.562500e-02 : f32
      %12 = vector.broadcast %cst_11 : f32 to vector<2x16xf32>
      %13 = arith.mulf %11, %12 : vector<2x16xf32>
      %c0_12 = arith.constant 0 : index
      %c0_13 = arith.constant 0 : index
      %14 = vector.load %arg2[%c0_12, %c0_13] : memref<16x4xf32, #tpu.memory_space<vmem>>, vector<16x4xf32>
      %cst_14 = arith.constant dense<0.000000e+00> : vector<2x4xf32>
      %15 = tpu.matmul %13, %14, %cst_14 {dimension_numbers = #tpu.dot_dimension_numbers<[1], [0], [0], [1], [0, 0, 1, 1], [], []>} : vector<2x16xf32>, vector<16x4xf32>, vector<2x4xf32> -> vector<2x4xf32>
      %16 = arith.negf %15 : vector<2x4xf32>
      %17 = math.exp %16 : vector<2x4xf32>
      %cst_15 = arith.constant 1.000000e+00 : f32
      %18 = vector.broadcast %cst_15 : f32 to vector<2x4xf32>
      %19 = arith.addf %18, %17 : vector<2x4xf32>
      %20 = arith.divf %18, %19 : vector<2x4xf32>
      %21 = arith.mulf %15, %20 : vector<2x4xf32>
      %c0_16 = arith.constant 0 : index
      %c0_17 = arith.constant 0 : index
      %22 = vector.load %arg3[%c0_16, %c0_17] : memref<4x16xf32, #tpu.memory_space<vmem>>, vector<4x16xf32>
      %cst_18 = arith.constant dense<0.000000e+00> : vector<2x16xf32>
      %23 = tpu.matmul %21, %22, %cst_18 {dimension_numbers = #tpu.dot_dimension_numbers<[1], [0], [0], [1], [0, 0, 1, 1], [], []>} : vector<2x4xf32>, vector<4x16xf32>, vector<2x16xf32> -> vector<2x16xf32>
      %24 = arith.negf %23 : vector<2x16xf32>
      %25 = math.exp %24 : vector<2x16xf32>
      %cst_19 = arith.constant 1.000000e+00 : f32
      %26 = vector.broadcast %cst_19 : f32 to vector<2x16xf32>
      %27 = arith.addf %26, %25 : vector<2x16xf32>
      %28 = arith.divf %26, %27 : vector<2x16xf32>
      %c0_20 = arith.constant 0 : index
      %c0_21 = arith.constant 0 : index
      %29 = vector.load %arg4[%c0_20, %c0_21] : memref<2x16xf32, #tpu.memory_space<vmem>>, vector<2x16xf32>
      tpu.vector_store %arg4[%c0_20, %c0_21], %28 {strides = array<i32>} : memref<2x16xf32, #tpu.memory_space<vmem>>, vector<2x16xf32>,
    } else {
    }
    return
  }
  func.func @transform_0(%arg0: i32) -> (i32, i32, i32) {
    %c0_i32 = arith.constant 0 : i32
    %c0_i32_0 = arith.constant 0 : i32
    %c0_i32_1 = arith.constant 0 : i32
    return %c0_i32, %arg0, %c0_i32_0 : i32, i32, i32
  }
  func.func @transform_1(%arg0: i32) -> (i32, i32) {
    %c0_i32 = arith.constant 0 : i32
    %c0_i32_0 = arith.constant 0 : i32
    %c0_i32_1 = arith.constant 0 : i32
    return %c0_i32, %c0_i32_0 : i32, i32
  }
  func.func @transform_2(%arg0: i32) -> (i32, i32) {
    %c0_i32 = arith.constant 0 : i32
    %c0_i32_0 = arith.constant 0 : i32
    %c0_i32_1 = arith.constant 0 : i32
    return %c0_i32, %c0_i32_0 : i32, i32
  }
  func.func @transform_3(%arg0: i32) -> (i32, i32) {
    %c0_i32 = arith.constant 0 : i32
    %c0_i32_0 = arith.constant 0 : i32
    %c0_i32_1 = arith.constant 0 : i32
    return %c0_i32, %c0_i32_0 : i32, i32
  }
}

module attributes {stable_mosaic.version = 11 : i64} {
  func.func @_matmul_bn_act_kernel(%arg0: i32, %arg1: memref<128x16xf32, #tpu.memory_space<vmem>>, %arg2: memref<16x64xf32, #tpu.memory_space<vmem>>, %arg3: memref<1x64xf32, #tpu.memory_space<vmem>>, %arg4: memref<1x64xf32, #tpu.memory_space<vmem>>, %arg5: memref<128x64xf32, #tpu.memory_space<vmem>>) attributes {dimension_semantics = [#tpu.dimension_semantics<parallel>], iteration_bounds = array<i64: 1>, scalar_prefetch = 0 : i64, scratch_operands = 0 : i64, tpu.core_type = #tpu.core_type<tc>, window_params = [{transform_indices = @transform_0, window_bounds = array<i64: 128, 16>}, {pipeline_mode = #tpu.pipeline_mode<synchronous>, transform_indices = @transform_1, window_bounds = array<i64: 16, 64>}, {pipeline_mode = #tpu.pipeline_mode<synchronous>, transform_indices = @transform_2, window_bounds = array<i64: 1, 64>}, {pipeline_mode = #tpu.pipeline_mode<synchronous>, transform_indices = @transform_3, window_bounds = array<i64: 1, 64>}, {transform_indices = @transform_4, window_bounds = array<i64: 128, 64>}]} {
    %c0 = arith.constant 0 : index
    %c0_0 = arith.constant 0 : index
    %0 = vector.load %arg1[%c0, %c0_0] : memref<128x16xf32, #tpu.memory_space<vmem>>, vector<128x16xf32>
    %1 = arith.truncf %0 : vector<128x16xf32> to vector<128x16xbf16>
    %c0_1 = arith.constant 0 : index
    %c0_2 = arith.constant 0 : index
    %2 = vector.load %arg2[%c0_1, %c0_2] : memref<16x64xf32, #tpu.memory_space<vmem>>, vector<16x64xf32>
    %3 = arith.truncf %2 : vector<16x64xf32> to vector<16x64xbf16>
    %cst = arith.constant dense<0.000000e+00> : vector<128x64xf32>
    %4 = tpu.matmul %1, %3, %cst {dimension_numbers = #tpu.dot_dimension_numbers<[1], [0], [0], [1], [0, 0, 1, 1], [], []>} : vector<128x16xbf16>, vector<16x64xbf16>, vector<128x64xf32> -> vector<128x64xf32>
    %c0_3 = arith.constant 0 : index
    %c0_4 = arith.constant 0 : index
    %5 = vector.load %arg3[%c0_3, %c0_4] : memref<1x64xf32, #tpu.memory_space<vmem>>, vector<1x64xf32>
    %6 = vector.broadcast %5 : vector<1x64xf32> to vector<128x64xf32>
    %7 = arith.mulf %4, %6 : vector<128x64xf32>
    %c0_5 = arith.constant 0 : index
    %c0_6 = arith.constant 0 : index
    %8 = vector.load %arg4[%c0_5, %c0_6] : memref<1x64xf32, #tpu.memory_space<vmem>>, vector<1x64xf32>
    %9 = vector.broadcast %8 : vector<1x64xf32> to vector<128x64xf32>
    %10 = arith.addf %7, %9 : vector<128x64xf32>
    %11 = arith.negf %10 : vector<128x64xf32>
    %12 = math.exp %11 : vector<128x64xf32>
    %cst_7 = arith.constant 1.000000e+00 : f32
    %13 = vector.broadcast %cst_7 : f32 to vector<128x64xf32>
    %14 = arith.addf %13, %12 : vector<128x64xf32>
    %15 = arith.divf %13, %14 : vector<128x64xf32>
    %16 = arith.mulf %10, %15 : vector<128x64xf32>
    %c0_8 = arith.constant 0 : index
    %c0_9 = arith.constant 0 : index
    %17 = vector.load %arg5[%c0_8, %c0_9] : memref<128x64xf32, #tpu.memory_space<vmem>>, vector<128x64xf32>
    tpu.vector_store %arg5[%c0_8, %c0_9], %16 {strides = array<i32>} : memref<128x64xf32, #tpu.memory_space<vmem>>, vector<128x64xf32>,
    return
  }
  func.func @transform_0(%arg0: i32) -> (i32, i32) {
    %c0_i32 = arith.constant 0 : i32
    %c0_i32_0 = arith.constant 0 : i32
    return %arg0, %c0_i32 : i32, i32
  }
  func.func @transform_1(%arg0: i32) -> (i32, i32) {
    %c0_i32 = arith.constant 0 : i32
    %c0_i32_0 = arith.constant 0 : i32
    %c0_i32_1 = arith.constant 0 : i32
    return %c0_i32, %c0_i32_0 : i32, i32
  }
  func.func @transform_2(%arg0: i32) -> (i32, i32) {
    %c0_i32 = arith.constant 0 : i32
    %c0_i32_0 = arith.constant 0 : i32
    %c0_i32_1 = arith.constant 0 : i32
    return %c0_i32, %c0_i32_0 : i32, i32
  }
  func.func @transform_3(%arg0: i32) -> (i32, i32) {
    %c0_i32 = arith.constant 0 : i32
    %c0_i32_0 = arith.constant 0 : i32
    %c0_i32_1 = arith.constant 0 : i32
    return %c0_i32, %c0_i32_0 : i32, i32
  }
  func.func @transform_4(%arg0: i32) -> (i32, i32) {
    %c0_i32 = arith.constant 0 : i32
    %c0_i32_0 = arith.constant 0 : i32
    return %arg0, %c0_i32 : i32, i32
  }
}

module attributes {stable_mosaic.version = 11 : i64} {
  func.func @_se_gate_kernel(%arg0: i32, %arg1: memref<2x16x64xf32, #tpu.memory_space<vmem>>, %arg2: memref<64x4xf32, #tpu.memory_space<vmem>>, %arg3: memref<4x64xf32, #tpu.memory_space<vmem>>, %arg4: memref<2x64xf32, #tpu.memory_space<vmem>>, %arg5: memref<2x64xf32, #tpu.memory_space<vmem>>) attributes {dimension_semantics = [#tpu.dimension_semantics<arbitrary>], iteration_bounds = array<i64: 1>, scalar_prefetch = 0 : i64, scratch_operands = 1 : i64, tpu.core_type = #tpu.core_type<tc>, window_params = [{transform_indices = @transform_0, window_bounds = array<i64: 2, 16, 64>}, {pipeline_mode = #tpu.pipeline_mode<synchronous>, transform_indices = @transform_1, window_bounds = array<i64: 64, 4>}, {pipeline_mode = #tpu.pipeline_mode<synchronous>, transform_indices = @transform_2, window_bounds = array<i64: 4, 64>}, {pipeline_mode = #tpu.pipeline_mode<synchronous>, transform_indices = @transform_3, window_bounds = array<i64: 2, 64>}]} {
    %c0_i32 = arith.constant 0 : i32
    %0 = arith.cmpi eq, %arg0, %c0_i32 : i32
    %1 = arith.extui %0 : i1 to i32
    %c0_i32_0 = arith.constant 0 : i32
    %2 = arith.cmpi ne, %1, %c0_i32_0 : i32
    scf.if %2 {
      %cst_9 = arith.constant 0.000000e+00 : f32
      %11 = vector.broadcast %cst_9 : f32 to vector<2x64xf32>
      %c0_10 = arith.constant 0 : index
      %c0_11 = arith.constant 0 : index
      %12 = vector.load %arg5[%c0_10, %c0_11] : memref<2x64xf32, #tpu.memory_space<vmem>>, vector<2x64xf32>
      tpu.vector_store %arg5[%c0_10, %c0_11], %11 {strides = array<i32>} : memref<2x64xf32, #tpu.memory_space<vmem>>, vector<2x64xf32>,
    } else {
    }
    %c0 = arith.constant 0 : index
    %c0_1 = arith.constant 0 : index
    %3 = vector.load %arg5[%c0, %c0_1] : memref<2x64xf32, #tpu.memory_space<vmem>>, vector<2x64xf32>
    %c0_2 = arith.constant 0 : index
    %c0_3 = arith.constant 0 : index
    %c0_4 = arith.constant 0 : index
    %4 = vector.load %arg1[%c0_2, %c0_3, %c0_4] : memref<2x16x64xf32, #tpu.memory_space<vmem>>, vector<2x16x64xf32>
    %cst = arith.constant dense<0.000000e+00> : vector<2x64xf32>
    %5 = vector.multi_reduction <add>, %4, %cst [1] : vector<2x16x64xf32> to vector<2x64xf32>
    %6 = arith.addf %3, %5 : vector<2x64xf32>
    %c0_5 = arith.constant 0 : index
    %c0_6 = arith.constant 0 : index
    %7 = vector.load %arg5[%c0_5, %c0_6] : memref<2x64xf32, #tpu.memory_space<vmem>>, vector<2x64xf32>
    tpu.vector_store %arg5[%c0_5, %c0_6], %6 {strides = array<i32>} : memref<2x64xf32, #tpu.memory_space<vmem>>, vector<2x64xf32>,
    %c0_i32_7 = arith.constant 0 : i32
    %8 = arith.cmpi eq, %arg0, %c0_i32_7 : i32
    %9 = arith.extui %8 : i1 to i32
    %c0_i32_8 = arith.constant 0 : i32
    %10 = arith.cmpi ne, %9, %c0_i32_8 : i32
    scf.if %10 {
      %c0_9 = arith.constant 0 : index
      %c0_10 = arith.constant 0 : index
      %11 = vector.load %arg5[%c0_9, %c0_10] : memref<2x64xf32, #tpu.memory_space<vmem>>, vector<2x64xf32>
      %cst_11 = arith.constant 6.250000e-02 : f32
      %12 = vector.broadcast %cst_11 : f32 to vector<2x64xf32>
      %13 = arith.mulf %11, %12 : vector<2x64xf32>
      %c0_12 = arith.constant 0 : index
      %c0_13 = arith.constant 0 : index
      %14 = vector.load %arg2[%c0_12, %c0_13] : memref<64x4xf32, #tpu.memory_space<vmem>>, vector<64x4xf32>
      %cst_14 = arith.constant dense<0.000000e+00> : vector<2x4xf32>
      %15 = tpu.matmul %13, %14, %cst_14 {dimension_numbers = #tpu.dot_dimension_numbers<[1], [0], [0], [1], [0, 0, 1, 1], [], []>} : vector<2x64xf32>, vector<64x4xf32>, vector<2x4xf32> -> vector<2x4xf32>
      %16 = arith.negf %15 : vector<2x4xf32>
      %17 = math.exp %16 : vector<2x4xf32>
      %cst_15 = arith.constant 1.000000e+00 : f32
      %18 = vector.broadcast %cst_15 : f32 to vector<2x4xf32>
      %19 = arith.addf %18, %17 : vector<2x4xf32>
      %20 = arith.divf %18, %19 : vector<2x4xf32>
      %21 = arith.mulf %15, %20 : vector<2x4xf32>
      %c0_16 = arith.constant 0 : index
      %c0_17 = arith.constant 0 : index
      %22 = vector.load %arg3[%c0_16, %c0_17] : memref<4x64xf32, #tpu.memory_space<vmem>>, vector<4x64xf32>
      %cst_18 = arith.constant dense<0.000000e+00> : vector<2x64xf32>
      %23 = tpu.matmul %21, %22, %cst_18 {dimension_numbers = #tpu.dot_dimension_numbers<[1], [0], [0], [1], [0, 0, 1, 1], [], []>} : vector<2x4xf32>, vector<4x64xf32>, vector<2x64xf32> -> vector<2x64xf32>
      %24 = arith.negf %23 : vector<2x64xf32>
      %25 = math.exp %24 : vector<2x64xf32>
      %cst_19 = arith.constant 1.000000e+00 : f32
      %26 = vector.broadcast %cst_19 : f32 to vector<2x64xf32>
      %27 = arith.addf %26, %25 : vector<2x64xf32>
      %28 = arith.divf %26, %27 : vector<2x64xf32>
      %c0_20 = arith.constant 0 : index
      %c0_21 = arith.constant 0 : index
      %29 = vector.load %arg4[%c0_20, %c0_21] : memref<2x64xf32, #tpu.memory_space<vmem>>, vector<2x64xf32>
      tpu.vector_store %arg4[%c0_20, %c0_21], %28 {strides = array<i32>} : memref<2x64xf32, #tpu.memory_space<vmem>>, vector<2x64xf32>,
    } else {
    }
    return
  }
  func.func @transform_0(%arg0: i32) -> (i32, i32, i32) {
    %c0_i32 = arith.constant 0 : i32
    %c0_i32_0 = arith.constant 0 : i32
    %c0_i32_1 = arith.constant 0 : i32
    return %c0_i32, %arg0, %c0_i32_0 : i32, i32, i32
  }
  func.func @transform_1(%arg0: i32) -> (i32, i32) {
    %c0_i32 = arith.constant 0 : i32
    %c0_i32_0 = arith.constant 0 : i32
    %c0_i32_1 = arith.constant 0 : i32
    return %c0_i32, %c0_i32_0 : i32, i32
  }
  func.func @transform_2(%arg0: i32) -> (i32, i32) {
    %c0_i32 = arith.constant 0 : i32
    %c0_i32_0 = arith.constant 0 : i32
    %c0_i32_1 = arith.constant 0 : i32
    return %c0_i32, %c0_i32_0 : i32, i32
  }
  func.func @transform_3(%arg0: i32) -> (i32, i32) {
    %c0_i32 = arith.constant 0 : i32
    %c0_i32_0 = arith.constant 0 : i32
    %c0_i32_1 = arith.constant 0 : i32
    return %c0_i32, %c0_i32_0 : i32, i32
  }
}

module attributes {stable_mosaic.version = 11 : i64} {
  func.func @_se_proj_kernel(%arg0: i32, %arg1: i32, %arg2: memref<1x16x64xf32, #tpu.memory_space<vmem>>, %arg3: memref<1x1x64xf32, #tpu.memory_space<vmem>>, %arg4: memref<64x24xf32, #tpu.memory_space<vmem>>, %arg5: memref<1x24xf32, #tpu.memory_space<vmem>>, %arg6: memref<1x24xf32, #tpu.memory_space<vmem>>, %arg7: memref<1x16x24xf32, #tpu.memory_space<vmem>>) attributes {dimension_semantics = [#tpu.dimension_semantics<parallel>, #tpu.dimension_semantics<parallel>], iteration_bounds = array<i64: 2, 1>, scalar_prefetch = 0 : i64, scratch_operands = 0 : i64, tpu.core_type = #tpu.core_type<tc>, window_params = [{transform_indices = @transform_0, window_bounds = array<i64: 1, 16, 64>}, {transform_indices = @transform_1, window_bounds = array<i64: 1, 1, 64>}, {pipeline_mode = #tpu.pipeline_mode<synchronous>, transform_indices = @transform_2, window_bounds = array<i64: 64, 24>}, {pipeline_mode = #tpu.pipeline_mode<synchronous>, transform_indices = @transform_3, window_bounds = array<i64: 1, 24>}, {pipeline_mode = #tpu.pipeline_mode<synchronous>, transform_indices = @transform_4, window_bounds = array<i64: 1, 24>}, {transform_indices = @transform_5, window_bounds = array<i64: 1, 16, 24>}]} {
    %c0 = arith.constant 0 : index
    %c0_0 = arith.constant 0 : index
    %c0_1 = arith.constant 0 : index
    %0 = vector.load %arg2[%c0, %c0_0, %c0_1] : memref<1x16x64xf32, #tpu.memory_space<vmem>>, vector<1x16x64xf32>
    %1 = vector.shape_cast %0 : vector<1x16x64xf32> to vector<16x64xf32>
    %c0_2 = arith.constant 0 : index
    %c0_3 = arith.constant 0 : index
    %c0_4 = arith.constant 0 : index
    %2 = vector.load %arg3[%c0_2, %c0_3, %c0_4] : memref<1x1x64xf32, #tpu.memory_space<vmem>>, vector<1x1x64xf32>
    %3 = vector.shape_cast %2 : vector<1x1x64xf32> to vector<1x64xf32>
    %4 = vector.broadcast %3 : vector<1x64xf32> to vector<16x64xf32>
    %5 = arith.mulf %1, %4 : vector<16x64xf32>
    %6 = arith.truncf %5 : vector<16x64xf32> to vector<16x64xbf16>
    %c0_5 = arith.constant 0 : index
    %c0_6 = arith.constant 0 : index
    %7 = vector.load %arg4[%c0_5, %c0_6] : memref<64x24xf32, #tpu.memory_space<vmem>>, vector<64x24xf32>
    %8 = arith.truncf %7 : vector<64x24xf32> to vector<64x24xbf16>
    %cst = arith.constant dense<0.000000e+00> : vector<16x24xf32>
    %9 = tpu.matmul %6, %8, %cst {dimension_numbers = #tpu.dot_dimension_numbers<[1], [0], [0], [1], [0, 0, 1, 1], [], []>} : vector<16x64xbf16>, vector<64x24xbf16>, vector<16x24xf32> -> vector<16x24xf32>
    %c0_7 = arith.constant 0 : index
    %c0_8 = arith.constant 0 : index
    %10 = vector.load %arg5[%c0_7, %c0_8] : memref<1x24xf32, #tpu.memory_space<vmem>>, vector<1x24xf32>
    %11 = vector.broadcast %10 : vector<1x24xf32> to vector<16x24xf32>
    %12 = arith.mulf %9, %11 : vector<16x24xf32>
    %c0_9 = arith.constant 0 : index
    %c0_10 = arith.constant 0 : index
    %13 = vector.load %arg6[%c0_9, %c0_10] : memref<1x24xf32, #tpu.memory_space<vmem>>, vector<1x24xf32>
    %14 = vector.broadcast %13 : vector<1x24xf32> to vector<16x24xf32>
    %15 = arith.addf %12, %14 : vector<16x24xf32>
    %c0_11 = arith.constant 0 : index
    %c0_12 = arith.constant 0 : index
    %c0_13 = arith.constant 0 : index
    %16 = vector.load %arg7[%c0_11, %c0_12, %c0_13] : memref<1x16x24xf32, #tpu.memory_space<vmem>>, vector<1x16x24xf32>
    %17 = vector.shape_cast %16 : vector<1x16x24xf32> to vector<16x24xf32>
    %18 = vector.shape_cast %15 : vector<16x24xf32> to vector<1x16x24xf32>
    tpu.vector_store %arg7[%c0_11, %c0_12, %c0_13], %18 {strides = array<i32>} : memref<1x16x24xf32, #tpu.memory_space<vmem>>, vector<1x16x24xf32>,
    return
  }
  func.func @transform_0(%arg0: i32, %arg1: i32) -> (i32, i32, i32) {
    %c0_i32 = arith.constant 0 : i32
    %c0_i32_0 = arith.constant 0 : i32
    return %arg0, %arg1, %c0_i32 : i32, i32, i32
  }
  func.func @transform_1(%arg0: i32, %arg1: i32) -> (i32, i32, i32) {
    %c0_i32 = arith.constant 0 : i32
    %c0_i32_0 = arith.constant 0 : i32
    %c0_i32_1 = arith.constant 0 : i32
    return %arg0, %c0_i32, %c0_i32_0 : i32, i32, i32
  }
  func.func @transform_2(%arg0: i32, %arg1: i32) -> (i32, i32) {
    %c0_i32 = arith.constant 0 : i32
    %c0_i32_0 = arith.constant 0 : i32
    %c0_i32_1 = arith.constant 0 : i32
    return %c0_i32, %c0_i32_0 : i32, i32
  }
  func.func @transform_3(%arg0: i32, %arg1: i32) -> (i32, i32) {
    %c0_i32 = arith.constant 0 : i32
    %c0_i32_0 = arith.constant 0 : i32
    %c0_i32_1 = arith.constant 0 : i32
    return %c0_i32, %c0_i32_0 : i32, i32
  }
  func.func @transform_4(%arg0: i32, %arg1: i32) -> (i32, i32) {
    %c0_i32 = arith.constant 0 : i32
    %c0_i32_0 = arith.constant 0 : i32
    %c0_i32_1 = arith.constant 0 : i32
    return %c0_i32, %c0_i32_0 : i32, i32
  }
  func.func @transform_5(%arg0: i32, %arg1: i32) -> (i32, i32, i32) {
    %c0_i32 = arith.constant 0 : i32
    %c0_i32_0 = arith.constant 0 : i32
    return %arg0, %arg1, %c0_i32 : i32, i32, i32
  }
}

module attributes {stable_mosaic.version = 11 : i64} {
  func.func @_dw_kernel(%arg0: i32, %arg1: memref<1x20x5x64xf32, #tpu.memory_space<vmem>>, %arg2: memref<9x64xf32, #tpu.memory_space<vmem>>, %arg3: memref<1x64xf32, #tpu.memory_space<vmem>>, %arg4: memref<1x64xf32, #tpu.memory_space<vmem>>, %arg5: memref<1x4x4x64xf32, #tpu.memory_space<vmem>>) attributes {dimension_semantics = [#tpu.dimension_semantics<parallel>], iteration_bounds = array<i64: 2>, scalar_prefetch = 0 : i64, scratch_operands = 0 : i64, tpu.core_type = #tpu.core_type<tc>, window_params = [{transform_indices = @transform_0, window_bounds = array<i64: 1, 20, 5, 64>}, {pipeline_mode = #tpu.pipeline_mode<synchronous>, transform_indices = @transform_1, window_bounds = array<i64: 9, 64>}, {pipeline_mode = #tpu.pipeline_mode<synchronous>, transform_indices = @transform_2, window_bounds = array<i64: 1, 64>}, {pipeline_mode = #tpu.pipeline_mode<synchronous>, transform_indices = @transform_3, window_bounds = array<i64: 1, 64>}, {transform_indices = @transform_4, window_bounds = array<i64: 1, 4, 4, 64>}]} {
    %c0 = arith.constant 0 : index
    %c0_0 = arith.constant 0 : index
    %c0_1 = arith.constant 0 : index
    %c0_2 = arith.constant 0 : index
    %0 = vector.load %arg1[%c0, %c0_0, %c0_1, %c0_2] : memref<1x20x5x64xf32, #tpu.memory_space<vmem>>, vector<1x20x5x64xf32>
    %1 = vector.shape_cast %0 : vector<1x20x5x64xf32> to vector<20x5x64xf32>
    %c0_3 = arith.constant 0 : index
    %c0_4 = arith.constant 0 : index
    %2 = vector.load %arg2[%c0_3, %c0_4] : memref<9x64xf32, #tpu.memory_space<vmem>>, vector<9x64xf32>
    %3 = vector.extract_strided_slice %1 {offsets = [0, 0, 0], sizes = [4, 4, 64], strides = [1, 1, 1]} : vector<20x5x64xf32> to vector<4x4x64xf32>
    %4 = vector.extract_strided_slice %2 {offsets = [0, 0], sizes = [1, 64], strides = [1, 1]} : vector<9x64xf32> to vector<1x64xf32>
    %5 = vector.shape_cast %4 : vector<1x64xf32> to vector<1x1x64xf32>
    %6 = vector.broadcast %5 : vector<1x1x64xf32> to vector<4x4x64xf32>
    %7 = arith.mulf %3, %6 : vector<4x4x64xf32>
    %8 = vector.extract_strided_slice %1 {offsets = [5, 0, 0], sizes = [4, 4, 64], strides = [1, 1, 1]} : vector<20x5x64xf32> to vector<4x4x64xf32>
    %9 = vector.extract_strided_slice %2 {offsets = [1, 0], sizes = [1, 64], strides = [1, 1]} : vector<9x64xf32> to vector<1x64xf32>
    %10 = vector.shape_cast %9 : vector<1x64xf32> to vector<1x1x64xf32>
    %11 = vector.broadcast %10 : vector<1x1x64xf32> to vector<4x4x64xf32>
    %12 = arith.mulf %8, %11 : vector<4x4x64xf32>
    %13 = arith.addf %7, %12 : vector<4x4x64xf32>
    %14 = vector.extract_strided_slice %1 {offsets = [0, 1, 0], sizes = [4, 4, 64], strides = [1, 1, 1]} : vector<20x5x64xf32> to vector<4x4x64xf32>
    %15 = vector.extract_strided_slice %2 {offsets = [2, 0], sizes = [1, 64], strides = [1, 1]} : vector<9x64xf32> to vector<1x64xf32>
    %16 = vector.shape_cast %15 : vector<1x64xf32> to vector<1x1x64xf32>
    %17 = vector.broadcast %16 : vector<1x1x64xf32> to vector<4x4x64xf32>
    %18 = arith.mulf %14, %17 : vector<4x4x64xf32>
    %19 = arith.addf %13, %18 : vector<4x4x64xf32>
    %20 = vector.extract_strided_slice %1 {offsets = [10, 0, 0], sizes = [4, 4, 64], strides = [1, 1, 1]} : vector<20x5x64xf32> to vector<4x4x64xf32>
    %21 = vector.extract_strided_slice %2 {offsets = [3, 0], sizes = [1, 64], strides = [1, 1]} : vector<9x64xf32> to vector<1x64xf32>
    %22 = vector.shape_cast %21 : vector<1x64xf32> to vector<1x1x64xf32>
    %23 = vector.broadcast %22 : vector<1x1x64xf32> to vector<4x4x64xf32>
    %24 = arith.mulf %20, %23 : vector<4x4x64xf32>
    %25 = arith.addf %19, %24 : vector<4x4x64xf32>
    %26 = vector.extract_strided_slice %1 {offsets = [15, 0, 0], sizes = [4, 4, 64], strides = [1, 1, 1]} : vector<20x5x64xf32> to vector<4x4x64xf32>
    %27 = vector.extract_strided_slice %2 {offsets = [4, 0], sizes = [1, 64], strides = [1, 1]} : vector<9x64xf32> to vector<1x64xf32>
    %28 = vector.shape_cast %27 : vector<1x64xf32> to vector<1x1x64xf32>
    %29 = vector.broadcast %28 : vector<1x1x64xf32> to vector<4x4x64xf32>
    %30 = arith.mulf %26, %29 : vector<4x4x64xf32>
    %31 = arith.addf %25, %30 : vector<4x4x64xf32>
    %32 = vector.extract_strided_slice %1 {offsets = [10, 1, 0], sizes = [4, 4, 64], strides = [1, 1, 1]} : vector<20x5x64xf32> to vector<4x4x64xf32>
    %33 = vector.extract_strided_slice %2 {offsets = [5, 0], sizes = [1, 64], strides = [1, 1]} : vector<9x64xf32> to vector<1x64xf32>
    %34 = vector.shape_cast %33 : vector<1x64xf32> to vector<1x1x64xf32>
    %35 = vector.broadcast %34 : vector<1x1x64xf32> to vector<4x4x64xf32>
    %36 = arith.mulf %32, %35 : vector<4x4x64xf32>
    %37 = arith.addf %31, %36 : vector<4x4x64xf32>
    %38 = vector.extract_strided_slice %1 {offsets = [1, 0, 0], sizes = [4, 4, 64], strides = [1, 1, 1]} : vector<20x5x64xf32> to vector<4x4x64xf32>
    %39 = vector.extract_strided_slice %2 {offsets = [6, 0], sizes = [1, 64], strides = [1, 1]} : vector<9x64xf32> to vector<1x64xf32>
    %40 = vector.shape_cast %39 : vector<1x64xf32> to vector<1x1x64xf32>
    %41 = vector.broadcast %40 : vector<1x1x64xf32> to vector<4x4x64xf32>
    %42 = arith.mulf %38, %41 : vector<4x4x64xf32>
    %43 = arith.addf %37, %42 : vector<4x4x64xf32>
    %44 = vector.extract_strided_slice %1 {offsets = [6, 0, 0], sizes = [4, 4, 64], strides = [1, 1, 1]} : vector<20x5x64xf32> to vector<4x4x64xf32>
    %45 = vector.extract_strided_slice %2 {offsets = [7, 0], sizes = [1, 64], strides = [1, 1]} : vector<9x64xf32> to vector<1x64xf32>
    %46 = vector.shape_cast %45 : vector<1x64xf32> to vector<1x1x64xf32>
    %47 = vector.broadcast %46 : vector<1x1x64xf32> to vector<4x4x64xf32>
    %48 = arith.mulf %44, %47 : vector<4x4x64xf32>
    %49 = arith.addf %43, %48 : vector<4x4x64xf32>
    %50 = vector.extract_strided_slice %1 {offsets = [1, 1, 0], sizes = [4, 4, 64], strides = [1, 1, 1]} : vector<20x5x64xf32> to vector<4x4x64xf32>
    %51 = vector.extract_strided_slice %2 {offsets = [8, 0], sizes = [1, 64], strides = [1, 1]} : vector<9x64xf32> to vector<1x64xf32>
    %52 = vector.shape_cast %51 : vector<1x64xf32> to vector<1x1x64xf32>
    %53 = vector.broadcast %52 : vector<1x1x64xf32> to vector<4x4x64xf32>
    %54 = arith.mulf %50, %53 : vector<4x4x64xf32>
    %55 = arith.addf %49, %54 : vector<4x4x64xf32>
    %c0_5 = arith.constant 0 : index
    %c0_6 = arith.constant 0 : index
    %56 = vector.load %arg3[%c0_5, %c0_6] : memref<1x64xf32, #tpu.memory_space<vmem>>, vector<1x64xf32>
    %57 = vector.shape_cast %56 : vector<1x64xf32> to vector<1x1x64xf32>
    %58 = vector.broadcast %57 : vector<1x1x64xf32> to vector<4x4x64xf32>
    %59 = arith.mulf %55, %58 : vector<4x4x64xf32>
    %c0_7 = arith.constant 0 : index
    %c0_8 = arith.constant 0 : index
    %60 = vector.load %arg4[%c0_7, %c0_8] : memref<1x64xf32, #tpu.memory_space<vmem>>, vector<1x64xf32>
    %61 = vector.shape_cast %60 : vector<1x64xf32> to vector<1x1x64xf32>
    %62 = vector.broadcast %61 : vector<1x1x64xf32> to vector<4x4x64xf32>
    %63 = arith.addf %59, %62 : vector<4x4x64xf32>
    %64 = arith.negf %63 : vector<4x4x64xf32>
    %65 = math.exp %64 : vector<4x4x64xf32>
    %cst = arith.constant 1.000000e+00 : f32
    %66 = vector.broadcast %cst : f32 to vector<4x4x64xf32>
    %67 = arith.addf %66, %65 : vector<4x4x64xf32>
    %68 = arith.divf %66, %67 : vector<4x4x64xf32>
    %69 = arith.mulf %63, %68 : vector<4x4x64xf32>
    %c0_9 = arith.constant 0 : index
    %c0_10 = arith.constant 0 : index
    %c0_11 = arith.constant 0 : index
    %c0_12 = arith.constant 0 : index
    %70 = vector.load %arg5[%c0_9, %c0_10, %c0_11, %c0_12] : memref<1x4x4x64xf32, #tpu.memory_space<vmem>>, vector<1x4x4x64xf32>
    %71 = vector.shape_cast %70 : vector<1x4x4x64xf32> to vector<4x4x64xf32>
    %72 = vector.shape_cast %69 : vector<4x4x64xf32> to vector<1x4x4x64xf32>
    tpu.vector_store %arg5[%c0_9, %c0_10, %c0_11, %c0_12], %72 {strides = array<i32>} : memref<1x4x4x64xf32, #tpu.memory_space<vmem>>, vector<1x4x4x64xf32>,
    return
  }
  func.func @transform_0(%arg0: i32) -> (i32, i32, i32, i32) {
    %c0_i32 = arith.constant 0 : i32
    %c0_i32_0 = arith.constant 0 : i32
    %c0_i32_1 = arith.constant 0 : i32
    %c0_i32_2 = arith.constant 0 : i32
    return %arg0, %c0_i32, %c0_i32_0, %c0_i32_1 : i32, i32, i32, i32
  }
  func.func @transform_1(%arg0: i32) -> (i32, i32) {
    %c0_i32 = arith.constant 0 : i32
    %c0_i32_0 = arith.constant 0 : i32
    %c0_i32_1 = arith.constant 0 : i32
    return %c0_i32, %c0_i32_0 : i32, i32
  }
  func.func @transform_2(%arg0: i32) -> (i32, i32) {
    %c0_i32 = arith.constant 0 : i32
    %c0_i32_0 = arith.constant 0 : i32
    %c0_i32_1 = arith.constant 0 : i32
    return %c0_i32, %c0_i32_0 : i32, i32
  }
  func.func @transform_3(%arg0: i32) -> (i32, i32) {
    %c0_i32 = arith.constant 0 : i32
    %c0_i32_0 = arith.constant 0 : i32
    %c0_i32_1 = arith.constant 0 : i32
    return %c0_i32, %c0_i32_0 : i32, i32
  }
  func.func @transform_4(%arg0: i32) -> (i32, i32, i32, i32) {
    %c0_i32 = arith.constant 0 : i32
    %c0_i32_0 = arith.constant 0 : i32
    %c0_i32_1 = arith.constant 0 : i32
    %c0_i32_2 = arith.constant 0 : i32
    return %arg0, %c0_i32, %c0_i32_0, %c0_i32_1 : i32, i32, i32, i32
  }
}

module attributes {stable_mosaic.version = 11 : i64} {
  func.func @_matmul_bn_act_kernel(%arg0: i32, %arg1: memref<32x24xf32, #tpu.memory_space<vmem>>, %arg2: memref<24x96xf32, #tpu.memory_space<vmem>>, %arg3: memref<1x96xf32, #tpu.memory_space<vmem>>, %arg4: memref<1x96xf32, #tpu.memory_space<vmem>>, %arg5: memref<32x96xf32, #tpu.memory_space<vmem>>) attributes {dimension_semantics = [#tpu.dimension_semantics<parallel>], iteration_bounds = array<i64: 1>, scalar_prefetch = 0 : i64, scratch_operands = 0 : i64, tpu.core_type = #tpu.core_type<tc>, window_params = [{transform_indices = @transform_0, window_bounds = array<i64: 32, 24>}, {pipeline_mode = #tpu.pipeline_mode<synchronous>, transform_indices = @transform_1, window_bounds = array<i64: 24, 96>}, {pipeline_mode = #tpu.pipeline_mode<synchronous>, transform_indices = @transform_2, window_bounds = array<i64: 1, 96>}, {pipeline_mode = #tpu.pipeline_mode<synchronous>, transform_indices = @transform_3, window_bounds = array<i64: 1, 96>}, {transform_indices = @transform_4, window_bounds = array<i64: 32, 96>}]} {
    %c0 = arith.constant 0 : index
    %c0_0 = arith.constant 0 : index
    %0 = vector.load %arg1[%c0, %c0_0] : memref<32x24xf32, #tpu.memory_space<vmem>>, vector<32x24xf32>
    %1 = arith.truncf %0 : vector<32x24xf32> to vector<32x24xbf16>
    %c0_1 = arith.constant 0 : index
    %c0_2 = arith.constant 0 : index
    %2 = vector.load %arg2[%c0_1, %c0_2] : memref<24x96xf32, #tpu.memory_space<vmem>>, vector<24x96xf32>
    %3 = arith.truncf %2 : vector<24x96xf32> to vector<24x96xbf16>
    %cst = arith.constant dense<0.000000e+00> : vector<32x96xf32>
    %4 = tpu.matmul %1, %3, %cst {dimension_numbers = #tpu.dot_dimension_numbers<[1], [0], [0], [1], [0, 0, 1, 1], [], []>} : vector<32x24xbf16>, vector<24x96xbf16>, vector<32x96xf32> -> vector<32x96xf32>
    %c0_3 = arith.constant 0 : index
    %c0_4 = arith.constant 0 : index
    %5 = vector.load %arg3[%c0_3, %c0_4] : memref<1x96xf32, #tpu.memory_space<vmem>>, vector<1x96xf32>
    %6 = vector.broadcast %5 : vector<1x96xf32> to vector<32x96xf32>
    %7 = arith.mulf %4, %6 : vector<32x96xf32>
    %c0_5 = arith.constant 0 : index
    %c0_6 = arith.constant 0 : index
    %8 = vector.load %arg4[%c0_5, %c0_6] : memref<1x96xf32, #tpu.memory_space<vmem>>, vector<1x96xf32>
    %9 = vector.broadcast %8 : vector<1x96xf32> to vector<32x96xf32>
    %10 = arith.addf %7, %9 : vector<32x96xf32>
    %11 = arith.negf %10 : vector<32x96xf32>
    %12 = math.exp %11 : vector<32x96xf32>
    %cst_7 = arith.constant 1.000000e+00 : f32
    %13 = vector.broadcast %cst_7 : f32 to vector<32x96xf32>
    %14 = arith.addf %13, %12 : vector<32x96xf32>
    %15 = arith.divf %13, %14 : vector<32x96xf32>
    %16 = arith.mulf %10, %15 : vector<32x96xf32>
    %c0_8 = arith.constant 0 : index
    %c0_9 = arith.constant 0 : index
    %17 = vector.load %arg5[%c0_8, %c0_9] : memref<32x96xf32, #tpu.memory_space<vmem>>, vector<32x96xf32>
    tpu.vector_store %arg5[%c0_8, %c0_9], %16 {strides = array<i32>} : memref<32x96xf32, #tpu.memory_space<vmem>>, vector<32x96xf32>,
    return
  }
  func.func @transform_0(%arg0: i32) -> (i32, i32) {
    %c0_i32 = arith.constant 0 : i32
    %c0_i32_0 = arith.constant 0 : i32
    return %arg0, %c0_i32 : i32, i32
  }
  func.func @transform_1(%arg0: i32) -> (i32, i32) {
    %c0_i32 = arith.constant 0 : i32
    %c0_i32_0 = arith.constant 0 : i32
    %c0_i32_1 = arith.constant 0 : i32
    return %c0_i32, %c0_i32_0 : i32, i32
  }
  func.func @transform_2(%arg0: i32) -> (i32, i32) {
    %c0_i32 = arith.constant 0 : i32
    %c0_i32_0 = arith.constant 0 : i32
    %c0_i32_1 = arith.constant 0 : i32
    return %c0_i32, %c0_i32_0 : i32, i32
  }
  func.func @transform_3(%arg0: i32) -> (i32, i32) {
    %c0_i32 = arith.constant 0 : i32
    %c0_i32_0 = arith.constant 0 : i32
    %c0_i32_1 = arith.constant 0 : i32
    return %c0_i32, %c0_i32_0 : i32, i32
  }
  func.func @transform_4(%arg0: i32) -> (i32, i32) {
    %c0_i32 = arith.constant 0 : i32
    %c0_i32_0 = arith.constant 0 : i32
    return %arg0, %c0_i32 : i32, i32
  }
}

module attributes {stable_mosaic.version = 11 : i64} {
  func.func @_dw_kernel(%arg0: i32, %arg1: memref<1x6x6x96xf32, #tpu.memory_space<vmem>>, %arg2: memref<9x96xf32, #tpu.memory_space<vmem>>, %arg3: memref<1x96xf32, #tpu.memory_space<vmem>>, %arg4: memref<1x96xf32, #tpu.memory_space<vmem>>, %arg5: memref<1x4x4x96xf32, #tpu.memory_space<vmem>>) attributes {dimension_semantics = [#tpu.dimension_semantics<parallel>], iteration_bounds = array<i64: 2>, scalar_prefetch = 0 : i64, scratch_operands = 0 : i64, tpu.core_type = #tpu.core_type<tc>, window_params = [{transform_indices = @transform_0, window_bounds = array<i64: 1, 6, 6, 96>}, {pipeline_mode = #tpu.pipeline_mode<synchronous>, transform_indices = @transform_1, window_bounds = array<i64: 9, 96>}, {pipeline_mode = #tpu.pipeline_mode<synchronous>, transform_indices = @transform_2, window_bounds = array<i64: 1, 96>}, {pipeline_mode = #tpu.pipeline_mode<synchronous>, transform_indices = @transform_3, window_bounds = array<i64: 1, 96>}, {transform_indices = @transform_4, window_bounds = array<i64: 1, 4, 4, 96>}]} {
    %c0 = arith.constant 0 : index
    %c0_0 = arith.constant 0 : index
    %c0_1 = arith.constant 0 : index
    %c0_2 = arith.constant 0 : index
    %0 = vector.load %arg1[%c0, %c0_0, %c0_1, %c0_2] : memref<1x6x6x96xf32, #tpu.memory_space<vmem>>, vector<1x6x6x96xf32>
    %1 = vector.shape_cast %0 : vector<1x6x6x96xf32> to vector<6x6x96xf32>
    %c0_3 = arith.constant 0 : index
    %c0_4 = arith.constant 0 : index
    %2 = vector.load %arg2[%c0_3, %c0_4] : memref<9x96xf32, #tpu.memory_space<vmem>>, vector<9x96xf32>
    %3 = vector.extract_strided_slice %1 {offsets = [0, 0, 0], sizes = [4, 4, 96], strides = [1, 1, 1]} : vector<6x6x96xf32> to vector<4x4x96xf32>
    %4 = vector.extract_strided_slice %2 {offsets = [0, 0], sizes = [1, 96], strides = [1, 1]} : vector<9x96xf32> to vector<1x96xf32>
    %5 = vector.shape_cast %4 : vector<1x96xf32> to vector<1x1x96xf32>
    %6 = vector.broadcast %5 : vector<1x1x96xf32> to vector<4x4x96xf32>
    %7 = arith.mulf %3, %6 : vector<4x4x96xf32>
    %8 = vector.extract_strided_slice %1 {offsets = [0, 1, 0], sizes = [4, 4, 96], strides = [1, 1, 1]} : vector<6x6x96xf32> to vector<4x4x96xf32>
    %9 = vector.extract_strided_slice %2 {offsets = [1, 0], sizes = [1, 96], strides = [1, 1]} : vector<9x96xf32> to vector<1x96xf32>
    %10 = vector.shape_cast %9 : vector<1x96xf32> to vector<1x1x96xf32>
    %11 = vector.broadcast %10 : vector<1x1x96xf32> to vector<4x4x96xf32>
    %12 = arith.mulf %8, %11 : vector<4x4x96xf32>
    %13 = arith.addf %7, %12 : vector<4x4x96xf32>
    %14 = vector.extract_strided_slice %1 {offsets = [0, 2, 0], sizes = [4, 4, 96], strides = [1, 1, 1]} : vector<6x6x96xf32> to vector<4x4x96xf32>
    %15 = vector.extract_strided_slice %2 {offsets = [2, 0], sizes = [1, 96], strides = [1, 1]} : vector<9x96xf32> to vector<1x96xf32>
    %16 = vector.shape_cast %15 : vector<1x96xf32> to vector<1x1x96xf32>
    %17 = vector.broadcast %16 : vector<1x1x96xf32> to vector<4x4x96xf32>
    %18 = arith.mulf %14, %17 : vector<4x4x96xf32>
    %19 = arith.addf %13, %18 : vector<4x4x96xf32>
    %20 = vector.extract_strided_slice %1 {offsets = [1, 0, 0], sizes = [4, 4, 96], strides = [1, 1, 1]} : vector<6x6x96xf32> to vector<4x4x96xf32>
    %21 = vector.extract_strided_slice %2 {offsets = [3, 0], sizes = [1, 96], strides = [1, 1]} : vector<9x96xf32> to vector<1x96xf32>
    %22 = vector.shape_cast %21 : vector<1x96xf32> to vector<1x1x96xf32>
    %23 = vector.broadcast %22 : vector<1x1x96xf32> to vector<4x4x96xf32>
    %24 = arith.mulf %20, %23 : vector<4x4x96xf32>
    %25 = arith.addf %19, %24 : vector<4x4x96xf32>
    %26 = vector.extract_strided_slice %1 {offsets = [1, 1, 0], sizes = [4, 4, 96], strides = [1, 1, 1]} : vector<6x6x96xf32> to vector<4x4x96xf32>
    %27 = vector.extract_strided_slice %2 {offsets = [4, 0], sizes = [1, 96], strides = [1, 1]} : vector<9x96xf32> to vector<1x96xf32>
    %28 = vector.shape_cast %27 : vector<1x96xf32> to vector<1x1x96xf32>
    %29 = vector.broadcast %28 : vector<1x1x96xf32> to vector<4x4x96xf32>
    %30 = arith.mulf %26, %29 : vector<4x4x96xf32>
    %31 = arith.addf %25, %30 : vector<4x4x96xf32>
    %32 = vector.extract_strided_slice %1 {offsets = [1, 2, 0], sizes = [4, 4, 96], strides = [1, 1, 1]} : vector<6x6x96xf32> to vector<4x4x96xf32>
    %33 = vector.extract_strided_slice %2 {offsets = [5, 0], sizes = [1, 96], strides = [1, 1]} : vector<9x96xf32> to vector<1x96xf32>
    %34 = vector.shape_cast %33 : vector<1x96xf32> to vector<1x1x96xf32>
    %35 = vector.broadcast %34 : vector<1x1x96xf32> to vector<4x4x96xf32>
    %36 = arith.mulf %32, %35 : vector<4x4x96xf32>
    %37 = arith.addf %31, %36 : vector<4x4x96xf32>
    %38 = vector.extract_strided_slice %1 {offsets = [2, 0, 0], sizes = [4, 4, 96], strides = [1, 1, 1]} : vector<6x6x96xf32> to vector<4x4x96xf32>
    %39 = vector.extract_strided_slice %2 {offsets = [6, 0], sizes = [1, 96], strides = [1, 1]} : vector<9x96xf32> to vector<1x96xf32>
    %40 = vector.shape_cast %39 : vector<1x96xf32> to vector<1x1x96xf32>
    %41 = vector.broadcast %40 : vector<1x1x96xf32> to vector<4x4x96xf32>
    %42 = arith.mulf %38, %41 : vector<4x4x96xf32>
    %43 = arith.addf %37, %42 : vector<4x4x96xf32>
    %44 = vector.extract_strided_slice %1 {offsets = [2, 1, 0], sizes = [4, 4, 96], strides = [1, 1, 1]} : vector<6x6x96xf32> to vector<4x4x96xf32>
    %45 = vector.extract_strided_slice %2 {offsets = [7, 0], sizes = [1, 96], strides = [1, 1]} : vector<9x96xf32> to vector<1x96xf32>
    %46 = vector.shape_cast %45 : vector<1x96xf32> to vector<1x1x96xf32>
    %47 = vector.broadcast %46 : vector<1x1x96xf32> to vector<4x4x96xf32>
    %48 = arith.mulf %44, %47 : vector<4x4x96xf32>
    %49 = arith.addf %43, %48 : vector<4x4x96xf32>
    %50 = vector.extract_strided_slice %1 {offsets = [2, 2, 0], sizes = [4, 4, 96], strides = [1, 1, 1]} : vector<6x6x96xf32> to vector<4x4x96xf32>
    %51 = vector.extract_strided_slice %2 {offsets = [8, 0], sizes = [1, 96], strides = [1, 1]} : vector<9x96xf32> to vector<1x96xf32>
    %52 = vector.shape_cast %51 : vector<1x96xf32> to vector<1x1x96xf32>
    %53 = vector.broadcast %52 : vector<1x1x96xf32> to vector<4x4x96xf32>
    %54 = arith.mulf %50, %53 : vector<4x4x96xf32>
    %55 = arith.addf %49, %54 : vector<4x4x96xf32>
    %c0_5 = arith.constant 0 : index
    %c0_6 = arith.constant 0 : index
    %56 = vector.load %arg3[%c0_5, %c0_6] : memref<1x96xf32, #tpu.memory_space<vmem>>, vector<1x96xf32>
    %57 = vector.shape_cast %56 : vector<1x96xf32> to vector<1x1x96xf32>
    %58 = vector.broadcast %57 : vector<1x1x96xf32> to vector<4x4x96xf32>
    %59 = arith.mulf %55, %58 : vector<4x4x96xf32>
    %c0_7 = arith.constant 0 : index
    %c0_8 = arith.constant 0 : index
    %60 = vector.load %arg4[%c0_7, %c0_8] : memref<1x96xf32, #tpu.memory_space<vmem>>, vector<1x96xf32>
    %61 = vector.shape_cast %60 : vector<1x96xf32> to vector<1x1x96xf32>
    %62 = vector.broadcast %61 : vector<1x1x96xf32> to vector<4x4x96xf32>
    %63 = arith.addf %59, %62 : vector<4x4x96xf32>
    %64 = arith.negf %63 : vector<4x4x96xf32>
    %65 = math.exp %64 : vector<4x4x96xf32>
    %cst = arith.constant 1.000000e+00 : f32
    %66 = vector.broadcast %cst : f32 to vector<4x4x96xf32>
    %67 = arith.addf %66, %65 : vector<4x4x96xf32>
    %68 = arith.divf %66, %67 : vector<4x4x96xf32>
    %69 = arith.mulf %63, %68 : vector<4x4x96xf32>
    %c0_9 = arith.constant 0 : index
    %c0_10 = arith.constant 0 : index
    %c0_11 = arith.constant 0 : index
    %c0_12 = arith.constant 0 : index
    %70 = vector.load %arg5[%c0_9, %c0_10, %c0_11, %c0_12] : memref<1x4x4x96xf32, #tpu.memory_space<vmem>>, vector<1x4x4x96xf32>
    %71 = vector.shape_cast %70 : vector<1x4x4x96xf32> to vector<4x4x96xf32>
    %72 = vector.shape_cast %69 : vector<4x4x96xf32> to vector<1x4x4x96xf32>
    tpu.vector_store %arg5[%c0_9, %c0_10, %c0_11, %c0_12], %72 {strides = array<i32>} : memref<1x4x4x96xf32, #tpu.memory_space<vmem>>, vector<1x4x4x96xf32>,
    return
  }
  func.func @transform_0(%arg0: i32) -> (i32, i32, i32, i32) {
    %c0_i32 = arith.constant 0 : i32
    %c0_i32_0 = arith.constant 0 : i32
    %c0_i32_1 = arith.constant 0 : i32
    %c0_i32_2 = arith.constant 0 : i32
    return %arg0, %c0_i32, %c0_i32_0, %c0_i32_1 : i32, i32, i32, i32
  }
  func.func @transform_1(%arg0: i32) -> (i32, i32) {
    %c0_i32 = arith.constant 0 : i32
    %c0_i32_0 = arith.constant 0 : i32
    %c0_i32_1 = arith.constant 0 : i32
    return %c0_i32, %c0_i32_0 : i32, i32
  }
  func.func @transform_2(%arg0: i32) -> (i32, i32) {
    %c0_i32 = arith.constant 0 : i32
    %c0_i32_0 = arith.constant 0 : i32
    %c0_i32_1 = arith.constant 0 : i32
    return %c0_i32, %c0_i32_0 : i32, i32
  }
  func.func @transform_3(%arg0: i32) -> (i32, i32) {
    %c0_i32 = arith.constant 0 : i32
    %c0_i32_0 = arith.constant 0 : i32
    %c0_i32_1 = arith.constant 0 : i32
    return %c0_i32, %c0_i32_0 : i32, i32
  }
  func.func @transform_4(%arg0: i32) -> (i32, i32, i32, i32) {
    %c0_i32 = arith.constant 0 : i32
    %c0_i32_0 = arith.constant 0 : i32
    %c0_i32_1 = arith.constant 0 : i32
    %c0_i32_2 = arith.constant 0 : i32
    return %arg0, %c0_i32, %c0_i32_0, %c0_i32_1 : i32, i32, i32, i32
  }
}

module attributes {stable_mosaic.version = 11 : i64} {
  func.func @_se_gate_kernel(%arg0: i32, %arg1: memref<2x16x96xf32, #tpu.memory_space<vmem>>, %arg2: memref<96x6xf32, #tpu.memory_space<vmem>>, %arg3: memref<6x96xf32, #tpu.memory_space<vmem>>, %arg4: memref<2x96xf32, #tpu.memory_space<vmem>>, %arg5: memref<2x96xf32, #tpu.memory_space<vmem>>) attributes {dimension_semantics = [#tpu.dimension_semantics<arbitrary>], iteration_bounds = array<i64: 1>, scalar_prefetch = 0 : i64, scratch_operands = 1 : i64, tpu.core_type = #tpu.core_type<tc>, window_params = [{transform_indices = @transform_0, window_bounds = array<i64: 2, 16, 96>}, {pipeline_mode = #tpu.pipeline_mode<synchronous>, transform_indices = @transform_1, window_bounds = array<i64: 96, 6>}, {pipeline_mode = #tpu.pipeline_mode<synchronous>, transform_indices = @transform_2, window_bounds = array<i64: 6, 96>}, {pipeline_mode = #tpu.pipeline_mode<synchronous>, transform_indices = @transform_3, window_bounds = array<i64: 2, 96>}]} {
    %c0_i32 = arith.constant 0 : i32
    %0 = arith.cmpi eq, %arg0, %c0_i32 : i32
    %1 = arith.extui %0 : i1 to i32
    %c0_i32_0 = arith.constant 0 : i32
    %2 = arith.cmpi ne, %1, %c0_i32_0 : i32
    scf.if %2 {
      %cst_9 = arith.constant 0.000000e+00 : f32
      %11 = vector.broadcast %cst_9 : f32 to vector<2x96xf32>
      %c0_10 = arith.constant 0 : index
      %c0_11 = arith.constant 0 : index
      %12 = vector.load %arg5[%c0_10, %c0_11] : memref<2x96xf32, #tpu.memory_space<vmem>>, vector<2x96xf32>
      tpu.vector_store %arg5[%c0_10, %c0_11], %11 {strides = array<i32>} : memref<2x96xf32, #tpu.memory_space<vmem>>, vector<2x96xf32>,
    } else {
    }
    %c0 = arith.constant 0 : index
    %c0_1 = arith.constant 0 : index
    %3 = vector.load %arg5[%c0, %c0_1] : memref<2x96xf32, #tpu.memory_space<vmem>>, vector<2x96xf32>
    %c0_2 = arith.constant 0 : index
    %c0_3 = arith.constant 0 : index
    %c0_4 = arith.constant 0 : index
    %4 = vector.load %arg1[%c0_2, %c0_3, %c0_4] : memref<2x16x96xf32, #tpu.memory_space<vmem>>, vector<2x16x96xf32>
    %cst = arith.constant dense<0.000000e+00> : vector<2x96xf32>
    %5 = vector.multi_reduction <add>, %4, %cst [1] : vector<2x16x96xf32> to vector<2x96xf32>
    %6 = arith.addf %3, %5 : vector<2x96xf32>
    %c0_5 = arith.constant 0 : index
    %c0_6 = arith.constant 0 : index
    %7 = vector.load %arg5[%c0_5, %c0_6] : memref<2x96xf32, #tpu.memory_space<vmem>>, vector<2x96xf32>
    tpu.vector_store %arg5[%c0_5, %c0_6], %6 {strides = array<i32>} : memref<2x96xf32, #tpu.memory_space<vmem>>, vector<2x96xf32>,
    %c0_i32_7 = arith.constant 0 : i32
    %8 = arith.cmpi eq, %arg0, %c0_i32_7 : i32
    %9 = arith.extui %8 : i1 to i32
    %c0_i32_8 = arith.constant 0 : i32
    %10 = arith.cmpi ne, %9, %c0_i32_8 : i32
    scf.if %10 {
      %c0_9 = arith.constant 0 : index
      %c0_10 = arith.constant 0 : index
      %11 = vector.load %arg5[%c0_9, %c0_10] : memref<2x96xf32, #tpu.memory_space<vmem>>, vector<2x96xf32>
      %cst_11 = arith.constant 6.250000e-02 : f32
      %12 = vector.broadcast %cst_11 : f32 to vector<2x96xf32>
      %13 = arith.mulf %11, %12 : vector<2x96xf32>
      %c0_12 = arith.constant 0 : index
      %c0_13 = arith.constant 0 : index
      %14 = vector.load %arg2[%c0_12, %c0_13] : memref<96x6xf32, #tpu.memory_space<vmem>>, vector<96x6xf32>
      %cst_14 = arith.constant dense<0.000000e+00> : vector<2x6xf32>
      %15 = tpu.matmul %13, %14, %cst_14 {dimension_numbers = #tpu.dot_dimension_numbers<[1], [0], [0], [1], [0, 0, 1, 1], [], []>} : vector<2x96xf32>, vector<96x6xf32>, vector<2x6xf32> -> vector<2x6xf32>
      %16 = arith.negf %15 : vector<2x6xf32>
      %17 = math.exp %16 : vector<2x6xf32>
      %cst_15 = arith.constant 1.000000e+00 : f32
      %18 = vector.broadcast %cst_15 : f32 to vector<2x6xf32>
      %19 = arith.addf %18, %17 : vector<2x6xf32>
      %20 = arith.divf %18, %19 : vector<2x6xf32>
      %21 = arith.mulf %15, %20 : vector<2x6xf32>
      %c0_16 = arith.constant 0 : index
      %c0_17 = arith.constant 0 : index
      %22 = vector.load %arg3[%c0_16, %c0_17] : memref<6x96xf32, #tpu.memory_space<vmem>>, vector<6x96xf32>
      %cst_18 = arith.constant dense<0.000000e+00> : vector<2x96xf32>
      %23 = tpu.matmul %21, %22, %cst_18 {dimension_numbers = #tpu.dot_dimension_numbers<[1], [0], [0], [1], [0, 0, 1, 1], [], []>} : vector<2x6xf32>, vector<6x96xf32>, vector<2x96xf32> -> vector<2x96xf32>
      %24 = arith.negf %23 : vector<2x96xf32>
      %25 = math.exp %24 : vector<2x96xf32>
      %cst_19 = arith.constant 1.000000e+00 : f32
      %26 = vector.broadcast %cst_19 : f32 to vector<2x96xf32>
      %27 = arith.addf %26, %25 : vector<2x96xf32>
      %28 = arith.divf %26, %27 : vector<2x96xf32>
      %c0_20 = arith.constant 0 : index
      %c0_21 = arith.constant 0 : index
      %29 = vector.load %arg4[%c0_20, %c0_21] : memref<2x96xf32, #tpu.memory_space<vmem>>, vector<2x96xf32>
      tpu.vector_store %arg4[%c0_20, %c0_21], %28 {strides = array<i32>} : memref<2x96xf32, #tpu.memory_space<vmem>>, vector<2x96xf32>,
    } else {
    }
    return
  }
  func.func @transform_0(%arg0: i32) -> (i32, i32, i32) {
    %c0_i32 = arith.constant 0 : i32
    %c0_i32_0 = arith.constant 0 : i32
    %c0_i32_1 = arith.constant 0 : i32
    return %c0_i32, %arg0, %c0_i32_0 : i32, i32, i32
  }
  func.func @transform_1(%arg0: i32) -> (i32, i32) {
    %c0_i32 = arith.constant 0 : i32
    %c0_i32_0 = arith.constant 0 : i32
    %c0_i32_1 = arith.constant 0 : i32
    return %c0_i32, %c0_i32_0 : i32, i32
  }
  func.func @transform_2(%arg0: i32) -> (i32, i32) {
    %c0_i32 = arith.constant 0 : i32
    %c0_i32_0 = arith.constant 0 : i32
    %c0_i32_1 = arith.constant 0 : i32
    return %c0_i32, %c0_i32_0 : i32, i32
  }
  func.func @transform_3(%arg0: i32) -> (i32, i32) {
    %c0_i32 = arith.constant 0 : i32
    %c0_i32_0 = arith.constant 0 : i32
    %c0_i32_1 = arith.constant 0 : i32
    return %c0_i32, %c0_i32_0 : i32, i32
  }
}

module attributes {stable_mosaic.version = 11 : i64} {
  func.func @_se_proj_res_kernel(%arg0: i32, %arg1: i32, %arg2: memref<1x16x96xf32, #tpu.memory_space<vmem>>, %arg3: memref<1x1x96xf32, #tpu.memory_space<vmem>>, %arg4: memref<96x24xf32, #tpu.memory_space<vmem>>, %arg5: memref<1x24xf32, #tpu.memory_space<vmem>>, %arg6: memref<1x24xf32, #tpu.memory_space<vmem>>, %arg7: memref<1x16x24xf32, #tpu.memory_space<vmem>>, %arg8: memref<1x16x24xf32, #tpu.memory_space<vmem>>) attributes {dimension_semantics = [#tpu.dimension_semantics<parallel>, #tpu.dimension_semantics<parallel>], iteration_bounds = array<i64: 2, 1>, scalar_prefetch = 0 : i64, scratch_operands = 0 : i64, tpu.core_type = #tpu.core_type<tc>, window_params = [{transform_indices = @transform_0, window_bounds = array<i64: 1, 16, 96>}, {transform_indices = @transform_1, window_bounds = array<i64: 1, 1, 96>}, {pipeline_mode = #tpu.pipeline_mode<synchronous>, transform_indices = @transform_2, window_bounds = array<i64: 96, 24>}, {pipeline_mode = #tpu.pipeline_mode<synchronous>, transform_indices = @transform_3, window_bounds = array<i64: 1, 24>}, {pipeline_mode = #tpu.pipeline_mode<synchronous>, transform_indices = @transform_4, window_bounds = array<i64: 1, 24>}, {transform_indices = @transform_5, window_bounds = array<i64: 1, 16, 24>}, {transform_indices = @transform_6, window_bounds = array<i64: 1, 16, 24>}]} {
    %c0 = arith.constant 0 : index
    %c0_0 = arith.constant 0 : index
    %c0_1 = arith.constant 0 : index
    %0 = vector.load %arg2[%c0, %c0_0, %c0_1] : memref<1x16x96xf32, #tpu.memory_space<vmem>>, vector<1x16x96xf32>
    %1 = vector.shape_cast %0 : vector<1x16x96xf32> to vector<16x96xf32>
    %c0_2 = arith.constant 0 : index
    %c0_3 = arith.constant 0 : index
    %c0_4 = arith.constant 0 : index
    %2 = vector.load %arg3[%c0_2, %c0_3, %c0_4] : memref<1x1x96xf32, #tpu.memory_space<vmem>>, vector<1x1x96xf32>
    %3 = vector.shape_cast %2 : vector<1x1x96xf32> to vector<1x96xf32>
    %4 = vector.broadcast %3 : vector<1x96xf32> to vector<16x96xf32>
    %5 = arith.mulf %1, %4 : vector<16x96xf32>
    %6 = arith.truncf %5 : vector<16x96xf32> to vector<16x96xbf16>
    %c0_5 = arith.constant 0 : index
    %c0_6 = arith.constant 0 : index
    %7 = vector.load %arg4[%c0_5, %c0_6] : memref<96x24xf32, #tpu.memory_space<vmem>>, vector<96x24xf32>
    %8 = arith.truncf %7 : vector<96x24xf32> to vector<96x24xbf16>
    %cst = arith.constant dense<0.000000e+00> : vector<16x24xf32>
    %9 = tpu.matmul %6, %8, %cst {dimension_numbers = #tpu.dot_dimension_numbers<[1], [0], [0], [1], [0, 0, 1, 1], [], []>} : vector<16x96xbf16>, vector<96x24xbf16>, vector<16x24xf32> -> vector<16x24xf32>
    %c0_7 = arith.constant 0 : index
    %c0_8 = arith.constant 0 : index
    %10 = vector.load %arg5[%c0_7, %c0_8] : memref<1x24xf32, #tpu.memory_space<vmem>>, vector<1x24xf32>
    %11 = vector.broadcast %10 : vector<1x24xf32> to vector<16x24xf32>
    %12 = arith.mulf %9, %11 : vector<16x24xf32>
    %c0_9 = arith.constant 0 : index
    %c0_10 = arith.constant 0 : index
    %13 = vector.load %arg6[%c0_9, %c0_10] : memref<1x24xf32, #tpu.memory_space<vmem>>, vector<1x24xf32>
    %14 = vector.broadcast %13 : vector<1x24xf32> to vector<16x24xf32>
    %15 = arith.addf %12, %14 : vector<16x24xf32>
    %c0_11 = arith.constant 0 : index
    %c0_12 = arith.constant 0 : index
    %c0_13 = arith.constant 0 : index
    %16 = vector.load %arg7[%c0_11, %c0_12, %c0_13] : memref<1x16x24xf32, #tpu.memory_space<vmem>>, vector<1x16x24xf32>
    %17 = vector.shape_cast %16 : vector<1x16x24xf32> to vector<16x24xf32>
    %18 = arith.addf %15, %17 : vector<16x24xf32>
    %c0_14 = arith.constant 0 : index
    %c0_15 = arith.constant 0 : index
    %c0_16 = arith.constant 0 : index
    %19 = vector.load %arg8[%c0_14, %c0_15, %c0_16] : memref<1x16x24xf32, #tpu.memory_space<vmem>>, vector<1x16x24xf32>
    %20 = vector.shape_cast %19 : vector<1x16x24xf32> to vector<16x24xf32>
    %21 = vector.shape_cast %18 : vector<16x24xf32> to vector<1x16x24xf32>
    tpu.vector_store %arg8[%c0_14, %c0_15, %c0_16], %21 {strides = array<i32>} : memref<1x16x24xf32, #tpu.memory_space<vmem>>, vector<1x16x24xf32>,
    return
  }
  func.func @transform_0(%arg0: i32, %arg1: i32) -> (i32, i32, i32) {
    %c0_i32 = arith.constant 0 : i32
    %c0_i32_0 = arith.constant 0 : i32
    return %arg0, %arg1, %c0_i32 : i32, i32, i32
  }
  func.func @transform_1(%arg0: i32, %arg1: i32) -> (i32, i32, i32) {
    %c0_i32 = arith.constant 0 : i32
    %c0_i32_0 = arith.constant 0 : i32
    %c0_i32_1 = arith.constant 0 : i32
    return %arg0, %c0_i32, %c0_i32_0 : i32, i32, i32
  }
  func.func @transform_2(%arg0: i32, %arg1: i32) -> (i32, i32) {
    %c0_i32 = arith.constant 0 : i32
    %c0_i32_0 = arith.constant 0 : i32
    %c0_i32_1 = arith.constant 0 : i32
    return %c0_i32, %c0_i32_0 : i32, i32
  }
  func.func @transform_3(%arg0: i32, %arg1: i32) -> (i32, i32) {
    %c0_i32 = arith.constant 0 : i32
    %c0_i32_0 = arith.constant 0 : i32
    %c0_i32_1 = arith.constant 0 : i32
    return %c0_i32, %c0_i32_0 : i32, i32
  }
  func.func @transform_4(%arg0: i32, %arg1: i32) -> (i32, i32) {
    %c0_i32 = arith.constant 0 : i32
    %c0_i32_0 = arith.constant 0 : i32
    %c0_i32_1 = arith.constant 0 : i32
    return %c0_i32, %c0_i32_0 : i32, i32
  }
  func.func @transform_5(%arg0: i32, %arg1: i32) -> (i32, i32, i32) {
    %c0_i32 = arith.constant 0 : i32
    %c0_i32_0 = arith.constant 0 : i32
    return %arg0, %arg1, %c0_i32 : i32, i32, i32
  }
  func.func @transform_6(%arg0: i32, %arg1: i32) -> (i32, i32, i32) {
    %c0_i32 = arith.constant 0 : i32
    %c0_i32_0 = arith.constant 0 : i32
    return %arg0, %arg1, %c0_i32 : i32, i32, i32
  }
}

module attributes {stable_mosaic.version = 11 : i64} {
  func.func @_avgpool_linear_kernel(%arg0: i32, %arg1: memref<2x16x96xf32, #tpu.memory_space<vmem>>, %arg2: memref<96x10xf32, #tpu.memory_space<vmem>>, %arg3: memref<1x10xf32, #tpu.memory_space<vmem>>, %arg4: memref<2x10xf32, #tpu.memory_space<vmem>>, %arg5: memref<2x96xf32, #tpu.memory_space<vmem>>) attributes {dimension_semantics = [#tpu.dimension_semantics<arbitrary>], iteration_bounds = array<i64: 1>, scalar_prefetch = 0 : i64, scratch_operands = 1 : i64, tpu.core_type = #tpu.core_type<tc>, window_params = [{transform_indices = @transform_0, window_bounds = array<i64: 2, 16, 96>}, {pipeline_mode = #tpu.pipeline_mode<synchronous>, transform_indices = @transform_1, window_bounds = array<i64: 96, 10>}, {pipeline_mode = #tpu.pipeline_mode<synchronous>, transform_indices = @transform_2, window_bounds = array<i64: 1, 10>}, {pipeline_mode = #tpu.pipeline_mode<synchronous>, transform_indices = @transform_3, window_bounds = array<i64: 2, 10>}]} {
    %c0_i32 = arith.constant 0 : i32
    %0 = arith.cmpi eq, %arg0, %c0_i32 : i32
    %1 = arith.extui %0 : i1 to i32
    %c0_i32_0 = arith.constant 0 : i32
    %2 = arith.cmpi ne, %1, %c0_i32_0 : i32
    scf.if %2 {
      %cst_9 = arith.constant 0.000000e+00 : f32
      %11 = vector.broadcast %cst_9 : f32 to vector<2x96xf32>
      %c0_10 = arith.constant 0 : index
      %c0_11 = arith.constant 0 : index
      %12 = vector.load %arg5[%c0_10, %c0_11] : memref<2x96xf32, #tpu.memory_space<vmem>>, vector<2x96xf32>
      tpu.vector_store %arg5[%c0_10, %c0_11], %11 {strides = array<i32>} : memref<2x96xf32, #tpu.memory_space<vmem>>, vector<2x96xf32>,
    } else {
    }
    %c0 = arith.constant 0 : index
    %c0_1 = arith.constant 0 : index
    %3 = vector.load %arg5[%c0, %c0_1] : memref<2x96xf32, #tpu.memory_space<vmem>>, vector<2x96xf32>
    %c0_2 = arith.constant 0 : index
    %c0_3 = arith.constant 0 : index
    %c0_4 = arith.constant 0 : index
    %4 = vector.load %arg1[%c0_2, %c0_3, %c0_4] : memref<2x16x96xf32, #tpu.memory_space<vmem>>, vector<2x16x96xf32>
    %cst = arith.constant dense<0.000000e+00> : vector<2x96xf32>
    %5 = vector.multi_reduction <add>, %4, %cst [1] : vector<2x16x96xf32> to vector<2x96xf32>
    %6 = arith.addf %3, %5 : vector<2x96xf32>
    %c0_5 = arith.constant 0 : index
    %c0_6 = arith.constant 0 : index
    %7 = vector.load %arg5[%c0_5, %c0_6] : memref<2x96xf32, #tpu.memory_space<vmem>>, vector<2x96xf32>
    tpu.vector_store %arg5[%c0_5, %c0_6], %6 {strides = array<i32>} : memref<2x96xf32, #tpu.memory_space<vmem>>, vector<2x96xf32>,
    %c0_i32_7 = arith.constant 0 : i32
    %8 = arith.cmpi eq, %arg0, %c0_i32_7 : i32
    %9 = arith.extui %8 : i1 to i32
    %c0_i32_8 = arith.constant 0 : i32
    %10 = arith.cmpi ne, %9, %c0_i32_8 : i32
    scf.if %10 {
      %c0_9 = arith.constant 0 : index
      %c0_10 = arith.constant 0 : index
      %11 = vector.load %arg5[%c0_9, %c0_10] : memref<2x96xf32, #tpu.memory_space<vmem>>, vector<2x96xf32>
      %cst_11 = arith.constant 6.250000e-02 : f32
      %12 = vector.broadcast %cst_11 : f32 to vector<2x96xf32>
      %13 = arith.mulf %11, %12 : vector<2x96xf32>
      %c0_12 = arith.constant 0 : index
      %c0_13 = arith.constant 0 : index
      %14 = vector.load %arg2[%c0_12, %c0_13] : memref<96x10xf32, #tpu.memory_space<vmem>>, vector<96x10xf32>
      %cst_14 = arith.constant dense<0.000000e+00> : vector<2x10xf32>
      %15 = tpu.matmul %13, %14, %cst_14 {dimension_numbers = #tpu.dot_dimension_numbers<[1], [0], [0], [1], [0, 0, 1, 1], [], []>} : vector<2x96xf32>, vector<96x10xf32>, vector<2x10xf32> -> vector<2x10xf32>
      %c0_15 = arith.constant 0 : index
      %c0_16 = arith.constant 0 : index
      %16 = vector.load %arg3[%c0_15, %c0_16] : memref<1x10xf32, #tpu.memory_space<vmem>>, vector<1x10xf32>
      %17 = vector.broadcast %16 : vector<1x10xf32> to vector<2x10xf32>
      %18 = arith.addf %15, %17 : vector<2x10xf32>
      %c0_17 = arith.constant 0 : index
      %c0_18 = arith.constant 0 : index
      %19 = vector.load %arg4[%c0_17, %c0_18] : memref<2x10xf32, #tpu.memory_space<vmem>>, vector<2x10xf32>
      tpu.vector_store %arg4[%c0_17, %c0_18], %18 {strides = array<i32>} : memref<2x10xf32, #tpu.memory_space<vmem>>, vector<2x10xf32>,
    } else {
    }
    return
  }
  func.func @transform_0(%arg0: i32) -> (i32, i32, i32) {
    %c0_i32 = arith.constant 0 : i32
    %c0_i32_0 = arith.constant 0 : i32
    %c0_i32_1 = arith.constant 0 : i32
    return %c0_i32, %arg0, %c0_i32_0 : i32, i32, i32
  }
  func.func @transform_1(%arg0: i32) -> (i32, i32) {
    %c0_i32 = arith.constant 0 : i32
    %c0_i32_0 = arith.constant 0 : i32
    %c0_i32_1 = arith.constant 0 : i32
    return %c0_i32, %c0_i32_0 : i32, i32
  }
  func.func @transform_2(%arg0: i32) -> (i32, i32) {
    %c0_i32 = arith.constant 0 : i32
    %c0_i32_0 = arith.constant 0 : i32
    %c0_i32_1 = arith.constant 0 : i32
    return %c0_i32, %c0_i32_0 : i32, i32
  }
  func.func @transform_3(%arg0: i32) -> (i32, i32) {
    %c0_i32 = arith.constant 0 : i32
    %c0_i32_0 = arith.constant 0 : i32
    %c0_i32_1 = arith.constant 0 : i32
    return %c0_i32, %c0_i32_0 : i32, i32
  }
}

</mosaic_0001>

<bundles_post_ra>
// kernel: _lambda_.14
= control target key start
LH: loop header
LB: loop body
LE: loop exit
PB: predicated region body
PF: predicated region fallthrough
CT: control target
= control target key end

     0   :  { %vm73_vm0 = vcmask 1044480   ;;  %vm74_vm1 = vcmask 1045504   ;;  %v607_v2 = vmov 65535   ;;  %vm48_vm2 = vcmask 220160   ;;  %s1030_s1 = inlined_call_operand.vmem [shape: f32[27,16], index: 1, kind: input, shape index: {}]   ;;  %s1031_s0 = inlined_call_operand.vmem [shape: f32[128,27], index: 0, kind: input, shape index: {}]   ;;  %s1032_s2 = inlined_call_operand.vmem [shape: f32[1,16], index: 2, kind: input, shape index: {}]   ;;  %s1033_s3 = inlined_call_operand.vmem [shape: f32[1,16], index: 3, kind: input, shape index: {}]   ;;  %s1034_s4 = inlined_call_operand.vmem [shape: f32[128,16], index: 4, kind: output, shape index: {}]  }
   0x1   :  { %v44_v0 = vld [vmem:[%s1030_s1 + $0x10] sm:$0xff]  ;;  %v45_v1 = vld [vmem:[%s1030_s1 + $0x18] sm:$0x7]  ;;  %v75_v3 = vsel %vm73_vm0, 4294967295, %v607_v2  ;;  %v42_v6 = vld [vmem:[%s1030_s1] sm:$0xff]  ;;  %vm489_vm6 = vcmask 130048  }
   0x2   :  { %v47_v4 = vpack.c.bf16 %v45_v1, %v44_v0  ;;  %v76_v5 = vsel %vm74_vm1, %v75_v3, 0  ;;  %v43_v7 = vld [vmem:[%s1030_s1 + $0x8] sm:$0xff]  ;;  %v18_v9 = vld [vmem:[%s1031_s0] sm:$0xff]  ;;  %v20_v22 = vld [vmem:[%s1031_s0 + $0x10] sm:$0xff] }
   0x3   :  { %v19_v10 = vld [vmem:[%s1031_s0 + $0x8] sm:$0xff]  ;;  %v22_v11 = vld [vmem:[%s1031_s0 + $0x20] sm:$0xff]  ;;  %v46_v12 = vpack.c.bf16 %v43_v7, %v42_v6  ;;  %v21_v23 = vld [vmem:[%s1031_s0 + $0x18] sm:$0xff] }
   0x4   :  { %v78_v8 = vand.u32 %v76_v5, %v47_v4  ;;  %v23_v13 = vld [vmem:[%s1031_s0 + $0x28] sm:$0xff]  ;;  %v26_v14 = vld [vmem:[%s1031_s0 + $0x40] sm:$0xff]  ;;  %v34_v18 = vpack.c.bf16 %v19_v10, %v18_v9  ;;  %v24_v24 = vld [vmem:[%s1031_s0 + $0x30] sm:$0xff]  ;;  %v35_v30 = vpack.c.bf16 %v21_v23, %v20_v22 }
   0x5   :  { %v27_v15 = vld [vmem:[%s1031_s0 + $0x48] sm:$0xff]  ;;  %v30_v16 = vld [vmem:[%s1031_s0 + $0x60] sm:$0xff]  ;;  %v36_v19 = vpack.c.bf16 %v23_v13, %v22_v11  ;;  %v25_v25 = vld [vmem:[%s1031_s0 + $0x38] sm:$0xff] }
   0x6   :  { %86 = vmatpush.bf16.msra.mxu0 %v78_v8  ;;  %534 = vmatpush.bf16.msra.mxu1 %v78_v8  ;;  %v31_v17 = vld [vmem:[%s1031_s0 + $0x68] sm:$0xff]  ;;  %v38_v20 = vpack.c.bf16 %v27_v15, %v26_v14  ;;  %v28_v26 = vld [vmem:[%s1031_s0 + $0x50] sm:$0xff]  ;;  %v29_v27 = vld [vmem:[%s1031_s0 + $0x58] sm:$0xff]  ;;  %v37_v31 = vpack.c.bf16 %v25_v25, %v24_v24 }
   0x7   :  { %535 = vmatpush.bf16.msra.mxu2 %v78_v8  ;;  %536 = vmatpush.bf16.msra.mxu3 %v78_v8  ;;  %v40_v21 = vpack.c.bf16 %v31_v17, %v30_v16  ;;  %v32_v28 = vld [vmem:[%s1031_s0 + $0x70] sm:$0xff]  ;;  %v33_v29 = vld [vmem:[%s1031_s0 + $0x78] sm:$0xff]  ;;  %v39_v32 = vpack.c.bf16 %v29_v27, %v28_v26  ;;  %v704_v34 = vld [vmem:[%s1032_s2] ss:$0 sm:$0xff] }
   0x8   :  { %v41_v33 = vpack.c.bf16 %v33_v29, %v32_v28  ;;  %v709_v35 = vld [vmem:[%s1033_s3] ss:$0 sm:$0xff] }
   0xa   :  { %87 = vmatpush.bf16.msra.mxu0 %v46_v12  ;;  %537 = vmatpush.bf16.msra.mxu1 %v46_v12 }
   0xb   :  { %538 = vmatpush.bf16.msra.mxu2 %v46_v12  ;;  %539 = vmatpush.bf16.msra.mxu3 %v46_v12 }
   0xd   :  { %510 = vmatmul.msk.bf16.vlgmr.msra.gmra.mxu0 %vm48_vm2, %v34_v18  ;;  %512 = vmatmul.msk.bf16.vlgmr.msra.gmra.mxu1 %vm48_vm2, %v36_v19 }
   0xe   :  { %514 = vmatmul.msk.bf16.vlgmr.msra.gmra.mxu2 %vm48_vm2, %v38_v20  ;;  %516 = vmatmul.msk.bf16.vlgmr.msra.gmra.mxu3 %vm48_vm2, %v40_v21 }
  0x1d   :  { %511 = vmatmul.msk.bf16.gmra.mxu0 %vm48_vm2, %v35_v30  ;;  %513 = vmatmul.msk.bf16.gmra.mxu1 %vm48_vm2, %v37_v31 }
  0x1e   :  { %515 = vmatmul.msk.bf16.gmra.mxu2 %vm48_vm2, %v39_v32  ;;  %517 = vmatmul.msk.bf16.gmra.mxu3 %vm48_vm2, %v41_v33 }
  0x8a   :  { %v89_v36 = vpop.f32.mrf.mxu0  ;;  %v99_v37 = vpop.f32.mrf.mxu1 }
  0x8b   :  { %v133_v38 = vmul.f32 %v704_v34, %v89_v36  ;;  %v137_v39 = vmul.f32 %v704_v34, %v99_v37 }
  0x8d   :  { %v714_v40 = vadd.f32 %v709_v35, %v133_v38  ;;  %v717_v41 = vadd.f32 %v709_v35, %v137_v39 }
  0x8f   :  { %v518_v42 = vmul.f32 -1.442695, %v714_v40  ;;  %v522_v43 = vmul.f32 -1.442695, %v717_v41 }
  0x91   :  { %543 = vpow2.f32 %v518_v42  ;;  %v109_v44 = vpop.f32.mrf.mxu2  ;;  %v119_v45 = vpop.f32.mrf.mxu3 }
  0x92   :  { %545 = vpow2.f32 %v522_v43  ;;  %v141_v46 = vmul.f32 %v704_v34, %v109_v44  ;;  %v145_v47 = vmul.f32 %v704_v34, %v119_v45  ;;  %v91_v48 = vpop.f32.mrf.mxu0  ;;  %v101_v49 = vpop.f32.mrf.mxu1 }
  0x93   :  { %v134_v50 = vmul.f32 %v704_v34, %v91_v48  ;;  %v138_v51 = vmul.f32 %v704_v34, %v101_v49 }
  0x94   :  { %v726_v52 = vadd.f32 %v709_v35, %v141_v46  ;;  %v729_v53 = vadd.f32 %v709_v35, %v145_v47 }
  0x95   :  { %v732_v54 = vadd.f32 %v709_v35, %v134_v50  ;;  %v735_v55 = vadd.f32 %v709_v35, %v138_v51 }
  0x96   :  { %v526_v56 = vmul.f32 -1.442695, %v726_v52  ;;  %v530_v57 = vmul.f32 -1.442695, %v729_v53 }
  0x97   :  { %v544_v58 = vpop.eup %543  ;;  %v519_v61 = vmul.f32 -1.442695, %v732_v54  ;;  %v523_v63 = vmul.f32 -1.442695, %v735_v55 }
  0x98   :  { %v546_v59 = vpop.eup %545  ;;  %v217_v60 = vadd.f32 1.0, %v544_v58  ;;  %547 = vpow2.f32 %v526_v56 }
  0x99   :  { %v740_v62 = vadd.f32 1.0, %v546_v59  ;;  %549 = vpow2.f32 %v530_v57  ;;  %v111_v0 = vpop.f32.mrf.mxu2  ;;  %v121_v2 = vpop.f32.mrf.mxu3 }
  0x9a   :  { %551 = vrcp.f32 %v217_v60  ;;  %v142_v1 = vmul.f32 %v704_v34, %v111_v0  ;;  %v242_v3 = vand.u32 2147483647, %v217_v60  ;;  %v244_v4 = vand.u32 2147483648, %v217_v60  ;;  %v94_v5 = vpop.f32.mrf.mxu0  ;;  %v104_v13 = vpop.f32.mrf.mxu1 }
  0x9b   :  { %553 = vrcp.f32 %v740_v62  ;;  %v302_v7 = vand.u32 2147483647, %v740_v62  ;;  %v304_v10 = vand.u32 2147483648, %v740_v62  ;;  %v146_v12 = vmul.f32 %v704_v34, %v121_v2 }
  0x9c   :  { %555 = vpow2.f32 %v519_v61  ;;  %v747_v8 = vadd.f32 %v709_v35, %v142_v1  ;;  %vm238_vm3 = vweird.f32 %v217_v60  ;;  %vm298_vm4 = vweird.f32 %v740_v62 }
  0x9d   :  { %557 = vpow2.f32 %v523_v63  ;;  %v135_v16 = vmul.f32 %v704_v34, %v94_v5  ;;  %vm757_vm5 = vcmp.eq.f32.partialorder %v242_v3, 8.507059e+37  ;;  %v245_v20 = vor.u32 1.1754944e-38, %v244_v4 }
  0x9e   :  { %v548_v6 = vpop.eup %547  ;;  %vm763_vm7 = vcmp.eq.f32.partialorder %v302_v7, 8.507059e+37  ;;  %v527_v24 = vmul.f32 -1.442695, %v747_v8  ;;  %v139_v25 = vmul.f32 %v704_v34, %v104_v13  ;;  %v305_v28 = vor.u32 1.1754944e-38, %v304_v10 }
  0x9f   :  { %v550_v9 = vpop.eup %549  ;;  %v750_v11 = vadd.f32 1.0, %v548_v6  ;;  %v771_v29 = vadd.f32 %v709_v35, %v146_v12  ;;  %v776_v33 = vadd.f32 %v709_v35, %v135_v16 }
  0xa0   :  { %v552_v14 = vpop.eup %551  ;;  %v754_v15 = vadd.f32 1.0, %v550_v9  ;;  %v783_v42 = vadd.f32 %v709_v35, %v139_v25 }
  0xa1   :  { %v554_v17 = vpop.eup %553  ;;  %v234_v18 = vmul.f32 %v552_v14, %v217_v60  ;;  %559 = vrcp.f32 %v750_v11  ;;  %v362_v31 = vand.u32 2147483647, %v750_v11  ;;  %v364_v32 = vand.u32 2147483648, %v750_v11 }
  0xa2   :  { %v556_v21 = vpop.eup %555  ;;  %v294_v22 = vmul.f32 %v554_v17, %v740_v62  ;;  %561 = vrcp.f32 %v754_v15  ;;  %vm239_vm8 = vweird.f32 %v552_v14  ;;  %vm299_vm9 = vweird.f32 %v554_v17 }
  0xa3   :  { %v558_v26 = vpop.eup %557  ;;  %v235_v27 = vsub.f32 1.0, %v234_v18  ;;  %v778_v37 = vadd.f32 1.0, %v556_v21  ;;  %563 = vpow2.f32 %v527_v24  ;;  %vm358_vm10 = vweird.f32 %v750_v11  ;;  %vm240_vm11 = vmor %vm238_vm3, %vm239_vm8 }
  0xa4   :  { %v295_v30 = vsub.f32 1.0, %v294_v22  ;;  %v780_v38 = vadd.f32 1.0, %v558_v26  ;;  %v422_v45 = vand.u32 2147483647, %v754_v15  ;;  %vm790_vm12 = vcmp.eq.f32.partialorder %v362_v31, 8.507059e+37  ;;  %vm300_vm14 = vmor %vm298_vm4, %vm299_vm9 }
  0xa5   :  { %v236_v36 = vmul.f32 %v552_v14, %v235_v27  ;;  %565 = vrcp.f32 %v778_v37  ;;  %v365_v49 = vor.u32 1.1754944e-38, %v364_v32  ;;  %vm418_vm13 = vweird.f32 %v754_v15  ;;  %v114_v27 = vpop.f32.mrf.mxu2 }
  0xa6   :  { %v296_v39 = vmul.f32 %v554_v17, %v295_v30  ;;  %v424_v56 = vand.u32 2147483648, %v754_v15  ;;  %567 = vrcp.f32 %v780_v38  ;;  %v531_v57 = vmul.f32 -1.442695, %v771_v29 }
  0xa7   :  { %v560_v43 = vpop.eup %559  ;;  %v237_v44 = vadd.f32 %v552_v14, %v236_v36  ;;  %vm807_vm15 = vcmp.eq.f32.partialorder %v422_v45, 8.507059e+37  ;;  %v257_v1 = vand.u32 2147483647, %v778_v37  ;;  %vm253_vm1 = vweird.f32 %v778_v37  ;;  %v124_v36 = vpop.f32.mrf.mxu3 }
  0xa8   :  { %v297_v46 = vadd.f32 %v554_v17, %v296_v39  ;;  %v354_v47 = vmul.f32 %v560_v43, %v750_v11  ;;  %v562_v50 = vpop.eup %561  ;;  %vm359_vm0 = vweird.f32 %v560_v43  ;;  %569 = vpow2.f32 %v531_v57  ;;  %v96_v39 = vpop.f32.mrf.mxu0 }
  0xa9   :  { %v241_v51 = vsel %vm240_vm11, %v552_v14, %v237_v44  ;;  %v414_v61 = vmul.f32 %v562_v50, %v754_v15  ;;  %v564_v2 = vpop.eup %563  ;;  %vm419_vm2 = vweird.f32 %v562_v50  ;;  %vm360_vm3 = vmor %vm358_vm10, %vm359_vm0  ;;  %vm827_vm4 = vcmp.eq.f32.partialorder %v257_v1, 8.507059e+37 }
  0xaa   :  { %v246_v58 = vsel %vm757_vm5, %v245_v20, %v241_v51  ;;  %v301_v59 = vsel %vm300_vm14, %v554_v17, %v297_v46  ;;  %v355_v60 = vsub.f32 1.0, %v354_v47  ;;  %v818_v7 = vadd.f32 1.0, %v564_v2  ;;  %vm420_vm5 = vmor %vm418_vm13, %vm419_vm2 }
  0xab   :  { %v473_v63 = vmul.f32 %v246_v58, %v714_v40  ;;  %v306_v0 = vsel %vm763_vm7, %v305_v28, %v301_v59  ;;  %v415_v5 = vsub.f32 1.0, %v414_v61  ;;  %v566_v6 = vpop.eup %565  ;;  %v425_v40 = vor.u32 1.1754944e-38, %v424_v56  ;;  %v106_v61 = vpop.f32.mrf.mxu1 }
  0xac   :  { %v477_v3 = vmul.f32 %v306_v0, %v717_v41  ;;  %v356_v4 = vmul.f32 %v560_v43, %v355_v60  ;;  %v249_v10 = vmul.f32 %v566_v6, %v778_v37  ;;  %v568_v12 = vpop.eup %567  ;;  %v259_v14 = vand.u32 2147483648, %v778_v37 }
  0xad   :  { %490 = vst.msk [vmem:[%s1034_s4] sm:$0xff] %vm489_vm6, %v473_v63  ;;  %v416_v9 = vmul.f32 %v562_v50, %v415_v5  ;;  %571 = vrcp.f32 %v818_v7  ;;  %v520_v16 = vmul.f32 -1.442695, %v776_v33  ;;  %v309_v20 = vmul.f32 %v568_v12, %v780_v38 }
  0xae   :  { %494 = vst.msk [vmem:[%s1034_s4 + $0x20] sm:$0xff] %vm489_vm6, %v477_v3  ;;  %v357_v41 = vadd.f32 %v560_v43, %v356_v4  ;;  %v250_v19 = vsub.f32 1.0, %v249_v10  ;;  %vm254_vm7 = vweird.f32 %v566_v6  ;;  %v317_v11 = vand.u32 2147483647, %v780_v38  ;;  %v570_v28 = vpop.eup %569 }
  0xaf   :  { %v417_v18 = vadd.f32 %v562_v50, %v416_v9  ;;  %v319_v22 = vand.u32 2147483648, %v780_v38  ;;  %v310_v26 = vsub.f32 1.0, %v309_v20  ;;  %vm313_vm8 = vweird.f32 %v780_v38  ;;  %vm255_vm10 = vmor %vm253_vm1, %vm254_vm7  ;;  %v116_v20 = vpop.f32.mrf.mxu2 }
  0xb0   :  { %v361_v17 = vsel %vm360_vm3, %v560_v43, %v357_v41  ;;  %v251_v25 = vmul.f32 %v566_v6, %v250_v19  ;;  %vm314_vm9 = vweird.f32 %v568_v12  ;;  %573 = vpow2.f32 %v520_v16  ;;  %v126_v16 = vpop.f32.mrf.mxu3 }
  0xb1   :  { %v366_v21 = vsel %vm790_vm12, %v365_v49, %v361_v17  ;;  %v421_v24 = vsel %vm420_vm5, %v562_v50, %v417_v18  ;;  %v311_v31 = vmul.f32 %v568_v12, %v310_v26  ;;  %v850_v32 = vadd.f32 1.0, %v570_v28  ;;  %vm315_vm12 = vmor %vm313_vm8, %vm314_vm9 }
  0xb2   :  { %v481_v23 = vmul.f32 %v366_v21, %v726_v52  ;;  %v426_v30 = vsel %vm807_vm15, %v425_v40, %v421_v24  ;;  %v252_v52 = vadd.f32 %v566_v6, %v251_v25  ;;  %v260_v44 = vor.u32 1.1754944e-38, %v259_v14 }
  0xb3   :  { %v485_v15 = vmul.f32 %v426_v30, %v729_v53  ;;  %v572_v43 = vpop.eup %571  ;;  %vm855_vm11 = vcmp.eq.f32.partialorder %v317_v11, 8.507059e+37  ;;  %v524_v46 = vmul.f32 -1.442695, %v783_v42  ;;  %v143_v53 = vmul.f32 %v704_v34, %v114_v27 }
  0xb4   :  { %498 = vst.msk [vmem:[%s1034_s4 + $0x40] sm:$0xff] %vm489_vm6, %v481_v23  ;;  %v256_v47 = vsel %vm255_vm10, %v566_v6, %v252_v52  ;;  %v312_v48 = vadd.f32 %v568_v12, %v311_v31  ;;  %v320_v49 = vor.u32 1.1754944e-38, %v319_v22  ;;  %v369_v37 = vmul.f32 %v572_v43, %v818_v7 }
  0xb5   :  { %502 = vst.msk [vmem:[%s1034_s4 + $0x60] sm:$0xff] %vm489_vm6, %v485_v15  ;;  %v261_v50 = vsel %vm827_vm4, %v260_v44, %v256_v47  ;;  %575 = vrcp.f32 %v850_v32  ;;  %v147_v51 = vmul.f32 %v704_v34, %v124_v36  ;;  %v136_v56 = vmul.f32 %v704_v34, %v96_v39 }
  0xb6   :  { %v474_v57 = vmul.f32 %v261_v50, %v732_v54  ;;  %v316_v58 = vsel %vm315_vm12, %v568_v12, %v312_v48  ;;  %v370_v59 = vsub.f32 1.0, %v369_v37  ;;  %v377_v60 = vand.u32 2147483647, %v818_v7  ;;  %v574_v63 = vpop.eup %573 }
  0xb7   :  { %v321_v0 = vsel %vm855_vm11, %v320_v49, %v316_v58  ;;  %v379_v38 = vand.u32 2147483648, %v818_v7  ;;  %577 = vpow2.f32 %v524_v46  ;;  %v880_v62 = vadd.f32 %v709_v35, %v143_v53 }
  0xb8   :  { %491 = vst.msk [vmem:[%s1034_s4 + $0x8] sm:$0xff] %vm489_vm6, %v474_v57  ;;  %v478_v54 = vmul.f32 %v321_v0, %v735_v55  ;;  %v371_v1 = vmul.f32 %v572_v43, %v370_v59  ;;  %vm374_vm13 = vweird.f32 %v572_v43  ;;  %v887_v2 = vadd.f32 1.0, %v574_v63 }
  0xb9   :  { %v528_v3 = vmul.f32 -1.442695, %v880_v62  ;;  %v891_v4 = vadd.f32 %v709_v35, %v147_v51  ;;  %v894_v5 = vadd.f32 %v709_v35, %v136_v56  ;;  %v140_v6 = vmul.f32 %v704_v34, %v106_v61 }
  0xba   :  { %495 = vst.msk [vmem:[%s1034_s4 + $0x28] sm:$0xff] %vm489_vm6, %v478_v54  ;;  %v372_v55 = vadd.f32 %v572_v43, %v371_v1  ;;  %vm373_vm14 = vweird.f32 %v818_v7  ;;  %579 = vrcp.f32 %v887_v2  ;;  %v380_v41 = vor.u32 1.1754944e-38, %v379_v38 }
  0xbb   :  { %v576_v40 = vpop.eup %575  ;;  %vm375_vm15 = vmor %vm373_vm14, %vm374_vm13  ;;  %581 = vpow2.f32 %v528_v3  ;;  %v532_v9 = vmul.f32 -1.442695, %v891_v4  ;;  %v521_v10 = vmul.f32 -1.442695, %v894_v5  ;;  %vm378_vm0 = vcmp.eq.f32.partialorder %v377_v60, 8.507059e+37 }
  0xbc   :  { %v376_v12 = vsel %vm375_vm15, %v572_v43, %v372_v55  ;;  %v429_v13 = vmul.f32 %v576_v40, %v850_v32  ;;  %v437_v14 = vand.u32 2147483647, %v850_v32  ;;  %v439_v7 = vand.u32 2147483648, %v850_v32 }
  0xbd   :  { %v578_v17 = vpop.eup %577  ;;  %v381_v18 = vsel %vm378_vm0, %v380_v41, %v376_v12  ;;  %583 = vpow2.f32 %v532_v9  ;;  %v909_v19 = vadd.f32 %v709_v35, %v140_v6  ;;  %v148_v24 = vmul.f32 %v704_v34, %v126_v16 }
  0xbe   :  { %v482_v21 = vmul.f32 %v381_v18, %v747_v8  ;;  %v430_v11 = vsub.f32 1.0, %v429_v13  ;;  %v912_v22 = vadd.f32 1.0, %v578_v17  ;;  %585 = vpow2.f32 %v521_v10 }
  0xbf   :  { %v525_v23 = vmul.f32 -1.442695, %v909_v19  ;;  %vm434_vm1 = vweird.f32 %v576_v40  ;;  %v144_v8 = vmul.f32 %v704_v34, %v116_v20  ;;  %vm433_vm2 = vweird.f32 %v850_v32 }
  0xc0   :  { %v580_v25 = vpop.eup %579  ;;  %499 = vst.msk [vmem:[%s1034_s4 + $0x48] sm:$0xff] %vm489_vm6, %v482_v21  ;;  %v431_v26 = vmul.f32 %v576_v40, %v430_v11  ;;  %587 = vrcp.f32 %v912_v22  ;;  %vm923_vm3 = vcmp.eq.f32.partialorder %v437_v14, 8.507059e+37  ;;  %v440_v52 = vor.u32 1.1754944e-38, %v439_v7  ;;  %vm435_vm5 = vmor %vm433_vm2, %vm434_vm1 }
  0xc1   :  { %v582_v27 = vpop.eup %581  ;;  %v264_v30 = vmul.f32 %v580_v25, %v887_v2  ;;  %vm268_vm4 = vweird.f32 %v887_v2  ;;  %v272_v34 = vand.u32 2147483647, %v887_v2  ;;  %589 = vpow2.f32 %v525_v23 }
  0xc2   :  { %v432_v15 = vadd.f32 %v576_v40, %v431_v26  ;;  %v929_v31 = vadd.f32 1.0, %v582_v27  ;;  %v933_v32 = vadd.f32 %v709_v35, %v148_v24  ;;  %v274_v45 = vand.u32 2147483648, %v887_v2 }
  0xc3   :  { %v584_v36 = vpop.eup %583  ;;  %v265_v39 = vsub.f32 1.0, %v264_v30  ;;  %v938_v46 = vadd.f32 %v709_v35, %v144_v8  ;;  %vm269_vm7 = vweird.f32 %v580_v25  ;;  %vm273_vm8 = vcmp.eq.f32.partialorder %v272_v34, 8.507059e+37 }
  0xc4   :  { %v586_v43 = vpop.eup %585  ;;  %v436_v44 = vsel %vm435_vm5, %v576_v40, %v432_v15  ;;  %591 = vrcp.f32 %v929_v31  ;;  %v942_v48 = vadd.f32 1.0, %v584_v36  ;;  %vm270_vm9 = vmor %vm268_vm4, %vm269_vm7  ;;  %v275_v35 = vor.u32 1.1754944e-38, %v274_v45 }
  0xc5   :  { %v441_v53 = vsel %vm923_vm3, %v440_v52, %v436_v44  ;;  %v266_v47 = vmul.f32 %v580_v25, %v265_v39  ;;  %v945_v50 = vadd.f32 1.0, %v586_v43  ;;  %v332_v57 = vand.u32 2147483647, %v912_v22 }
  0xc6   :  { %v588_v49 = vpop.eup %587  ;;  %v486_v37 = vmul.f32 %v441_v53, %v771_v29  ;;  %593 = vrcp.f32 %v942_v48  ;;  %v529_v29 = vmul.f32 -1.442695, %v938_v46  ;;  %v334_v61 = vand.u32 2147483648, %v912_v22 }
  0xc7   :  { %v267_v51 = vadd.f32 %v580_v25, %v266_v47  ;;  %v324_v56 = vmul.f32 %v588_v49, %v912_v22  ;;  %v590_v58 = vpop.eup %589  ;;  %595 = vrcp.f32 %v945_v50  ;;  %vm328_vm10 = vweird.f32 %v912_v22 }
  0xc8   :  { %503 = vst.msk [vmem:[%s1034_s4 + $0x68] sm:$0xff] %vm489_vm6, %v486_v37  ;;  %v392_v38 = vand.u32 2147483647, %v929_v31  ;;  %vm329_vm11 = vweird.f32 %v588_v49  ;;  %v394_v3 = vand.u32 2147483648, %v929_v31  ;;  %v964_v6 = vadd.f32 1.0, %v590_v58 }
  0xc9   :  { %v271_v59 = vsel %vm270_vm9, %v580_v25, %v267_v51  ;;  %v325_v60 = vsub.f32 1.0, %v324_v56  ;;  %597 = vpow2.f32 %v529_v29  ;;  %vm333_vm12 = vcmp.eq.f32.partialorder %v332_v57, 8.507059e+37  ;;  %vm330_vm13 = vmor %vm328_vm10, %vm329_vm11 }
  0xca   :  { %v592_v63 = vpop.eup %591  ;;  %v276_v0 = vsel %vm273_vm8, %v275_v35, %v271_v59  ;;  %v335_v40 = vor.u32 1.1754944e-38, %v334_v61  ;;  %vm388_vm14 = vweird.f32 %v929_v31  ;;  %vm973_vm15 = vcmp.eq.f32.partialorder %v392_v38, 8.507059e+37 }
  0xcb   :  { %v475_v54 = vmul.f32 %v276_v0, %v776_v33  ;;  %v326_v1 = vmul.f32 %v588_v49, %v325_v60  ;;  %v384_v2 = vmul.f32 %v592_v63, %v929_v31  ;;  %599 = vrcp.f32 %v964_v6 }
  0xcc   :  { %v594_v9 = vpop.eup %593  ;;  %v533_v10 = vmul.f32 -1.442695, %v933_v32  ;;  %vm389_vm0 = vweird.f32 %v592_v63  ;;  %v395_v18 = vor.u32 1.1754944e-38, %v394_v3  ;;  %v452_v7 = vand.u32 2147483647, %v942_v48 }
  0xcd   :  { %492 = vst.msk [vmem:[%s1034_s4 + $0x10] sm:$0xff] %vm489_vm6, %v475_v54  ;;  %v327_v55 = vadd.f32 %v588_v49, %v326_v1  ;;  %v385_v41 = vsub.f32 1.0, %v384_v2  ;;  %v596_v12 = vpop.eup %595  ;;  %v444_v16 = vmul.f32 %v594_v9, %v942_v48  ;;  %v454_v23 = vand.u32 2147483648, %v942_v48  ;;  %vm390_vm1 = vmor %vm388_vm14, %vm389_vm0 }
  0xce   :  { %v279_v20 = vmul.f32 %v596_v12, %v945_v50  ;;  %v287_v26 = vand.u32 2147483647, %v945_v50  ;;  %v289_v8 = vand.u32 2147483648, %v945_v50  ;;  %601 = vpow2.f32 %v533_v10 }
  0xcf   :  { %v331_v13 = vsel %vm330_vm13, %v588_v49, %v327_v55  ;;  %v386_v14 = vmul.f32 %v592_v63, %v385_v41  ;;  %v445_v22 = vsub.f32 1.0, %v444_v16  ;;  %v598_v24 = vpop.eup %597  ;;  %vm449_vm2 = vweird.f32 %v594_v9 }
  0xd0   :  { %v336_v17 = vsel %vm333_vm12, %v335_v40, %v331_v13  ;;  %v280_v25 = vsub.f32 1.0, %v279_v20  ;;  %v228_v28 = vadd.f32 1.0, %v598_v24  ;;  %vm448_vm3 = vweird.f32 %v942_v48 }
  0xd1   :  { %v479_v21 = vmul.f32 %v336_v17, %v783_v42  ;;  %v387_v11 = vadd.f32 %v592_v63, %v386_v14  ;;  %v446_v27 = vmul.f32 %v594_v9, %v445_v22  ;;  %v600_v30 = vpop.eup %599  ;;  %vm284_vm4 = vweird.f32 %v596_v12  ;;  %vm450_vm7 = vmor %vm448_vm3, %vm449_vm2 }
  0xd2   :  { %v281_v52 = vmul.f32 %v596_v12, %v280_v25  ;;  %vm283_vm5 = vweird.f32 %v945_v50  ;;  %v339_v39 = vmul.f32 %v600_v30, %v964_v6  ;;  %vm453_vm8 = vcmp.eq.f32.partialorder %v452_v7, 8.507059e+37 }
  0xd3   :  { %496 = vst.msk [vmem:[%s1034_s4 + $0x30] sm:$0xff] %vm489_vm6, %v479_v21  ;;  %v391_v42 = vsel %vm390_vm1, %v592_v63, %v387_v11  ;;  %v447_v36 = vadd.f32 %v594_v9, %v446_v27  ;;  %v455_v34 = vor.u32 1.1754944e-38, %v454_v23  ;;  %603 = vrcp.f32 %v228_v28  ;;  %vm285_vm9 = vmor %vm283_vm5, %vm284_vm4 }
  0xd4   :  { %v396_v15 = vsel %vm973_vm15, %v395_v18, %v391_v42  ;;  %v282_v43 = vadd.f32 %v596_v12, %v281_v52  ;;  %vm288_vm10 = vcmp.eq.f32.partialorder %v287_v26, 8.507059e+37  ;;  %v290_v45 = vor.u32 1.1754944e-38, %v289_v8  ;;  %v602_v53 = vpop.eup %601 }
  0xd5   :  { %v483_v31 = vmul.f32 %v396_v15, %v880_v62  ;;  %v451_v44 = vsel %vm450_vm7, %v594_v9, %v447_v36  ;;  %v340_v62 = vsub.f32 1.0, %v339_v39  ;;  %v347_v49 = vand.u32 2147483647, %v964_v6 }
  0xd6   :  { %v456_v47 = vsel %vm453_vm8, %v455_v34, %v451_v44  ;;  %v286_v48 = vsel %vm285_vm9, %v596_v12, %v282_v43  ;;  %v349_v37 = vand.u32 2147483648, %v964_v6  ;;  %vm344_vm11 = vweird.f32 %v600_v30 }
  0xd7   :  { %500 = vst.msk [vmem:[%s1034_s4 + $0x50] sm:$0xff] %vm489_vm6, %v483_v31  ;;  %v487_v50 = vmul.f32 %v456_v47, %v891_v4  ;;  %v291_v51 = vsel %vm288_vm10, %v290_v45, %v286_v48  ;;  %v341_v56 = vmul.f32 %v600_v30, %v340_v62  ;;  %v232_v57 = vadd.f32 1.0, %v602_v53 }
  0xd8   :  { %v476_v35 = vmul.f32 %v291_v51, %v894_v5  ;;  %vm343_vm12 = vweird.f32 %v964_v6  ;;  %v350_v4 = vor.u32 1.1754944e-38, %v349_v37  ;;  %vm348_vm14 = vcmp.eq.f32.partialorder %v347_v49, 8.507059e+37 }
  0xd9   :  { %504 = vst.msk [vmem:[%s1034_s4 + $0x70] sm:$0xff] %vm489_vm6, %v487_v50  ;;  %v342_v29 = vadd.f32 %v600_v30, %v341_v56  ;;  %v604_v58 = vpop.eup %603  ;;  %vm345_vm13 = vmor %vm343_vm12, %vm344_vm11  ;;  %605 = vrcp.f32 %v232_v57  ;;  %v409_v0 = vand.u32 2147483648, %v228_v28  ;;  %v407_v54 = vand.u32 2147483647, %v228_v28 }
  0xda   :  { %493 = vst.msk [vmem:[%s1034_s4 + $0x18] sm:$0xff] %vm489_vm6, %v476_v35  ;;  %v399_v5 = vmul.f32 %v604_v58, %v228_v28  ;;  %vm404_vm15 = vweird.f32 %v604_v58  ;;  %vm403_vm0 = vweird.f32 %v228_v28  ;;  %v469_v41 = vand.u32 2147483648, %v232_v57 }
  0xdb   :  { %v346_v59 = vsel %vm345_vm13, %v600_v30, %v342_v29  ;;  %vm405_vm1 = vmor %vm403_vm0, %vm404_vm15  ;;  %v410_v6 = vor.u32 1.1754944e-38, %v409_v0  ;;  %vm408_vm2 = vcmp.eq.f32.partialorder %v407_v54, 8.507059e+37  ;;  %v467_v10 = vand.u32 2147483647, %v232_v57 }
  0xdc   :  { %v351_v60 = vsel %vm348_vm14, %v350_v4, %v346_v59  ;;  %v400_v63 = vsub.f32 1.0, %v399_v5  ;;  %vm463_vm4 = vweird.f32 %v232_v57  ;;  %v470_v13 = vor.u32 1.1754944e-38, %v469_v41 }
  0xdd   :  { %v480_v61 = vmul.f32 %v351_v60, %v909_v19  ;;  %vm468_vm7 = vcmp.eq.f32.partialorder %v467_v10, 8.507059e+37 }
  0xde   :  { %v401_v38 = vmul.f32 %v604_v58, %v400_v63 }
  0xdf   :  { %497 = vst.msk [vmem:[%s1034_s4 + $0x38] sm:$0xff] %vm489_vm6, %v480_v61  ;;  %v606_v1 = vpop.eup %605 }
  0xe0   :  { %v402_v2 = vadd.f32 %v604_v58, %v401_v38  ;;  %v459_v3 = vmul.f32 %v606_v1, %v232_v57  ;;  %vm464_vm3 = vweird.f32 %v606_v1 }
  0xe1   :  { %vm465_vm5 = vmor %vm463_vm4, %vm464_vm3 }
  0xe2   :  { %v406_v55 = vsel %vm405_vm1, %v604_v58, %v402_v2  ;;  %v460_v40 = vsub.f32 1.0, %v459_v3 }
  0xe3   :  { %v411_v19 = vsel %vm408_vm2, %v410_v6, %v406_v55 }
  0xe4   :  { %v484_v9 = vmul.f32 %v411_v19, %v938_v46  ;;  %v461_v33 = vmul.f32 %v606_v1, %v460_v40 }
  0xe6   :  { %501 = vst.msk [vmem:[%s1034_s4 + $0x58] sm:$0xff] %vm489_vm6, %v484_v9  ;;  %v462_v12 = vadd.f32 %v606_v1, %v461_v33 }
  0xe8   :  { %v466_v14 = vsel %vm465_vm5, %v606_v1, %v462_v12 }
  0xe9   :  { %v471_v16 = vsel %vm468_vm7, %v470_v13, %v466_v14 }
  0xea   :  { %v488_v17 = vmul.f32 %v471_v16, %v933_v32 }
  0xec   :  { %505 = vst.msk [vmem:[%s1034_s4 + $0x78] sm:$0xff] %vm489_vm6, %v488_v17 }

// kernel: _lambda_.17
= control target key start
LH: loop header
LB: loop body
LE: loop exit
PB: predicated region body
PF: predicated region fallthrough
CT: control target
= control target key end

     0   :  { %s682_s21 = smov 0   ;;  %s684_s22 = smov 0   ;;  %s770_s0 = inlined_call_operand.vmem [shape: f32[2,64,16], index: 0, kind: input, shape index: {}]   ;;  %s771_s1 = inlined_call_operand.vmem [shape: f32[2,1,16], index: 1, kind: input, shape index: {}]   ;;  %s772_s2 = inlined_call_operand.vmem [shape: f32[16,16], index: 2, kind: input, shape index: {}]   ;;  %s773_s3 = inlined_call_operand.vmem [shape: f32[1,16], index: 3, kind: input, shape index: {}]   ;;  %s774_s4 = inlined_call_operand.vmem [shape: f32[1,16], index: 4, kind: input, shape index: {}]   ;;  %s775_s5 = inlined_call_operand.vmem [shape: f32[2,64,16], index: 5, kind: input, shape index: {}]   ;;  %s776_s6 = inlined_call_operand.vmem [shape: f32[2,64,16], index: 6, kind: output, shape index: {}]  }
   0x1   :  { %s686_s23 = smov 0  }
   0x2 LB: > { %s28_s24 = sadd.s32 1, %s641_s22  ;;  %p577_p0 = scmp.ge.s32.totalorder %s645_s23, 1  ;;  %s645_s23 = sphi %s686_s23, %s16_s23   ;;  %s641_s22 = sphi %s684_s22, %s778_s22   ;;  %s637_s21 = sphi %s682_s21, %s777_s21  }
   0x3   : > { %p30_p1 = scmp.ge.s32.totalorder %s28_s24, 2  ;;  %p258_p2 = scmp.lt.s32.totalorder %s645_s23, 3 }
   0x5   : > { %s780_s24 = smov (%p30_p1, %s28_s24), 0  ;;  %p259_p3 = pnand %p577_p0, %p258_p2 }
   0x6   : > { %p309_p4 = scmp.lt.s32.totalorder (!%p259_p3), %s637_s21, 1 }
   0x7   : > { %262 = sbr.rel (%p259_p3) target bundleno = 169 (0xa9), region = 44 }
   0xc   : > { %v366_v0 = vld [vmem:[%s772_s2] sm:$0xff]  ;;  %v367_v1 = vld [vmem:[%s772_s2 + $0x8] sm:$0xff]  ;;  %s782_s21 = smov (!%p309_p4, %s637_s21), 1  ;;  %vm369_vm0 = vcmask 130048  }
   0xd   : > { %v368_v2 = vpack.c.bf16 %v367_v1, %v366_v0  ;;  %s706_s29 = sshll.u32 %s782_s21, 6  ;;  %s320_s8 = scalar_lea.vmem %s771_s1, %s782_s21  ;;  %v621_v24 = vld [vmem:[%s773_s3] ss:$0 sm:$0xff] }
   0xe   : > { %s316_s11 = scalar_lea.vmem %s770_s0, %s706_s29  ;;  %v620_v3 = vld [vmem:[%s320_s8] ss:$0 sm:$0xff]  ;;  %s726_s16 = scalar_lea.vmem %s775_s5, %s706_s29 }
   0xf   : > { %389 = vmatpush.bf16.msra.mxu0 %v368_v2  ;;  %593 = vmatpush.bf16.msra.mxu1 %v368_v2  ;;  %v342_v4 = vld [vmem:[%s316_s11] sm:$0xff]  ;;  %v343_v5 = vld [vmem:[%s316_s11 + $0x8] sm:$0xff]  ;;  %v344_v6 = vld [vmem:[%s316_s11 + $0x10] sm:$0xff]  ;;  %s737_s21 = scalar_lea.vmem %s776_s6, %s706_s29 }
  0x10   : > { %594 = vmatpush.bf16.msra.mxu2 %v368_v2  ;;  %595 = vmatpush.bf16.msra.mxu3 %v368_v2  ;;  %v354_v7 = vmul.f32 %v620_v3, %v342_v4  ;;  %v355_v8 = vmul.f32 %v620_v3, %v343_v5  ;;  %v345_v9 = vld [vmem:[%s316_s11 + $0x18] sm:$0xff]  ;;  %v356_v10 = vmul.f32 %v620_v3, %v344_v6  ;;  %v346_v11 = vld [vmem:[%s316_s11 + $0x20] sm:$0xff]  ;;  %v347_v12 = vld [vmem:[%s316_s11 + $0x28] sm:$0xff] }
  0x11   : > { %v357_v13 = vmul.f32 %v620_v3, %v345_v9  ;;  %v358_v14 = vmul.f32 %v620_v3, %v346_v11  ;;  %v359_v15 = vmul.f32 %v620_v3, %v347_v12  ;;  %v348_v16 = vld [vmem:[%s316_s11 + $0x30] sm:$0xff]  ;;  %v349_v17 = vld [vmem:[%s316_s11 + $0x38] sm:$0xff]  ;;  %v622_v25 = vld [vmem:[%s774_s4] ss:$0 sm:$0xff] }
  0x12   : > { %v362_v18 = vpack.c.bf16 %v355_v8, %v354_v7  ;;  %v360_v19 = vmul.f32 %v620_v3, %v348_v16  ;;  %v361_v20 = vmul.f32 %v620_v3, %v349_v17  ;;  %v435_v29 = vld [vmem:[%s726_s16] sm:$0xff]  ;;  %v437_v32 = vld [vmem:[%s726_s16 + $0x10] sm:$0xff]  ;;  %v436_v46 = vld [vmem:[%s726_s16 + $0x8] sm:$0xff] }
  0x13   : > { %v363_v21 = vpack.c.bf16 %v357_v13, %v356_v10  ;;  %v364_v22 = vpack.c.bf16 %v359_v15, %v358_v14  ;;  %v439_v40 = vld [vmem:[%s726_s16 + $0x20] sm:$0xff]  ;;  %v441_v45 = vld [vmem:[%s726_s16 + $0x30] sm:$0xff]  ;;  %v438_v50 = vld [vmem:[%s726_s16 + $0x18] sm:$0xff] }
  0x14   : > { %584 = vmatmul.msk.bf16.vlgmr.msra.gmra.mxu0 %vm369_vm0, %v362_v18  ;;  %v365_v23 = vpack.c.bf16 %v361_v20, %v360_v19  ;;  %v440_v59 = vld [vmem:[%s726_s16 + $0x28] sm:$0xff]  ;;  %v442_v62 = vld [vmem:[%s726_s16 + $0x38] sm:$0xff] }
  0x15   : > { %585 = vmatmul.msk.bf16.vlgmr.msra.gmra.mxu1 %vm369_vm0, %v363_v21  ;;  %586 = vmatmul.msk.bf16.vlgmr.msra.gmra.mxu2 %vm369_vm0, %v364_v22 }
  0x16   : > { %587 = vmatmul.msk.bf16.vlgmr.msra.gmra.mxu3 %vm369_vm0, %v365_v23 }
  0x91   : > { %v391_v26 = vpop.f32.mrf.mxu0 }
  0x92   : > { %v415_v27 = vmul.f32 %v621_v24, %v391_v26  ;;  %v396_v28 = vpop.f32.mrf.mxu1 }
  0x93   : > { %v417_v30 = vmul.f32 %v621_v24, %v396_v28 }
  0x94   : > { %v427_v31 = vadd.f32 %v622_v25, %v415_v27 }
  0x95   : > { %v429_v33 = vadd.f32 %v622_v25, %v417_v30 }
  0x96   : > { %v443_v34 = vadd.f32 %v435_v29, %v427_v31 }
  0x97   : > { %v445_v35 = vadd.f32 %v437_v32, %v429_v33 }
  0x98   : > { %451 = vst.msk [vmem:[%s737_s21] sm:$0xff] %vm369_vm0, %v443_v34  ;;  %v401_v36 = vpop.f32.mrf.mxu2 }
  0x99   : > { %453 = vst.msk [vmem:[%s737_s21 + $0x10] sm:$0xff] %vm369_vm0, %v445_v35  ;;  %v419_v37 = vmul.f32 %v621_v24, %v401_v36  ;;  %v406_v38 = vpop.f32.mrf.mxu3  ;;  %v393_v39 = vpop.f32.mrf.mxu0 }
  0x9a   : > { %v421_v41 = vmul.f32 %v621_v24, %v406_v38  ;;  %v416_v42 = vmul.f32 %v621_v24, %v393_v39  ;;  %v398_v43 = vpop.f32.mrf.mxu1 }
  0x9b   : > { %v431_v44 = vadd.f32 %v622_v25, %v419_v37  ;;  %v418_v47 = vmul.f32 %v621_v24, %v398_v43 }
  0x9c   : > { %v433_v48 = vadd.f32 %v622_v25, %v421_v41  ;;  %v428_v49 = vadd.f32 %v622_v25, %v416_v42 }
  0x9d   : > { %v447_v51 = vadd.f32 %v439_v40, %v431_v44  ;;  %v430_v52 = vadd.f32 %v622_v25, %v418_v47 }
  0x9e   : > { %v449_v53 = vadd.f32 %v441_v45, %v433_v48  ;;  %v444_v54 = vadd.f32 %v436_v46, %v428_v49 }
  0x9f   : > { %455 = vst.msk [vmem:[%s737_s21 + $0x20] sm:$0xff] %vm369_vm0, %v447_v51  ;;  %v446_v55 = vadd.f32 %v438_v50, %v430_v52 }
  0xa0   : > { %457 = vst.msk [vmem:[%s737_s21 + $0x30] sm:$0xff] %vm369_vm0, %v449_v53  ;;  %v403_v56 = vpop.f32.mrf.mxu2 }
  0xa1   : > { %452 = vst.msk [vmem:[%s737_s21 + $0x8] sm:$0xff] %vm369_vm0, %v444_v54  ;;  %v420_v57 = vmul.f32 %v621_v24, %v403_v56  ;;  %v408_v58 = vpop.f32.mrf.mxu3 }
  0xa2   : > { %454 = vst.msk [vmem:[%s737_s21 + $0x18] sm:$0xff] %vm369_vm0, %v446_v55  ;;  %v422_v60 = vmul.f32 %v621_v24, %v408_v58 }
  0xa3   : > { %v432_v61 = vadd.f32 %v622_v25, %v420_v57 }
  0xa4   : > { %v434_v63 = vadd.f32 %v622_v25, %v422_v60 }
  0xa5   : > { %v448_v0 = vadd.f32 %v440_v59, %v432_v61 }
  0xa6   : > { %v450_v1 = vadd.f32 %v442_v62, %v434_v63 }
  0xa7   : > { %456 = vst.msk [vmem:[%s737_s21 + $0x28] sm:$0xff] %vm369_vm0, %v448_v0 }
  0xa8   : > { %458 = vst.msk [vmem:[%s737_s21 + $0x38] sm:$0xff] %vm369_vm0, %v450_v1 }
  0xa9 PF: > { %s16_s23 = sadd.s32 1, %s645_s23   ;;  %s777_s21 = smov %s641_s22 }
  0xaa   : > { %p13_p5 = scmp.ge.s32.totalorder %s16_s23, 4   ;;  %s778_s22 = smov %s780_s24 }
  0xac   :  { %15 = sbr.rel (!%p13_p5) target bundleno = 2 (0x2), region = 80 }

// kernel: _lambda_.16
= control target key start
LH: loop header
LB: loop body
LE: loop exit
PB: predicated region body
PF: predicated region fallthrough
CT: control target
= control target key end

     0   :  { %vm18_vm0 = vcmask 123904   ;;  %vm37_vm1 = vcmask 130048   ;;  %v205_v2 = vmov 0.0   ;;  %vm82_vm2 = vcmask 1041409   ;;  %s306_s1 = inlined_call_operand.vmem [shape: f32[16,4], index: 1, kind: input, shape index: {}]   ;;  %s307_s0 = inlined_call_operand.vmem [shape: f32[2,64,16], index: 0, kind: input, shape index: {}]   ;;  %s308_s2 = inlined_call_operand.vmem [shape: f32[4,16], index: 2, kind: input, shape index: {}]   ;;  %s309_s3 = inlined_call_operand.vmem [shape: f32[2,16], index: 3, kind: output, shape index: {}]  }
   0x1   :  { %v94_v0 = vld [vmem:[%s306_s1 + $0x8] sm:$0xff]  ;;  %v93_v1 = vld [vmem:[%s306_s1] sm:$0xff]  ;;  %19 = vst.msk [vmem:[#allocation2] sm:$0x3] %vm18_vm0, %v205_v2  ;;  %v23_v5 = vld [vmem:[%s307_s0 + $0x10] sm:$0xff]  ;;  %vm143_vm3 = vcmask 1043456  }
   0x2   :  { %v21_v3 = vld [vmem:[%s307_s0] sm:$0xff]  ;;  %112 = vmatpush.msra.mxu0 %v94_v0  ;;  %v22_v4 = vld [vmem:[%s307_s0 + $0x8] sm:$0xff]  ;;  %v24_v6 = vld [vmem:[%s307_s0 + $0x18] sm:$0xff]  ;;  %v41_v9 = vsel %vm37_vm1, %v23_v5, 0.0  ;;  %vm139_vm8 = vcmask 31744  }
   0x3   :  { %v38_v7 = vsel %vm37_vm1, %v21_v3, 0.0  ;;  %v39_v8 = vsel %vm37_vm1, %v22_v4, 0.0  ;;  %v25_v10 = vld [vmem:[%s307_s0 + $0x20] sm:$0xff]  ;;  %v30_v12 = vld [vmem:[%s307_s0 + $0x48] sm:$0xff]  ;;  %v31_v14 = vld [vmem:[%s307_s0 + $0x50] sm:$0xff]  ;;  %v43_v16 = vsel %vm37_vm1, %v24_v6, 0.0 }
   0x4   :  { %113 = vmatpush.msra.mxu0 %v93_v1  ;;  %v29_v11 = vld [vmem:[%s307_s0 + $0x40] sm:$0xff]  ;;  %v40_v13 = vadd.f32 %v39_v8, %v38_v7  ;;  %v32_v15 = vld [vmem:[%s307_s0 + $0x58] sm:$0xff]  ;;  %v60_v18 = vsel %vm37_vm1, %v30_v12, 0.0  ;;  %v26_v19 = vld [vmem:[%s307_s0 + $0x28] sm:$0xff]  ;;  %v62_v23 = vsel %vm37_vm1, %v31_v14, 0.0  ;;  %v45_v24 = vsel %vm37_vm1, %v25_v10, 0.0 }
   0x5   :  { %v59_v17 = vsel %vm37_vm1, %v29_v11, 0.0  ;;  %v33_v20 = vld [vmem:[%s307_s0 + $0x60] sm:$0xff]  ;;  %v64_v25 = vsel %vm37_vm1, %v32_v15, 0.0  ;;  %v27_v26 = vld [vmem:[%s307_s0 + $0x30] sm:$0xff]  ;;  %v34_v27 = vld [vmem:[%s307_s0 + $0x68] sm:$0xff]  ;;  %v47_v30 = vsel %vm37_vm1, %v26_v19, 0.0 }
   0x6   :  { %v42_v21 = vadd.f32 %v41_v9, %v40_v13  ;;  %v61_v22 = vadd.f32 %v60_v18, %v59_v17  ;;  %v66_v31 = vsel %vm37_vm1, %v33_v20, 0.0  ;;  %v28_v32 = vld [vmem:[%s307_s0 + $0x38] sm:$0xff]  ;;  %v35_v33 = vld [vmem:[%s307_s0 + $0x70] sm:$0xff]  ;;  %v49_v36 = vsel %vm37_vm1, %v27_v26, 0.0  ;;  %v138_v2 = vld [vmem:[%s308_s2] sm:$0xf] }
   0x7   :  { %v68_v37 = vsel %vm37_vm1, %v34_v27, 0.0  ;;  %v36_v38 = vld [vmem:[%s307_s0 + $0x78] sm:$0xff]  ;;  %v51_v41 = vsel %vm37_vm1, %v28_v32, 0.0  ;;  %v70_v42 = vsel %vm37_vm1, %v35_v33, 0.0  ;;  %193 = vmatpush.msk.msra.mxu1 %vm143_vm3, %v138_v2 }
   0x8   :  { %v44_v28 = vadd.f32 %v43_v16, %v42_v21  ;;  %v63_v29 = vadd.f32 %v62_v23, %v61_v22  ;;  %v72_v45 = vsel %vm37_vm1, %v36_v38, 0.0  ;;  %v20_v60 = vld [vmem:[#allocation2] sm:$0x3] }
   0xa   :  { %v46_v34 = vadd.f32 %v45_v24, %v44_v28  ;;  %v65_v35 = vadd.f32 %v64_v25, %v63_v29 }
   0xc   :  { %v48_v39 = vadd.f32 %v47_v30, %v46_v34  ;;  %v67_v40 = vadd.f32 %v66_v31, %v65_v35 }
   0xe   :  { %v50_v43 = vadd.f32 %v49_v36, %v48_v39  ;;  %v69_v44 = vadd.f32 %v68_v37, %v67_v40 }
  0x10   :  { %v52_v46 = vadd.f32 %v51_v41, %v50_v43  ;;  %v71_v47 = vadd.f32 %v70_v42, %v69_v44 }
  0x12   :  { %v53_v48 = vrot.slane %v52_v46, 4  ;;  %v73_v49 = vadd.f32 %v72_v45, %v71_v47 }
  0x14   :  { %v54_v50 = vadd.f32 %v53_v48, %v52_v46  ;;  %v74_v51 = vrot.slane %v73_v49, 4 }
  0x16   :  { %v55_v52 = vrot.slane %v54_v50, 2  ;;  %v75_v53 = vadd.f32 %v74_v51, %v73_v49 }
  0x18   :  { %v56_v54 = vadd.f32 %v55_v52, %v54_v50  ;;  %v76_v55 = vrot.slane %v75_v53, 2 }
  0x1a   :  { %v57_v56 = vrot.slane %v56_v54, 1  ;;  %v77_v57 = vadd.f32 %v76_v55, %v75_v53 }
  0x1c   :  { %v58_v58 = vadd.f32 %v57_v56, %v56_v54  ;;  %v78_v59 = vrot.slane %v77_v57, 1 }
  0x1e   :  { %v79_v61 = vadd.f32 %v78_v59, %v77_v57 }
  0x20   :  { %v83_v62 = vsel %vm82_vm2, %v79_v61, %v58_v58 }
  0x21   :  { %v85_v63 = vadd.f32 %v83_v62, %v20_v60 }
  0x23   :  { %87 = vst.msk [vmem:[#allocation2] sm:$0x3] %vm18_vm0, %v85_v63 }
  0x2a   :  { %v91_v0 = vld [vmem:[#allocation2] sm:$0x3] }
  0x2b   :  { %v92_v1 = vmul.f32 0.015625, %v91_v0 }
  0x2d   :  { %191 = vmatmul.msk.f32.vlgmr.msra.gmra.mxu0 %vm37_vm1, %v92_v1 }
  0xaa   :  { %v115_v3 = vpop.f32.mrf.mxu0 }
  0xab   :  { %v192_v4 = vmul.f32 -1.442695, %v115_v3 }
  0xad   :  { %197 = vpow2.f32 %v192_v4 }
  0xb3   :  { %v198_v5 = vpop.eup %197 }
  0xb4   :  { %v121_v6 = vadd.f32 1.0, %v198_v5 }
  0xb6   :  { %199 = vrcp.f32 %v121_v6  ;;  %v133_v10 = vand.u32 2147483648, %v121_v6  ;;  %v131_v12 = vand.u32 2147483647, %v121_v6  ;;  %vm127_vm5 = vweird.f32 %v121_v6 }
  0xb8   :  { %v134_v14 = vor.u32 1.1754944e-38, %v133_v10  ;;  %vm132_vm7 = vcmp.eq.f32.partialorder %v131_v12, 8.507059e+37 }
  0xbc   :  { %v200_v7 = vpop.eup %199 }
  0xbd   :  { %v123_v8 = vmul.f32 %v200_v7, %v121_v6  ;;  %vm128_vm4 = vweird.f32 %v200_v7 }
  0xbe   :  { %vm129_vm6 = vmor %vm127_vm5, %vm128_vm4 }
  0xbf   :  { %v124_v9 = vsub.f32 1.0, %v123_v8 }
  0xc1   :  { %v125_v11 = vmul.f32 %v200_v7, %v124_v9 }
  0xc3   :  { %v126_v13 = vadd.f32 %v200_v7, %v125_v11 }
  0xc5   :  { %v130_v15 = vsel %vm129_vm6, %v200_v7, %v126_v13 }
  0xc6   :  { %v135_v16 = vsel %vm132_vm7, %v134_v14, %v130_v15 }
  0xc7   :  { %v137_v17 = vmul.f32 %v135_v16, %v115_v3 }
  0xc9   :  { %194 = vmatmul.msk.f32.vlgmr.msra.gmra.mxu1 %vm139_vm8, %v137_v17 }
 0x146   :  { %v164_v18 = vpop.f32.mrf.mxu1 }
 0x147   :  { %v195_v19 = vmul.f32 -1.442695, %v164_v18 }
 0x149   :  { %201 = vpow2.f32 %v195_v19 }
 0x14f   :  { %v202_v20 = vpop.eup %201 }
 0x150   :  { %v170_v21 = vadd.f32 1.0, %v202_v20 }
 0x152   :  { %203 = vrcp.f32 %v170_v21  ;;  %v182_v25 = vand.u32 2147483648, %v170_v21  ;;  %v180_v27 = vand.u32 2147483647, %v170_v21  ;;  %vm176_vm10 = vweird.f32 %v170_v21 }
 0x154   :  { %v183_v29 = vor.u32 1.1754944e-38, %v182_v25  ;;  %vm181_vm12 = vcmp.eq.f32.partialorder %v180_v27, 8.507059e+37 }
 0x158   :  { %v204_v22 = vpop.eup %203 }
 0x159   :  { %v172_v23 = vmul.f32 %v204_v22, %v170_v21  ;;  %vm177_vm9 = vweird.f32 %v204_v22 }
 0x15a   :  { %vm178_vm11 = vmor %vm176_vm10, %vm177_vm9 }
 0x15b   :  { %v173_v24 = vsub.f32 1.0, %v172_v23 }
 0x15d   :  { %v174_v26 = vmul.f32 %v204_v22, %v173_v24 }
 0x15f   :  { %v175_v28 = vadd.f32 %v204_v22, %v174_v26 }
 0x161   :  { %v179_v30 = vsel %vm178_vm11, %v204_v22, %v175_v28 }
 0x162   :  { %v184_v31 = vsel %vm181_vm12, %v183_v29, %v179_v30 }
 0x163   :  { %186 = vst.msk [vmem:[%s309_s3] sm:$0x3] %vm18_vm0, %v184_v31 }

// kernel: _lambda_.15
= control target key start
LH: loop header
LB: loop body
LE: loop exit
PB: predicated region body
PF: predicated region fallthrough
CT: control target
= control target key end

     0   :  { %s1047_s15 = smov 0   ;;  %s1613_s0 = inlined_call_operand.vmem [shape: f32[2,10,10,16], index: 0, kind: input, shape index: {}]   ;;  %s1614_s1 = inlined_call_operand.vmem [shape: f32[9,16], index: 1, kind: input, shape index: {}]   ;;  %s1615_s2 = inlined_call_operand.vmem [shape: f32[1,16], index: 2, kind: input, shape index: {}]   ;;  %s1616_s3 = inlined_call_operand.vmem [shape: f32[1,16], index: 3, kind: input, shape index: {}]   ;;  %s1617_s4 = inlined_call_operand.vmem [shape: f32[2,8,8,16], index: 4, kind: output, shape index: {}]  }
   0x1 LB: > { %s951_s16 = sadd.s32 4294967295, %s1020_s15   ;;  %p955_p0 = scmp.ge.s32.totalorder %s1020_s15, 1  ;;  %s1020_s15 = sphi %s1047_s15, %s14_s15  }
   0x2   : > { %p162_p1 = scmp.lt.s32.totalorder %s1020_s15, 3 }
   0x4   : > { %p163_p2 = pnand %p955_p0, %p162_p1 }
   0x5   : > { %p188_p3 = scmp.lt.s32.totalorder (!%p163_p2), %s951_s16, 1 }
   0x6   : > { %166 = sbr.rel (%p163_p2) target bundleno = 152 (0x98), region = 36 }
   0xb   : > { %v1058_v0 = vld [vmem:[%s1614_s1] sm:$0xff]  ;;  %s1645_s16 = smov (!%p188_p3, %s951_s16), 1  ;;  %vm262_vm0 = vcmask 1046528   ;;  %vm336_vm1 = vcmask 1045504  }
   0xc   : > { %s970_s19 = smul.u32 160, %s1645_s16  ;;  %v220_v1 = vperm.slane %v1058_v0, 0  ;;  %v229_v2 = vperm.slane %v1058_v0, 1  ;;  %v1071_v3 = vperm.slane %v1058_v0, 2  ;;  %v1083_v7 = vperm.slane %v1058_v0, 3  ;;  %s969_s29 = sshll.u32 %s1645_s16, 6 }
   0xd   : > { %v1086_v8 = vperm.slane %v1058_v0, 4  ;;  %s1565_s6 = scalar_lea.vmem %s1617_s4, %s969_s29 }
   0xe   : > { %s1068_s22 = scalar_lea.vmem %s1613_s0, %s970_s19 }
   0xf   : > { %v1074_v4 = vld [vmem:[%s1068_s22] sm:$0xff]  ;;  %v1077_v5 = vld [vmem:[%s1068_s22 + $0x8] sm:$0x3]  ;;  %v1080_v6 = vld [vmem:[%s1068_s22 + $0x10] sm:$0xff] }
  0x10   : > { %v1089_v9 = vld [vmem:[%s1068_s22 + $0x18] sm:$0x3]  ;;  %v1092_v10 = vld [vmem:[%s1068_s22 + $0x20] sm:$0xff]  ;;  %v1095_v11 = vld [vmem:[%s1068_s22 + $0x28] sm:$0x3]  ;;  %v221_v12 = vmul.f32 %v220_v1, %v1074_v4  ;;  %v222_v13 = vmul.f32 %v220_v1, %v1080_v6  ;;  %v230_v14 = vmul.f32 %v229_v2, %v1074_v4  ;;  %v231_v15 = vmul.f32 %v229_v2, %v1077_v5 }
  0x11   : > { %v1102_v16 = vld [vmem:[%s1068_s22 + $0x30] sm:$0xff]  ;;  %v1105_v17 = vld [vmem:[%s1068_s22 + $0x38] sm:$0x3]  ;;  %v1108_v18 = vld [vmem:[%s1068_s22 + $0x40] sm:$0xff]  ;;  %v223_v19 = vmul.f32 %v220_v1, %v1092_v10  ;;  %v232_v20 = vmul.f32 %v229_v2, %v1080_v6  ;;  %v233_v21 = vmul.f32 %v229_v2, %v1089_v9  ;;  %v234_v22 = vmul.f32 %v229_v2, %v1092_v10 }
  0x12   : > { %v1115_v23 = vld [vmem:[%s1068_s22 + $0x48] sm:$0x3]  ;;  %v1118_v24 = vld [vmem:[%s1068_s22 + $0x50] sm:$0xff]  ;;  %v1121_v25 = vld [vmem:[%s1068_s22 + $0x58] sm:$0x3]  ;;  %v224_v26 = vmul.f32 %v220_v1, %v1102_v16  ;;  %v225_v27 = vmul.f32 %v220_v1, %v1108_v18  ;;  %v235_v28 = vmul.f32 %v229_v2, %v1095_v11  ;;  %v236_v29 = vmul.f32 %v229_v2, %v1102_v16 }
  0x13   : > { %v1128_v30 = vld [vmem:[%s1068_s22 + $0x60] sm:$0xff]  ;;  %v1131_v31 = vld [vmem:[%s1068_s22 + $0x68] sm:$0x3]  ;;  %v1134_v32 = vld [vmem:[%s1068_s22 + $0x70] sm:$0xff]  ;;  %v226_v33 = vmul.f32 %v220_v1, %v1118_v24  ;;  %v237_v34 = vmul.f32 %v229_v2, %v1105_v17  ;;  %v238_v35 = vmul.f32 %v229_v2, %v1108_v18  ;;  %v239_v36 = vmul.f32 %v229_v2, %v1115_v23 }
  0x14   : > { %v1141_v37 = vld [vmem:[%s1068_s22 + $0x78] sm:$0x3]  ;;  %v227_v38 = vmul.f32 %v220_v1, %v1128_v30  ;;  %v228_v39 = vmul.f32 %v220_v1, %v1134_v32  ;;  %v240_v40 = vmul.f32 %v229_v2, %v1118_v24  ;;  %v241_v41 = vmul.f32 %v229_v2, %v1121_v25 }
  0x15   : > { %v242_v42 = vmul.f32 %v229_v2, %v1128_v30  ;;  %v243_v43 = vmul.f32 %v229_v2, %v1131_v31  ;;  %v244_v44 = vmul.f32 %v229_v2, %v1134_v32  ;;  %v245_v45 = vmul.f32 %v229_v2, %v1141_v37 }
  0x16   : > { %v263_v46 = vrot.slane %v230_v14, 1  ;;  %v264_v47 = vrot.slane %v231_v15, 1  ;;  %v266_v48 = vrot.slane %v232_v20, 1  ;;  %v267_v49 = vrot.slane %v233_v21, 1 }
  0x17   : > { %v269_v50 = vrot.slane %v234_v22, 1  ;;  %v270_v51 = vrot.slane %v235_v28, 1  ;;  %v272_v52 = vrot.slane %v236_v29, 1  ;;  %v273_v53 = vrot.slane %v237_v34, 1 }
  0x18   : > { %v265_v54 = vsel %vm262_vm0, %v263_v46, %v264_v47  ;;  %v268_v55 = vsel %vm262_vm0, %v266_v48, %v267_v49  ;;  %v275_v56 = vrot.slane %v238_v35, 1  ;;  %v276_v57 = vrot.slane %v239_v36, 1 }
  0x19   : > { %v271_v58 = vsel %vm262_vm0, %v269_v50, %v270_v51  ;;  %v274_v59 = vsel %vm262_vm0, %v272_v52, %v273_v53  ;;  %v278_v60 = vrot.slane %v240_v40, 1  ;;  %v279_v61 = vrot.slane %v241_v41, 1 }
  0x1a   : > { %v277_v62 = vsel %vm262_vm0, %v275_v56, %v276_v57  ;;  %v281_v63 = vrot.slane %v242_v42, 1  ;;  %v282_v1 = vrot.slane %v243_v43, 1  ;;  %v284_v2 = vrot.slane %v244_v44, 1 }
  0x1b   : > { %v280_v14 = vsel %vm262_vm0, %v278_v60, %v279_v61  ;;  %v285_v15 = vrot.slane %v245_v45, 1  ;;  %v295_v20 = vadd.f32 %v265_v54, %v221_v12  ;;  %v296_v21 = vadd.f32 %v268_v55, %v222_v13 }
  0x1c   : > { %v283_v22 = vsel %vm262_vm0, %v281_v63, %v282_v1  ;;  %v297_v28 = vadd.f32 %v271_v58, %v223_v19  ;;  %v298_v29 = vadd.f32 %v274_v59, %v224_v26  ;;  %v299_v34 = vadd.f32 %v277_v62, %v225_v27 }
  0x1d   : > { %v286_v35 = vsel %vm262_vm0, %v284_v2, %v285_v15  ;;  %v300_v36 = vadd.f32 %v280_v14, %v226_v33  ;;  %v301_v40 = vadd.f32 %v283_v22, %v227_v38  ;;  %v304_v41 = vmul.f32 %v1071_v3, %v1074_v4 }
  0x1e   : > { %v302_v42 = vadd.f32 %v286_v35, %v228_v39  ;;  %v305_v43 = vmul.f32 %v1071_v3, %v1077_v5  ;;  %v306_v12 = vmul.f32 %v1071_v3, %v1080_v6  ;;  %v307_v13 = vmul.f32 %v1071_v3, %v1089_v9 }
  0x1f   : > { %v308_v19 = vmul.f32 %v1071_v3, %v1092_v10  ;;  %v309_v26 = vmul.f32 %v1071_v3, %v1095_v11  ;;  %v310_v27 = vmul.f32 %v1071_v3, %v1102_v16  ;;  %v311_v4 = vmul.f32 %v1071_v3, %v1105_v17 }
  0x20   : > { %v312_v5 = vmul.f32 %v1071_v3, %v1108_v18  ;;  %v313_v33 = vmul.f32 %v1071_v3, %v1115_v23  ;;  %v314_v38 = vmul.f32 %v1071_v3, %v1118_v24  ;;  %v315_v39 = vmul.f32 %v1071_v3, %v1121_v25 }
  0x21   : > { %v316_v44 = vmul.f32 %v1071_v3, %v1128_v30  ;;  %v317_v45 = vmul.f32 %v1071_v3, %v1131_v31  ;;  %v318_v46 = vmul.f32 %v1071_v3, %v1134_v32  ;;  %v319_v47 = vmul.f32 %v1071_v3, %v1141_v37 }
  0x22   : > { %v337_v48 = vrot.slane %v304_v41, 2  ;;  %v338_v49 = vrot.slane %v305_v43, 2  ;;  %v340_v50 = vrot.slane %v306_v12, 2  ;;  %v341_v51 = vrot.slane %v307_v13, 2  ;;  %v1198_v43 = vld [vmem:[%s1068_s22 + $0x80] sm:$0xff] }
  0x23   : > { %v343_v52 = vrot.slane %v308_v19, 2  ;;  %v344_v53 = vrot.slane %v309_v26, 2  ;;  %v346_v54 = vrot.slane %v310_v27, 2  ;;  %v347_v55 = vrot.slane %v311_v4, 2 }
  0x24   : > { %v339_v56 = vsel %vm336_vm1, %v337_v48, %v338_v49  ;;  %v342_v57 = vsel %vm336_vm1, %v340_v50, %v341_v51  ;;  %v349_v58 = vrot.slane %v312_v5, 2  ;;  %v350_v59 = vrot.slane %v313_v33, 2  ;;  %v1219_v50 = vld [vmem:[%s1068_s22 + $0x88] sm:$0x3] }
  0x25   : > { %v345_v60 = vsel %vm336_vm1, %v343_v52, %v344_v53  ;;  %v348_v61 = vsel %vm336_vm1, %v346_v54, %v347_v55  ;;  %v352_v3 = vrot.slane %v314_v38, 2  ;;  %v353_v62 = vrot.slane %v315_v39, 2 }
  0x26   : > { %v351_v63 = vsel %vm336_vm1, %v349_v58, %v350_v59  ;;  %v355_v1 = vrot.slane %v316_v44, 2  ;;  %v356_v2 = vrot.slane %v317_v45, 2  ;;  %v358_v14 = vrot.slane %v318_v46, 2 }
  0x27   : > { %v354_v15 = vsel %vm336_vm1, %v352_v3, %v353_v62  ;;  %v359_v22 = vrot.slane %v319_v47, 2  ;;  %v369_v35 = vadd.f32 %v339_v56, %v295_v20  ;;  %v370_v41 = vadd.f32 %v342_v57, %v296_v21 }
  0x28   : > { %v357_v12 = vsel %vm336_vm1, %v355_v1, %v356_v2  ;;  %v371_v13 = vadd.f32 %v345_v60, %v297_v28  ;;  %v372_v19 = vadd.f32 %v348_v61, %v298_v29  ;;  %v373_v26 = vadd.f32 %v351_v63, %v299_v34 }
  0x29   : > { %v360_v27 = vsel %vm336_vm1, %v358_v14, %v359_v22  ;;  %v374_v4 = vadd.f32 %v354_v15, %v300_v36  ;;  %v375_v5 = vadd.f32 %v357_v12, %v301_v40  ;;  %v378_v33 = vmul.f32 %v1083_v7, %v1080_v6 }
  0x2a   : > { %v376_v38 = vadd.f32 %v360_v27, %v302_v42  ;;  %v379_v20 = vmul.f32 %v1083_v7, %v1092_v10  ;;  %v380_v21 = vmul.f32 %v1083_v7, %v1102_v16  ;;  %v381_v28 = vmul.f32 %v1083_v7, %v1108_v18 }
  0x2b   : > { %v382_v29 = vmul.f32 %v1083_v7, %v1118_v24  ;;  %v383_v34 = vmul.f32 %v1083_v7, %v1128_v30  ;;  %v384_v36 = vmul.f32 %v1083_v7, %v1134_v32  ;;  %v385_v40 = vmul.f32 %v1083_v7, %v1198_v43 }
  0x2c   : > { %v386_v42 = vadd.f32 %v378_v33, %v369_v35  ;;  %v387_v39 = vadd.f32 %v379_v20, %v370_v41  ;;  %v388_v44 = vadd.f32 %v380_v21, %v371_v13  ;;  %v389_v45 = vadd.f32 %v381_v28, %v372_v19 }
  0x2d   : > { %v390_v46 = vadd.f32 %v382_v29, %v373_v26  ;;  %v391_v47 = vadd.f32 %v383_v34, %v374_v4  ;;  %v392_v48 = vadd.f32 %v384_v36, %v375_v5  ;;  %v393_v49 = vadd.f32 %v385_v40, %v376_v38  ;;  %v1261_v34 = vld [vmem:[%s1614_s1 + $0x8] ss:$0 sm:$0xff] }
  0x2e   : > { %v395_v51 = vmul.f32 %v1086_v8, %v1080_v6  ;;  %v396_v52 = vmul.f32 %v1086_v8, %v1089_v9  ;;  %v397_v53 = vmul.f32 %v1086_v8, %v1092_v10  ;;  %v398_v7 = vmul.f32 %v1086_v8, %v1095_v11 }
  0x2f   : > { %v399_v54 = vmul.f32 %v1086_v8, %v1102_v16  ;;  %v400_v55 = vmul.f32 %v1086_v8, %v1105_v17  ;;  %v401_v56 = vmul.f32 %v1086_v8, %v1108_v18  ;;  %v402_v57 = vmul.f32 %v1086_v8, %v1115_v23 }
  0x30   : > { %v403_v58 = vmul.f32 %v1086_v8, %v1118_v24  ;;  %v404_v59 = vmul.f32 %v1086_v8, %v1121_v25  ;;  %v405_v60 = vmul.f32 %v1086_v8, %v1128_v30  ;;  %v406_v61 = vmul.f32 %v1086_v8, %v1131_v31 }
  0x31   : > { %v407_v3 = vmul.f32 %v1086_v8, %v1134_v32  ;;  %v408_v62 = vmul.f32 %v1086_v8, %v1141_v37  ;;  %v409_v63 = vmul.f32 %v1086_v8, %v1198_v43  ;;  %v410_v1 = vmul.f32 %v1086_v8, %v1219_v50 }
  0x32   : > { %v427_v2 = vrot.slane %v395_v51, 1  ;;  %v428_v14 = vrot.slane %v396_v52, 1  ;;  %v430_v15 = vrot.slane %v397_v53, 1  ;;  %v431_v22 = vrot.slane %v398_v7, 1 }
  0x33   : > { %v433_v35 = vrot.slane %v399_v54, 1  ;;  %v434_v41 = vrot.slane %v400_v55, 1  ;;  %v436_v12 = vrot.slane %v401_v56, 1  ;;  %v437_v13 = vrot.slane %v402_v57, 1 }
  0x34   : > { %v429_v19 = vsel %vm262_vm0, %v427_v2, %v428_v14  ;;  %v432_v26 = vsel %vm262_vm0, %v430_v15, %v431_v22  ;;  %v439_v27 = vrot.slane %v403_v58, 1  ;;  %v440_v4 = vrot.slane %v404_v59, 1 }
  0x35   : > { %v435_v5 = vsel %vm262_vm0, %v433_v35, %v434_v41  ;;  %v438_v33 = vsel %vm262_vm0, %v436_v12, %v437_v13  ;;  %v442_v38 = vrot.slane %v405_v60, 1  ;;  %v443_v8 = vrot.slane %v406_v61, 1 }
  0x36   : > { %v441_v20 = vsel %vm262_vm0, %v439_v27, %v440_v4  ;;  %v445_v21 = vrot.slane %v407_v3, 1  ;;  %v446_v28 = vrot.slane %v408_v62, 1  ;;  %v448_v29 = vrot.slane %v409_v63, 1 }
  0x37   : > { %v444_v36 = vsel %vm262_vm0, %v442_v38, %v443_v8  ;;  %v449_v40 = vrot.slane %v410_v1, 1  ;;  %v459_v51 = vadd.f32 %v429_v19, %v386_v42  ;;  %v460_v52 = vadd.f32 %v432_v26, %v387_v39 }
  0x38   : > { %v447_v53 = vsel %vm262_vm0, %v445_v21, %v446_v28  ;;  %v461_v7 = vadd.f32 %v435_v5, %v388_v44  ;;  %v462_v54 = vadd.f32 %v438_v33, %v389_v45  ;;  %v463_v55 = vadd.f32 %v441_v20, %v390_v46 }
  0x39   : > { %v450_v56 = vsel %vm262_vm0, %v448_v29, %v449_v40  ;;  %v464_v57 = vadd.f32 %v444_v36, %v391_v47  ;;  %v465_v58 = vadd.f32 %v447_v53, %v392_v48  ;;  %v467_v59 = vperm.slane %v1058_v0, 5 }
  0x3a   : > { %v466_v60 = vadd.f32 %v450_v56, %v393_v49  ;;  %v540_v61 = vperm.slane %v1058_v0, 6  ;;  %v1269_v3 = vperm.slane %v1058_v0, 7  ;;  %v1273_v42 = vmul.f32 %v1261_v34, %v1092_v10 }
  0x3b   : > { %v468_v39 = vmul.f32 %v467_v59, %v1080_v6  ;;  %v469_v44 = vmul.f32 %v467_v59, %v1089_v9  ;;  %v470_v45 = vmul.f32 %v467_v59, %v1092_v10  ;;  %v471_v46 = vmul.f32 %v467_v59, %v1095_v11 }
  0x3c   : > { %v472_v47 = vmul.f32 %v467_v59, %v1102_v16  ;;  %v473_v48 = vmul.f32 %v467_v59, %v1105_v17  ;;  %v474_v49 = vmul.f32 %v467_v59, %v1108_v18  ;;  %v475_v0 = vmul.f32 %v467_v59, %v1115_v23 }
  0x3d   : > { %v476_v62 = vmul.f32 %v467_v59, %v1118_v24  ;;  %v477_v63 = vmul.f32 %v467_v59, %v1121_v25  ;;  %v478_v6 = vmul.f32 %v467_v59, %v1128_v30  ;;  %v479_v9 = vmul.f32 %v467_v59, %v1131_v31 }
  0x3e   : > { %v480_v1 = vmul.f32 %v467_v59, %v1134_v32  ;;  %v481_v2 = vmul.f32 %v467_v59, %v1141_v37  ;;  %v482_v14 = vmul.f32 %v467_v59, %v1198_v43  ;;  %v483_v15 = vmul.f32 %v467_v59, %v1219_v50 }
  0x3f   : > { %v500_v22 = vrot.slane %v468_v39, 2  ;;  %v501_v35 = vrot.slane %v469_v44, 2  ;;  %v503_v41 = vrot.slane %v470_v45, 2  ;;  %v504_v12 = vrot.slane %v471_v46, 2  ;;  %v1298_v45 = vld [vmem:[%s1068_s22 + $0x90] sm:$0xff] }
  0x40   : > { %v506_v13 = vrot.slane %v472_v47, 2  ;;  %v507_v19 = vrot.slane %v473_v48, 2  ;;  %v509_v26 = vrot.slane %v474_v49, 2  ;;  %v510_v27 = vrot.slane %v475_v0, 2 }
  0x41   : > { %v502_v4 = vsel %vm336_vm1, %v500_v22, %v501_v35  ;;  %v505_v5 = vsel %vm336_vm1, %v503_v41, %v504_v12  ;;  %v512_v33 = vrot.slane %v476_v62, 2  ;;  %v513_v38 = vrot.slane %v477_v63, 2  ;;  %v1311_v12 = vld [vmem:[%s1068_s22 + $0x98] sm:$0x3] }
  0x42   : > { %v508_v8 = vsel %vm336_vm1, %v506_v13, %v507_v19  ;;  %v511_v20 = vsel %vm336_vm1, %v509_v26, %v510_v27  ;;  %v515_v21 = vrot.slane %v478_v6, 2  ;;  %v516_v28 = vrot.slane %v479_v9, 2 }
  0x43   : > { %v514_v29 = vsel %vm336_vm1, %v512_v33, %v513_v38  ;;  %v518_v36 = vrot.slane %v480_v1, 2  ;;  %v519_v40 = vrot.slane %v481_v2, 2  ;;  %v521_v53 = vrot.slane %v482_v14, 2 }
  0x44   : > { %v517_v56 = vsel %vm336_vm1, %v515_v21, %v516_v28  ;;  %v522_v59 = vrot.slane %v483_v15, 2  ;;  %v532_v39 = vadd.f32 %v502_v4, %v459_v51  ;;  %v533_v44 = vadd.f32 %v505_v5, %v460_v52 }
  0x45   : > { %v520_v46 = vsel %vm336_vm1, %v518_v36, %v519_v40  ;;  %v534_v47 = vadd.f32 %v508_v8, %v461_v7  ;;  %v535_v48 = vadd.f32 %v511_v20, %v462_v54  ;;  %v536_v49 = vadd.f32 %v514_v29, %v463_v55 }
  0x46   : > { %v523_v0 = vsel %vm336_vm1, %v521_v53, %v522_v59  ;;  %v537_v62 = vadd.f32 %v517_v56, %v464_v57  ;;  %v538_v63 = vadd.f32 %v520_v46, %v465_v58  ;;  %v541_v6 = vmul.f32 %v540_v61, %v1092_v10 }
  0x47   : > { %v539_v9 = vadd.f32 %v523_v0, %v466_v60  ;;  %v542_v1 = vmul.f32 %v540_v61, %v1102_v16  ;;  %v543_v51 = vmul.f32 %v540_v61, %v1108_v18  ;;  %v544_v52 = vmul.f32 %v540_v61, %v1118_v24 }
  0x48   : > { %v545_v2 = vmul.f32 %v540_v61, %v1128_v30  ;;  %v546_v7 = vmul.f32 %v540_v61, %v1134_v32  ;;  %v547_v54 = vmul.f32 %v540_v61, %v1198_v43  ;;  %v548_v55 = vmul.f32 %v540_v61, %v1298_v45 }
  0x49   : > { %v549_v57 = vadd.f32 %v541_v6, %v532_v39  ;;  %v550_v58 = vadd.f32 %v542_v1, %v533_v44  ;;  %v551_v14 = vadd.f32 %v543_v51, %v534_v47  ;;  %v552_v15 = vadd.f32 %v544_v52, %v535_v48 }
  0x4a   : > { %v553_v60 = vadd.f32 %v545_v2, %v536_v49  ;;  %v554_v22 = vadd.f32 %v546_v7, %v537_v62  ;;  %v555_v35 = vadd.f32 %v547_v54, %v538_v63  ;;  %v556_v41 = vadd.f32 %v548_v55, %v539_v9 }
  0x4b   : > { %v558_v13 = vmul.f32 %v1269_v3, %v1092_v10  ;;  %v559_v19 = vmul.f32 %v1269_v3, %v1095_v11  ;;  %v560_v26 = vmul.f32 %v1269_v3, %v1102_v16  ;;  %v561_v61 = vmul.f32 %v1269_v3, %v1105_v17 }
  0x4c   : > { %v562_v27 = vmul.f32 %v1269_v3, %v1108_v18  ;;  %v563_v4 = vmul.f32 %v1269_v3, %v1115_v23  ;;  %v564_v5 = vmul.f32 %v1269_v3, %v1118_v24  ;;  %v565_v10 = vmul.f32 %v1269_v3, %v1121_v25 }
  0x4d   : > { %v566_v33 = vmul.f32 %v1269_v3, %v1128_v30  ;;  %v567_v38 = vmul.f32 %v1269_v3, %v1131_v31  ;;  %v568_v8 = vmul.f32 %v1269_v3, %v1134_v32  ;;  %v569_v20 = vmul.f32 %v1269_v3, %v1141_v37 }
  0x4e   : > { %v570_v21 = vmul.f32 %v1269_v3, %v1198_v43  ;;  %v571_v28 = vmul.f32 %v1269_v3, %v1219_v50  ;;  %v572_v29 = vmul.f32 %v1269_v3, %v1298_v45  ;;  %v573_v36 = vmul.f32 %v1269_v3, %v1311_v12 }
  0x4f   : > { %v590_v40 = vrot.slane %v558_v13, 1  ;;  %v591_v53 = vrot.slane %v559_v19, 1  ;;  %v593_v56 = vrot.slane %v560_v26, 1  ;;  %v594_v59 = vrot.slane %v561_v61, 1 }
  0x50   : > { %v596_v39 = vrot.slane %v562_v27, 1  ;;  %v597_v44 = vrot.slane %v563_v4, 1  ;;  %v599_v46 = vrot.slane %v564_v5, 1  ;;  %v600_v47 = vrot.slane %v565_v10, 1 }
  0x51   : > { %v592_v48 = vsel %vm262_vm0, %v590_v40, %v591_v53  ;;  %v595_v49 = vsel %vm262_vm0, %v593_v56, %v594_v59  ;;  %v602_v0 = vrot.slane %v566_v33, 1  ;;  %v603_v62 = vrot.slane %v567_v38, 1  ;;  %v980_v40 = vld [vmem:[%s1615_s2] ss:$0 sm:$0xff] }
  0x52   : > { %v598_v63 = vsel %vm262_vm0, %v596_v39, %v597_v44  ;;  %v601_v6 = vsel %vm262_vm0, %v599_v46, %v600_v47  ;;  %v605_v9 = vrot.slane %v568_v8, 1  ;;  %v606_v3 = vrot.slane %v569_v20, 1 }
  0x53   : > { %v604_v1 = vsel %vm262_vm0, %v602_v0, %v603_v62  ;;  %v608_v51 = vrot.slane %v570_v21, 1  ;;  %v609_v52 = vrot.slane %v571_v28, 1  ;;  %v611_v2 = vrot.slane %v572_v29, 1 }
  0x54   : > { %v607_v7 = vsel %vm262_vm0, %v605_v9, %v606_v3  ;;  %v612_v54 = vrot.slane %v573_v36, 1  ;;  %v622_v55 = vadd.f32 %v592_v48, %v549_v57  ;;  %v623_v13 = vadd.f32 %v595_v49, %v550_v58  ;;  %v981_v49 = vld [vmem:[%s1616_s3] ss:$0 sm:$0xff] }
  0x55   : > { %v610_v19 = vsel %vm262_vm0, %v608_v51, %v609_v52  ;;  %v624_v26 = vadd.f32 %v598_v63, %v551_v14  ;;  %v625_v61 = vadd.f32 %v601_v6, %v552_v15  ;;  %v626_v27 = vadd.f32 %v604_v1, %v553_v60 }
  0x56   : > { %v613_v4 = vsel %vm262_vm0, %v611_v2, %v612_v54  ;;  %v627_v5 = vadd.f32 %v607_v7, %v554_v22  ;;  %v628_v10 = vadd.f32 %v610_v19, %v555_v35  ;;  %v632_v33 = vmul.f32 %v1261_v34, %v1095_v11 }
  0x57   : > { %v629_v38 = vadd.f32 %v613_v4, %v556_v41  ;;  %v633_v8 = vmul.f32 %v1261_v34, %v1102_v16  ;;  %v634_v57 = vmul.f32 %v1261_v34, %v1105_v17  ;;  %v635_v58 = vmul.f32 %v1261_v34, %v1108_v18 }
  0x58   : > { %v636_v14 = vmul.f32 %v1261_v34, %v1115_v23  ;;  %v637_v15 = vmul.f32 %v1261_v34, %v1118_v24  ;;  %v638_v60 = vmul.f32 %v1261_v34, %v1121_v25  ;;  %v639_v11 = vmul.f32 %v1261_v34, %v1128_v30 }
  0x59   : > { %v640_v16 = vmul.f32 %v1261_v34, %v1131_v31  ;;  %v641_v17 = vmul.f32 %v1261_v34, %v1134_v32  ;;  %v642_v18 = vmul.f32 %v1261_v34, %v1141_v37  ;;  %v643_v23 = vmul.f32 %v1261_v34, %v1198_v43 }
  0x5a   : > { %v644_v24 = vmul.f32 %v1261_v34, %v1219_v50  ;;  %v645_v25 = vmul.f32 %v1261_v34, %v1298_v45  ;;  %v646_v30 = vmul.f32 %v1261_v34, %v1311_v12  ;;  %v663_v31 = vrot.slane %v1273_v42, 2 }
  0x5b   : > { %v664_v22 = vrot.slane %v632_v33, 2  ;;  %v666_v35 = vrot.slane %v633_v8, 2  ;;  %v667_v32 = vrot.slane %v634_v57, 2  ;;  %v669_v41 = vrot.slane %v635_v58, 2 }
  0x5c   : > { %v670_v20 = vrot.slane %v636_v14, 2  ;;  %v672_v37 = vrot.slane %v637_v15, 2  ;;  %v673_v21 = vrot.slane %v638_v60, 2  ;;  %v675_v28 = vrot.slane %v639_v11, 2 }
  0x5d   : > { %v665_v43 = vsel %vm336_vm1, %v663_v31, %v664_v22  ;;  %v668_v50 = vsel %vm336_vm1, %v666_v35, %v667_v32  ;;  %v676_v29 = vrot.slane %v640_v16, 2  ;;  %v678_v36 = vrot.slane %v641_v17, 2 }
  0x5e   : > { %v671_v45 = vsel %vm336_vm1, %v669_v41, %v670_v20  ;;  %v674_v34 = vsel %vm336_vm1, %v672_v37, %v673_v21  ;;  %v679_v12 = vrot.slane %v642_v18, 2  ;;  %v681_v42 = vrot.slane %v643_v23, 2 }
  0x5f   : > { %v677_v53 = vsel %vm336_vm1, %v675_v28, %v676_v29  ;;  %v682_v56 = vrot.slane %v644_v24, 2  ;;  %v684_v59 = vrot.slane %v645_v25, 2  ;;  %v685_v39 = vrot.slane %v646_v30, 2 }
  0x60   : > { %v680_v44 = vsel %vm336_vm1, %v678_v36, %v679_v12  ;;  %v695_v46 = vadd.f32 %v665_v43, %v622_v55  ;;  %v696_v47 = vadd.f32 %v668_v50, %v623_v13  ;;  %v697_v48 = vadd.f32 %v671_v45, %v624_v26 }
  0x61   : > { %v683_v0 = vsel %vm336_vm1, %v681_v42, %v682_v56  ;;  %v686_v62 = vsel %vm336_vm1, %v684_v59, %v685_v39  ;;  %v698_v63 = vadd.f32 %v674_v34, %v625_v61  ;;  %v699_v6 = vadd.f32 %v677_v53, %v626_v27 }
  0x62   : > { %v700_v9 = vadd.f32 %v680_v44, %v627_v5  ;;  %v701_v3 = vadd.f32 %v683_v0, %v628_v10  ;;  %v702_v1 = vadd.f32 %v686_v62, %v629_v38  ;;  %v707_v51 = vmul.f32 %v980_v40, %v695_v46 }
  0x63   : > { %v708_v52 = vmul.f32 %v980_v40, %v696_v47  ;;  %v709_v2 = vmul.f32 %v980_v40, %v697_v48  ;;  %v710_v7 = vmul.f32 %v980_v40, %v698_v63  ;;  %v711_v54 = vmul.f32 %v980_v40, %v699_v6 }
  0x64   : > { %v712_v55 = vmul.f32 %v980_v40, %v700_v9  ;;  %v713_v13 = vmul.f32 %v980_v40, %v701_v3  ;;  %v714_v19 = vmul.f32 %v980_v40, %v702_v1  ;;  %v1398_v26 = vadd.f32 %v981_v49, %v707_v51 }
  0x65   : > { %v1400_v4 = vadd.f32 %v981_v49, %v708_v52  ;;  %v1402_v33 = vadd.f32 %v981_v49, %v709_v2  ;;  %v1404_v8 = vadd.f32 %v981_v49, %v710_v7  ;;  %v1406_v61 = vadd.f32 %v981_v49, %v711_v54 }
  0x66   : > { %v1408_v27 = vadd.f32 %v981_v49, %v712_v55  ;;  %v959_v5 = vmul.f32 -1.442695, %v1398_v26  ;;  %v1411_v10 = vadd.f32 %v981_v49, %v713_v13  ;;  %v1416_v14 = vadd.f32 %v981_v49, %v714_v19 }
  0x67   : > { %v960_v38 = vmul.f32 -1.442695, %v1400_v4  ;;  %v961_v57 = vmul.f32 -1.442695, %v1402_v33  ;;  %v962_v58 = vmul.f32 -1.442695, %v1404_v8 }
  0x68   : > { %982 = vpow2.f32 %v959_v5  ;;  %v963_v15 = vmul.f32 -1.442695, %v1406_v61  ;;  %v964_v60 = vmul.f32 -1.442695, %v1408_v27  ;;  %v965_v11 = vmul.f32 -1.442695, %v1411_v10 }
  0x69   : > { %984 = vpow2.f32 %v960_v38  ;;  %v966_v16 = vmul.f32 -1.442695, %v1416_v14 }
  0x6a   : > { %986 = vpow2.f32 %v961_v57 }
  0x6b   : > { %988 = vpow2.f32 %v962_v58 }
  0x6c   : > { %990 = vpow2.f32 %v963_v15 }
  0x6d   : > { %992 = vpow2.f32 %v964_v60 }
  0x6e   : > { %v983_v17 = vpop.eup %982  ;;  %994 = vpow2.f32 %v965_v11 }
  0x6f   : > { %v985_v18 = vpop.eup %984  ;;  %v751_v23 = vadd.f32 1.0, %v983_v17  ;;  %996 = vpow2.f32 %v966_v16 }
  0x70   : > { %v987_v24 = vpop.eup %986  ;;  %v752_v25 = vadd.f32 1.0, %v985_v18 }
  0x71   : > { %v989_v30 = vpop.eup %988  ;;  %v1422_v31 = vadd.f32 1.0, %v987_v24  ;;  %998 = vrcp.f32 %v751_v23  ;;  %v770_v20 = vand.u32 2147483648, %v751_v23  ;;  %vm764_vm2 = vweird.f32 %v751_v23 }
  0x72   : > { %v991_v22 = vpop.eup %990  ;;  %v1424_v35 = vadd.f32 1.0, %v989_v30  ;;  %1000 = vrcp.f32 %v752_v25  ;;  %v768_v21 = vand.u32 2147483647, %v751_v23  ;;  %v785_v28 = vand.u32 2147483648, %v752_v25 }
  0x73   : > { %v993_v32 = vpop.eup %992  ;;  %v1426_v41 = vadd.f32 1.0, %v991_v22  ;;  %1002 = vrcp.f32 %v1422_v31  ;;  %vm779_vm3 = vweird.f32 %v752_v25  ;;  %v783_v29 = vand.u32 2147483647, %v752_v25 }
  0x74   : > { %v995_v37 = vpop.eup %994  ;;  %v1429_v50 = vadd.f32 1.0, %v993_v32  ;;  %1004 = vrcp.f32 %v1424_v35  ;;  %v1434_v45 = vor.u32 1.1754944e-38, %v770_v20  ;;  %v798_v34 = vand.u32 2147483647, %v1422_v31 }
  0x75   : > { %v997_v43 = vpop.eup %996  ;;  %v800_v12 = vand.u32 2147483648, %v1422_v31  ;;  %1006 = vrcp.f32 %v1426_v41  ;;  %v1441_v40 = vadd.f32 1.0, %v995_v37  ;;  %vm794_vm4 = vweird.f32 %v1422_v31 }
  0x76   : > { %v813_v56 = vand.u32 2147483647, %v1424_v35  ;;  %v1446_v59 = vadd.f32 1.0, %v997_v43  ;;  %v786_v44 = vor.u32 1.1754944e-38, %v785_v28  ;;  %vm809_vm5 = vweird.f32 %v1424_v35 }
  0x77   : > { %v1432_v36 = vpop.eup %998  ;;  %vm1453_vm7 = vcmp.eq.f32.partialorder %v768_v21, 8.507059e+37  ;;  %vm1457_vm8 = vcmp.eq.f32.partialorder %v783_v29, 8.507059e+37  ;;  %v815_v0 = vand.u32 2147483648, %v1424_v35  ;;  %1008 = vrcp.f32 %v1429_v50 }
  0x78   : > { %v1439_v42 = vpop.eup %1000  ;;  %v760_v53 = vmul.f32 %v1432_v36, %v751_v23  ;;  %vm765_vm6 = vweird.f32 %v1432_v36  ;;  %vm1465_vm9 = vcmp.eq.f32.partialorder %v798_v34, 8.507059e+37  ;;  %v801_v9 = vor.u32 1.1754944e-38, %v800_v12 }
  0x79   : > { %v775_v39 = vmul.f32 %v1439_v42, %v752_v25  ;;  %v1450_v46 = vpop.eup %1002  ;;  %vm824_vm10 = vweird.f32 %v1426_v41  ;;  %vm780_vm11 = vweird.f32 %v1439_v42  ;;  %vm1472_vm12 = vcmp.eq.f32.partialorder %v813_v56, 8.507059e+37  ;;  %vm1484_vm14 = vmor %vm764_vm2, %vm765_vm6 }
  0x7a   : > { %v761_v47 = vsub.f32 1.0, %v760_v53  ;;  %v790_v63 = vmul.f32 %v1450_v46, %v1422_v31  ;;  %v1005_v3 = vpop.eup %1004  ;;  %v828_v52 = vand.u32 2147483647, %v1426_v41  ;;  %vm795_vm13 = vweird.f32 %v1450_v46  ;;  %vm1492_vm15 = vmor %vm779_vm3, %vm780_vm11 }
  0x7b   : > { %v776_v62 = vsub.f32 1.0, %v775_v39  ;;  %v1007_v2 = vpop.eup %1006  ;;  %v805_v55 = vmul.f32 %v1005_v3, %v1424_v35  ;;  %v816_v5 = vor.u32 1.1754944e-38, %v815_v0  ;;  %v830_v57 = vand.u32 2147483648, %v1426_v41  ;;  %vm1499_vm1 = vmor %vm794_vm4, %vm795_vm13 }
  0x7c   : > { %v762_v1 = vmul.f32 %v1432_v36, %v761_v47  ;;  %v791_v54 = vsub.f32 1.0, %v790_v63  ;;  %v820_v38 = vmul.f32 %v1007_v2, %v1426_v41  ;;  %vm810_vm0 = vweird.f32 %v1005_v3 }
  0x7d   : > { %v777_v7 = vmul.f32 %v1439_v42, %v776_v62  ;;  %v806_v11 = vsub.f32 1.0, %v805_v55  ;;  %v1009_v16 = vpop.eup %1008  ;;  %vm825_vm2 = vweird.f32 %v1007_v2  ;;  %v843_v23 = vand.u32 2147483647, %v1429_v50  ;;  %vm1519_vm4 = vmor %vm809_vm5, %vm810_vm0 }
  0x7e   : > { %v763_v13 = vadd.f32 %v1432_v36, %v762_v1  ;;  %v792_v60 = vmul.f32 %v1450_v46, %v791_v54  ;;  %v821_v18 = vsub.f32 1.0, %v820_v38  ;;  %1010 = vrcp.f32 %v1441_v40  ;;  %vm1529_vm11 = vmor %vm824_vm10, %vm825_vm2 }
  0x7f   : > { %v778_v58 = vadd.f32 %v1439_v42, %v777_v7  ;;  %v807_v25 = vmul.f32 %v1005_v3, %v806_v11  ;;  %vm1506_vm3 = vcmp.eq.f32.partialorder %v828_v52, 8.507059e+37  ;;  %vm839_vm6 = vweird.f32 %v1429_v50 }
  0x80   : > { %v793_v24 = vadd.f32 %v1450_v46, %v792_v60  ;;  %v767_v31 = vsel %vm1484_vm14, %v1432_v36, %v763_v13  ;;  %v822_v20 = vmul.f32 %v1007_v2, %v821_v18  ;;  %v835_v37 = vmul.f32 %v1009_v16, %v1429_v50 }
  0x81   : > { %v782_v22 = vsel %vm1492_vm15, %v1439_v42, %v778_v58  ;;  %v808_v28 = vadd.f32 %v1005_v3, %v807_v25  ;;  %v831_v29 = vor.u32 1.1754944e-38, %v830_v57  ;;  %v845_v35 = vand.u32 2147483648, %v1429_v50 }
  0x82   : > { %v797_v21 = vsel %vm1499_vm1, %v1450_v46, %v793_v24  ;;  %v823_v36 = vadd.f32 %v1007_v2, %v822_v20  ;;  %v836_v34 = vsub.f32 1.0, %v835_v37  ;;  %vm840_vm5 = vweird.f32 %v1009_v16 }
  0x83   : > { %vm1534_vm13 = vcmp.eq.f32.partialorder %v843_v23, 8.507059e+37  ;;  %v772_v42 = vsel %vm1453_vm7, %v1434_v45, %v767_v31  ;;  %v787_v41 = vsel %vm1457_vm8, %v786_v44, %v782_v22  ;;  %v812_v53 = vsel %vm1519_vm4, %v1005_v3, %v808_v28  ;;  %vm1556_vm7 = vmor %vm839_vm6, %vm840_vm5 }
  0x84   : > { %1012 = vrcp.f32 %v1446_v59  ;;  %v1011_v56 = vpop.eup %1010  ;;  %v802_v39 = vsel %vm1465_vm9, %v801_v9, %v797_v21  ;;  %v827_v46 = vsel %vm1529_vm11, %v1007_v2, %v823_v36  ;;  %v837_v47 = vmul.f32 %v1009_v16, %v836_v34 }
  0x85   : > { %vm854_vm10 = vweird.f32 %v1441_v40  ;;  %v817_v45 = vsel %vm1472_vm12, %v816_v5, %v812_v53  ;;  %v846_v48 = vor.u32 1.1754944e-38, %v845_v35  ;;  %v850_v49 = vmul.f32 %v1011_v56, %v1441_v40 }
  0x86   : > { %v860_v0 = vand.u32 2147483648, %v1441_v40  ;;  %v832_v62 = vsel %vm1506_vm3, %v831_v29, %v827_v46  ;;  %v838_v63 = vadd.f32 %v1009_v16, %v837_v47  ;;  %v879_v50 = vmul.f32 %v772_v42, %v1398_v26 }
  0x87   : > { %v880_v6 = vmul.f32 %v787_v41, %v1400_v4  ;;  %v851_v9 = vsub.f32 1.0, %v850_v49  ;;  %vm855_vm8 = vweird.f32 %v1011_v56  ;;  %v858_v3 = vand.u32 2147483647, %v1441_v40 }
  0x88   : > { %v881_v1 = vmul.f32 %v802_v39, %v1402_v33  ;;  %v842_v51 = vsel %vm1556_vm7, %v1009_v16, %v838_v63  ;;  %v882_v52 = vmul.f32 %v817_v45, %v1404_v8  ;;  %vm887_vm9 = vcmask 130048   ;;  %vm1583_vm12 = vmor %vm854_vm10, %vm855_vm8 }
  0x89   : > { %v847_v26 = vsel %vm1534_vm13, %v846_v48, %v842_v51  ;;  %v852_v7 = vmul.f32 %v1011_v56, %v851_v9  ;;  %v883_v4 = vmul.f32 %v832_v62, %v1406_v61  ;;  %888 = vst.msk [vmem:[%s1565_s6] sm:$0xff] %vm887_vm9, %v879_v50  ;;  %v861_v54 = vor.u32 1.1754944e-38, %v860_v0 }
  0x8a   : > { %v1013_v2 = vpop.eup %1012  ;;  %v884_v55 = vmul.f32 %v847_v26, %v1408_v27  ;;  %889 = vst.msk [vmem:[%s1565_s6 + $0x8] sm:$0xff] %vm887_vm9, %v880_v6  ;;  %vm859_vm14 = vcmp.eq.f32.partialorder %v858_v3, 8.507059e+37  ;;  %v875_v61 = vand.u32 2147483648, %v1446_v59  ;;  %vm869_vm15 = vweird.f32 %v1446_v59 }
  0x8b   : > { %v865_v8 = vmul.f32 %v1013_v2, %v1446_v59  ;;  %v853_v13 = vadd.f32 %v1011_v56, %v852_v7  ;;  %890 = vst.msk [vmem:[%s1565_s6 + $0x10] sm:$0xff] %vm887_vm9, %v881_v1  ;;  %vm870_vm0 = vweird.f32 %v1013_v2  ;;  %v873_v19 = vand.u32 2147483647, %v1446_v59 }
  0x8c   : > { %891 = vst.msk [vmem:[%s1565_s6 + $0x18] sm:$0xff] %vm887_vm9, %v882_v52  ;;  %vm871_vm1 = vmor %vm869_vm15, %vm870_vm0  ;;  %v876_v57 = vor.u32 1.1754944e-38, %v875_v61 }
  0x8d   : > { %v866_v40 = vsub.f32 1.0, %v865_v8  ;;  %v857_v27 = vsel %vm1583_vm12, %v1011_v56, %v853_v13  ;;  %892 = vst.msk [vmem:[%s1565_s6 + $0x20] sm:$0xff] %vm887_vm9, %v883_v4  ;;  %vm874_vm2 = vcmp.eq.f32.partialorder %v873_v19, 8.507059e+37 }
  0x8e   : > { %v862_v5 = vsel %vm859_vm14, %v861_v54, %v857_v27  ;;  %893 = vst.msk [vmem:[%s1565_s6 + $0x28] sm:$0xff] %vm887_vm9, %v884_v55 }
  0x8f   : > { %v867_v38 = vmul.f32 %v1013_v2, %v866_v40  ;;  %v885_v58 = vmul.f32 %v862_v5, %v1411_v10 }
  0x91   : > { %v868_v15 = vadd.f32 %v1013_v2, %v867_v38  ;;  %894 = vst.msk [vmem:[%s1565_s6 + $0x30] sm:$0xff] %vm887_vm9, %v885_v58 }
  0x93   : > { %v872_v59 = vsel %vm871_vm1, %v1013_v2, %v868_v15 }
  0x94   : > { %v877_v60 = vsel %vm874_vm2, %v876_v57, %v872_v59 }
  0x95   : > { %v886_v11 = vmul.f32 %v877_v60, %v1416_v14 }
  0x97   : > { %895 = vst.msk [vmem:[%s1565_s6 + $0x38] sm:$0xff] %vm887_vm9, %v886_v11 }
  0x98 PF: > { %s14_s15 = sadd.s32 1, %s1020_s15  }
  0x99   : > { %p11_p4 = scmp.ge.s32.totalorder %s14_s15, 4  }
  0x9b   :  { %13 = sbr.rel (!%p11_p4) target bundleno = 1 (0x1), region = 66 }

// kernel: _lambda_.18
= control target key start
LH: loop header
LB: loop body
LE: loop exit
PB: predicated region body
PF: predicated region fallthrough
CT: control target
= control target key end

     0   :  { %vm45_vm0 = vcmask 130048   ;;  %vm479_vm4 = vcmask 523264   ;;  %s1009_s1 = inlined_call_operand.vmem [shape: f32[16,64], index: 1, kind: input, shape index: {}]   ;;  %s1010_s0 = inlined_call_operand.vmem [shape: f32[128,16], index: 0, kind: input, shape index: {}]   ;;  %s1011_s2 = inlined_call_operand.vmem [shape: f32[1,64], index: 2, kind: input, shape index: {}]   ;;  %s1012_s3 = inlined_call_operand.vmem [shape: f32[1,64], index: 3, kind: input, shape index: {}]   ;;  %s1013_s4 = inlined_call_operand.vmem [shape: f32[128,64], index: 4, kind: output, shape index: {}]  }
   0x1   :  { %v42_v0 = vld [vmem:[%s1009_s1] sm:$0xff]  ;;  %v43_v1 = vld [vmem:[%s1009_s1 + $0x8] sm:$0xff]  ;;  %v20_v15 = vld [vmem:[%s1010_s0 + $0x10] sm:$0xff] }
   0x2   :  { %v18_v2 = vld [vmem:[%s1010_s0] sm:$0xff]  ;;  %v44_v3 = vpack.c.bf16 %v43_v1, %v42_v0  ;;  %v19_v4 = vld [vmem:[%s1010_s0 + $0x8] sm:$0xff]  ;;  %v21_v16 = vld [vmem:[%s1010_s0 + $0x18] sm:$0xff] }
   0x3   :  { %v22_v5 = vld [vmem:[%s1010_s0 + $0x20] sm:$0xff]  ;;  %v23_v6 = vld [vmem:[%s1010_s0 + $0x28] sm:$0xff]  ;;  %v34_v7 = vpack.c.bf16 %v19_v4, %v18_v2  ;;  %v24_v17 = vld [vmem:[%s1010_s0 + $0x30] sm:$0xff]  ;;  %v35_v23 = vpack.c.bf16 %v21_v16, %v20_v15 }
   0x4   :  { %v36_v8 = vpack.c.bf16 %v23_v6, %v22_v5  ;;  %v26_v9 = vld [vmem:[%s1010_s0 + $0x40] sm:$0xff]  ;;  %v27_v10 = vld [vmem:[%s1010_s0 + $0x48] sm:$0xff]  ;;  %77 = vmatpush.bf16.msra.mxu0 %v44_v3  ;;  %524 = vmatpush.bf16.msra.mxu1 %v44_v3  ;;  %v25_v18 = vld [vmem:[%s1010_s0 + $0x38] sm:$0xff] }
   0x5   :  { %v30_v11 = vld [vmem:[%s1010_s0 + $0x60] sm:$0xff]  ;;  %v38_v12 = vpack.c.bf16 %v27_v10, %v26_v9  ;;  %v31_v13 = vld [vmem:[%s1010_s0 + $0x68] sm:$0xff]  ;;  %525 = vmatpush.bf16.msra.mxu2 %v44_v3  ;;  %526 = vmatpush.bf16.msra.mxu3 %v44_v3  ;;  %v28_v19 = vld [vmem:[%s1010_s0 + $0x50] sm:$0xff]  ;;  %v37_v24 = vpack.c.bf16 %v25_v18, %v24_v17 }
   0x6   :  { %v40_v14 = vpack.c.bf16 %v31_v13, %v30_v11  ;;  %v29_v20 = vld [vmem:[%s1010_s0 + $0x58] sm:$0xff]  ;;  %v32_v21 = vld [vmem:[%s1010_s0 + $0x70] sm:$0xff]  ;;  %v683_v27 = vld [vmem:[%s1011_s2] ss:$0 sm:$0xff] }
   0x7   :  { %500 = vmatmul.msk.bf16.vlgmr.msra.gmra.mxu0 %vm45_vm0, %v34_v7  ;;  %502 = vmatmul.msk.bf16.vlgmr.msra.gmra.mxu1 %vm45_vm0, %v36_v8  ;;  %v33_v22 = vld [vmem:[%s1010_s0 + $0x78] sm:$0xff]  ;;  %v39_v25 = vpack.c.bf16 %v29_v20, %v28_v19  ;;  %v688_v28 = vld [vmem:[%s1012_s3] ss:$0 sm:$0xff] }
   0x8   :  { %504 = vmatmul.msk.bf16.vlgmr.msra.gmra.mxu2 %vm45_vm0, %v38_v12  ;;  %506 = vmatmul.msk.bf16.vlgmr.msra.gmra.mxu3 %vm45_vm0, %v40_v14  ;;  %v41_v26 = vpack.c.bf16 %v33_v22, %v32_v21 }
  0x17   :  { %501 = vmatmul.msk.bf16.gmra.mxu0 %vm45_vm0, %v35_v23  ;;  %503 = vmatmul.msk.bf16.gmra.mxu1 %vm45_vm0, %v37_v24 }
  0x18   :  { %505 = vmatmul.msk.bf16.gmra.mxu2 %vm45_vm0, %v39_v25  ;;  %507 = vmatmul.msk.bf16.gmra.mxu3 %vm45_vm0, %v41_v26 }
  0x84   :  { %v79_v29 = vpop.f32.mrf.mxu0  ;;  %v89_v30 = vpop.f32.mrf.mxu1 }
  0x85   :  { %v123_v31 = vmul.f32 %v683_v27, %v79_v29  ;;  %v127_v32 = vmul.f32 %v683_v27, %v89_v30 }
  0x87   :  { %v693_v33 = vadd.f32 %v688_v28, %v123_v31  ;;  %v696_v34 = vadd.f32 %v688_v28, %v127_v32 }
  0x89   :  { %v508_v35 = vmul.f32 -1.442695, %v693_v33  ;;  %v512_v36 = vmul.f32 -1.442695, %v696_v34 }
  0x8b   :  { %529 = vpow2.f32 %v508_v35  ;;  %v99_v37 = vpop.f32.mrf.mxu2  ;;  %v109_v38 = vpop.f32.mrf.mxu3 }
  0x8c   :  { %531 = vpow2.f32 %v512_v36  ;;  %v131_v39 = vmul.f32 %v683_v27, %v99_v37  ;;  %v135_v40 = vmul.f32 %v683_v27, %v109_v38  ;;  %v81_v41 = vpop.f32.mrf.mxu0  ;;  %v91_v42 = vpop.f32.mrf.mxu1 }
  0x8d   :  { %v124_v43 = vmul.f32 %v683_v27, %v81_v41  ;;  %v128_v44 = vmul.f32 %v683_v27, %v91_v42 }
  0x8e   :  { %v705_v45 = vadd.f32 %v688_v28, %v131_v39  ;;  %v708_v46 = vadd.f32 %v688_v28, %v135_v40 }
  0x8f   :  { %v711_v47 = vadd.f32 %v688_v28, %v124_v43  ;;  %v714_v48 = vadd.f32 %v688_v28, %v128_v44 }
  0x90   :  { %v516_v49 = vmul.f32 -1.442695, %v705_v45  ;;  %v520_v50 = vmul.f32 -1.442695, %v708_v46 }
  0x91   :  { %v530_v51 = vpop.eup %529  ;;  %v509_v54 = vmul.f32 -1.442695, %v711_v47  ;;  %v513_v56 = vmul.f32 -1.442695, %v714_v48 }
  0x92   :  { %v532_v52 = vpop.eup %531  ;;  %v207_v53 = vadd.f32 1.0, %v530_v51  ;;  %533 = vpow2.f32 %v516_v49 }
  0x93   :  { %v719_v55 = vadd.f32 1.0, %v532_v52  ;;  %535 = vpow2.f32 %v520_v50  ;;  %v101_v57 = vpop.f32.mrf.mxu2  ;;  %v111_v59 = vpop.f32.mrf.mxu3 }
  0x94   :  { %537 = vrcp.f32 %v207_v53  ;;  %v132_v58 = vmul.f32 %v683_v27, %v101_v57  ;;  %v232_v60 = vand.u32 2147483647, %v207_v53  ;;  %v234_v61 = vand.u32 2147483648, %v207_v53  ;;  %v84_v62 = vpop.f32.mrf.mxu0  ;;  %v94_v6 = vpop.f32.mrf.mxu1 }
  0x95   :  { %539 = vrcp.f32 %v719_v55  ;;  %v292_v0 = vand.u32 2147483647, %v719_v55  ;;  %v294_v3 = vand.u32 2147483648, %v719_v55  ;;  %v136_v5 = vmul.f32 %v683_v27, %v111_v59 }
  0x96   :  { %541 = vpow2.f32 %v509_v54  ;;  %v726_v1 = vadd.f32 %v688_v28, %v132_v58  ;;  %vm228_vm1 = vweird.f32 %v207_v53  ;;  %vm288_vm2 = vweird.f32 %v719_v55 }
  0x97   :  { %543 = vpow2.f32 %v513_v56  ;;  %v125_v9 = vmul.f32 %v683_v27, %v84_v62  ;;  %vm736_vm3 = vcmp.eq.f32.partialorder %v232_v60, 8.507059e+37  ;;  %v235_v13 = vor.u32 1.1754944e-38, %v234_v61 }
  0x98   :  { %v534_v63 = vpop.eup %533  ;;  %vm742_vm5 = vcmp.eq.f32.partialorder %v292_v0, 8.507059e+37  ;;  %v517_v17 = vmul.f32 -1.442695, %v726_v1  ;;  %v129_v18 = vmul.f32 %v683_v27, %v94_v6  ;;  %v295_v21 = vor.u32 1.1754944e-38, %v294_v3 }
  0x99   :  { %v536_v2 = vpop.eup %535  ;;  %v729_v4 = vadd.f32 1.0, %v534_v63  ;;  %v750_v22 = vadd.f32 %v688_v28, %v136_v5  ;;  %v755_v26 = vadd.f32 %v688_v28, %v125_v9 }
  0x9a   :  { %v538_v7 = vpop.eup %537  ;;  %v733_v8 = vadd.f32 1.0, %v536_v2  ;;  %v762_v35 = vadd.f32 %v688_v28, %v129_v18 }
  0x9b   :  { %v540_v10 = vpop.eup %539  ;;  %v224_v11 = vmul.f32 %v538_v7, %v207_v53  ;;  %545 = vrcp.f32 %v729_v4  ;;  %v352_v24 = vand.u32 2147483647, %v729_v4  ;;  %v354_v25 = vand.u32 2147483648, %v729_v4 }
  0x9c   :  { %v542_v14 = vpop.eup %541  ;;  %v284_v15 = vmul.f32 %v540_v10, %v719_v55  ;;  %547 = vrcp.f32 %v733_v8  ;;  %vm229_vm6 = vweird.f32 %v538_v7  ;;  %vm289_vm7 = vweird.f32 %v540_v10 }
  0x9d   :  { %v544_v19 = vpop.eup %543  ;;  %v225_v20 = vsub.f32 1.0, %v224_v11  ;;  %v757_v30 = vadd.f32 1.0, %v542_v14  ;;  %549 = vpow2.f32 %v517_v17  ;;  %vm348_vm8 = vweird.f32 %v729_v4  ;;  %vm230_vm9 = vmor %vm228_vm1, %vm229_vm6 }
  0x9e   :  { %v285_v23 = vsub.f32 1.0, %v284_v15  ;;  %v759_v31 = vadd.f32 1.0, %v544_v19  ;;  %v412_v38 = vand.u32 2147483647, %v733_v8  ;;  %vm769_vm10 = vcmp.eq.f32.partialorder %v352_v24, 8.507059e+37  ;;  %vm290_vm12 = vmor %vm288_vm2, %vm289_vm7 }
  0x9f   :  { %v226_v29 = vmul.f32 %v538_v7, %v225_v20  ;;  %551 = vrcp.f32 %v757_v30  ;;  %v355_v42 = vor.u32 1.1754944e-38, %v354_v25  ;;  %vm408_vm11 = vweird.f32 %v733_v8  ;;  %v104_v20 = vpop.f32.mrf.mxu2 }
  0xa0   :  { %v286_v32 = vmul.f32 %v540_v10, %v285_v23  ;;  %v414_v49 = vand.u32 2147483648, %v733_v8  ;;  %553 = vrcp.f32 %v759_v31  ;;  %v521_v50 = vmul.f32 -1.442695, %v750_v22 }
  0xa1   :  { %v546_v36 = vpop.eup %545  ;;  %v227_v37 = vadd.f32 %v538_v7, %v226_v29  ;;  %vm786_vm13 = vcmp.eq.f32.partialorder %v412_v38, 8.507059e+37  ;;  %v247_v58 = vand.u32 2147483647, %v757_v30  ;;  %vm243_vm15 = vweird.f32 %v757_v30  ;;  %v114_v29 = vpop.f32.mrf.mxu3 }
  0xa2   :  { %v287_v39 = vadd.f32 %v540_v10, %v286_v32  ;;  %v344_v40 = vmul.f32 %v546_v36, %v729_v4  ;;  %v548_v43 = vpop.eup %547  ;;  %vm349_vm14 = vweird.f32 %v546_v36  ;;  %555 = vpow2.f32 %v521_v50  ;;  %v86_v32 = vpop.f32.mrf.mxu0 }
  0xa3   :  { %v231_v44 = vsel %vm230_vm9, %v538_v7, %v227_v37  ;;  %v404_v54 = vmul.f32 %v548_v43, %v733_v8  ;;  %v550_v59 = vpop.eup %549  ;;  %vm409_vm0 = vweird.f32 %v548_v43  ;;  %vm350_vm1 = vmor %vm348_vm8, %vm349_vm14  ;;  %vm806_vm2 = vcmp.eq.f32.partialorder %v247_v58, 8.507059e+37 }
  0xa4   :  { %v236_v51 = vsel %vm736_vm3, %v235_v13, %v231_v44  ;;  %v291_v52 = vsel %vm290_vm12, %v540_v10, %v287_v39  ;;  %v345_v53 = vsub.f32 1.0, %v344_v40  ;;  %v797_v0 = vadd.f32 1.0, %v550_v59  ;;  %vm410_vm3 = vmor %vm408_vm11, %vm409_vm0 }
  0xa5   :  { %v463_v56 = vmul.f32 %v236_v51, %v693_v33  ;;  %v296_v57 = vsel %vm742_vm5, %v295_v21, %v291_v52  ;;  %v405_v62 = vsub.f32 1.0, %v404_v54  ;;  %v552_v63 = vpop.eup %551  ;;  %v415_v33 = vor.u32 1.1754944e-38, %v414_v49  ;;  %v96_v54 = vpop.f32.mrf.mxu1 }
  0xa6   :  { %v467_v60 = vmul.f32 %v296_v57, %v696_v34  ;;  %v346_v61 = vmul.f32 %v546_v36, %v345_v53  ;;  %v239_v3 = vmul.f32 %v552_v63, %v757_v30  ;;  %v554_v5 = vpop.eup %553  ;;  %v249_v7 = vand.u32 2147483648, %v757_v30 }
  0xa7   :  { %480 = vst.msk [vmem:[%s1013_s4] sm:$0xff] %vm479_vm4, %v463_v56  ;;  %v406_v2 = vmul.f32 %v548_v43, %v405_v62  ;;  %557 = vrcp.f32 %v797_v0  ;;  %v510_v9 = vmul.f32 -1.442695, %v755_v26  ;;  %v299_v13 = vmul.f32 %v554_v5, %v759_v31 }
  0xa8   :  { %484 = vst.msk [vmem:[%s1013_s4 + $0x20] sm:$0xff] %vm479_vm4, %v467_v60  ;;  %v347_v34 = vadd.f32 %v546_v36, %v346_v61  ;;  %v240_v12 = vsub.f32 1.0, %v239_v3  ;;  %vm244_vm5 = vweird.f32 %v552_v63  ;;  %v307_v4 = vand.u32 2147483647, %v759_v31  ;;  %v556_v21 = vpop.eup %555 }
  0xa9   :  { %v407_v11 = vadd.f32 %v548_v43, %v406_v2  ;;  %v309_v15 = vand.u32 2147483648, %v759_v31  ;;  %v300_v19 = vsub.f32 1.0, %v299_v13  ;;  %vm303_vm6 = vweird.f32 %v759_v31  ;;  %vm245_vm8 = vmor %vm243_vm15, %vm244_vm5  ;;  %v106_v13 = vpop.f32.mrf.mxu2 }
  0xaa   :  { %v351_v10 = vsel %vm350_vm1, %v546_v36, %v347_v34  ;;  %v241_v18 = vmul.f32 %v552_v63, %v240_v12  ;;  %vm304_vm7 = vweird.f32 %v554_v5  ;;  %559 = vpow2.f32 %v510_v9  ;;  %v116_v9 = vpop.f32.mrf.mxu3 }
  0xab   :  { %v356_v14 = vsel %vm769_vm10, %v355_v42, %v351_v10  ;;  %v411_v17 = vsel %vm410_vm3, %v548_v43, %v407_v11  ;;  %v301_v24 = vmul.f32 %v554_v5, %v300_v19  ;;  %v829_v25 = vadd.f32 1.0, %v556_v21  ;;  %vm305_vm10 = vmor %vm303_vm6, %vm304_vm7 }
  0xac   :  { %v471_v16 = vmul.f32 %v356_v14, %v705_v45  ;;  %v416_v23 = vsel %vm786_vm13, %v415_v33, %v411_v17  ;;  %v242_v45 = vadd.f32 %v552_v63, %v241_v18  ;;  %v250_v37 = vor.u32 1.1754944e-38, %v249_v7 }
  0xad   :  { %v475_v8 = vmul.f32 %v416_v23, %v708_v46  ;;  %v558_v36 = vpop.eup %557  ;;  %vm834_vm9 = vcmp.eq.f32.partialorder %v307_v4, 8.507059e+37  ;;  %v514_v39 = vmul.f32 -1.442695, %v762_v35  ;;  %v133_v46 = vmul.f32 %v683_v27, %v104_v20 }
  0xae   :  { %488 = vst.msk [vmem:[%s1013_s4 + $0x40] sm:$0xff] %vm479_vm4, %v471_v16  ;;  %v246_v40 = vsel %vm245_vm8, %v552_v63, %v242_v45  ;;  %v302_v41 = vadd.f32 %v554_v5, %v301_v24  ;;  %v310_v42 = vor.u32 1.1754944e-38, %v309_v15  ;;  %v359_v30 = vmul.f32 %v558_v36, %v797_v0 }
  0xaf   :  { %492 = vst.msk [vmem:[%s1013_s4 + $0x60] sm:$0xff] %vm479_vm4, %v475_v8  ;;  %v251_v43 = vsel %vm806_vm2, %v250_v37, %v246_v40  ;;  %561 = vrcp.f32 %v829_v25  ;;  %v137_v44 = vmul.f32 %v683_v27, %v114_v29  ;;  %v126_v49 = vmul.f32 %v683_v27, %v86_v32 }
  0xb0   :  { %v464_v50 = vmul.f32 %v251_v43, %v711_v47  ;;  %v306_v51 = vsel %vm305_vm10, %v554_v5, %v302_v41  ;;  %v360_v52 = vsub.f32 1.0, %v359_v30  ;;  %v367_v53 = vand.u32 2147483647, %v797_v0  ;;  %v560_v56 = vpop.eup %559 }
  0xb1   :  { %v311_v57 = vsel %vm834_vm9, %v310_v42, %v306_v51  ;;  %v369_v31 = vand.u32 2147483648, %v797_v0  ;;  %563 = vpow2.f32 %v514_v39  ;;  %v859_v55 = vadd.f32 %v688_v28, %v133_v46 }
  0xb2   :  { %481 = vst.msk [vmem:[%s1013_s4 + $0x8] sm:$0xff] %vm479_vm4, %v464_v50  ;;  %v468_v47 = vmul.f32 %v311_v57, %v714_v48  ;;  %v361_v58 = vmul.f32 %v558_v36, %v360_v52  ;;  %vm364_vm11 = vweird.f32 %v558_v36  ;;  %v866_v59 = vadd.f32 1.0, %v560_v56 }
  0xb3   :  { %v518_v60 = vmul.f32 -1.442695, %v859_v55  ;;  %v870_v61 = vadd.f32 %v688_v28, %v137_v44  ;;  %v873_v62 = vadd.f32 %v688_v28, %v126_v49  ;;  %v130_v63 = vmul.f32 %v683_v27, %v96_v54 }
  0xb4   :  { %485 = vst.msk [vmem:[%s1013_s4 + $0x28] sm:$0xff] %vm479_vm4, %v468_v47  ;;  %v362_v48 = vadd.f32 %v558_v36, %v361_v58  ;;  %vm363_vm12 = vweird.f32 %v797_v0  ;;  %565 = vrcp.f32 %v866_v59  ;;  %v370_v34 = vor.u32 1.1754944e-38, %v369_v31 }
  0xb5   :  { %v562_v33 = vpop.eup %561  ;;  %vm365_vm13 = vmor %vm363_vm12, %vm364_vm11  ;;  %567 = vpow2.f32 %v518_v60  ;;  %v522_v2 = vmul.f32 -1.442695, %v870_v61  ;;  %v511_v3 = vmul.f32 -1.442695, %v873_v62  ;;  %vm368_vm14 = vcmp.eq.f32.partialorder %v367_v53, 8.507059e+37 }
  0xb6   :  { %v366_v5 = vsel %vm365_vm13, %v558_v36, %v362_v48  ;;  %v419_v6 = vmul.f32 %v562_v33, %v829_v25  ;;  %v427_v7 = vand.u32 2147483647, %v829_v25  ;;  %v429_v0 = vand.u32 2147483648, %v829_v25 }
  0xb7   :  { %v564_v10 = vpop.eup %563  ;;  %v371_v11 = vsel %vm368_vm14, %v370_v34, %v366_v5  ;;  %569 = vpow2.f32 %v522_v2  ;;  %v888_v12 = vadd.f32 %v688_v28, %v130_v63  ;;  %v138_v17 = vmul.f32 %v683_v27, %v116_v9 }
  0xb8   :  { %v472_v14 = vmul.f32 %v371_v11, %v726_v1  ;;  %v420_v4 = vsub.f32 1.0, %v419_v6  ;;  %v891_v15 = vadd.f32 1.0, %v564_v10  ;;  %571 = vpow2.f32 %v511_v3 }
  0xb9   :  { %v515_v16 = vmul.f32 -1.442695, %v888_v12  ;;  %vm424_vm15 = vweird.f32 %v562_v33  ;;  %v134_v1 = vmul.f32 %v683_v27, %v106_v13  ;;  %vm423_vm0 = vweird.f32 %v829_v25 }
  0xba   :  { %v566_v18 = vpop.eup %565  ;;  %489 = vst.msk [vmem:[%s1013_s4 + $0x48] sm:$0xff] %vm479_vm4, %v472_v14  ;;  %v421_v19 = vmul.f32 %v562_v33, %v420_v4  ;;  %573 = vrcp.f32 %v891_v15  ;;  %vm902_vm1 = vcmp.eq.f32.partialorder %v427_v7, 8.507059e+37  ;;  %v430_v45 = vor.u32 1.1754944e-38, %v429_v0  ;;  %vm425_vm3 = vmor %vm423_vm0, %vm424_vm15 }
  0xbb   :  { %v568_v20 = vpop.eup %567  ;;  %v254_v23 = vmul.f32 %v566_v18, %v866_v59  ;;  %vm258_vm2 = vweird.f32 %v866_v59  ;;  %v262_v27 = vand.u32 2147483647, %v866_v59  ;;  %575 = vpow2.f32 %v515_v16 }
  0xbc   :  { %v422_v8 = vadd.f32 %v562_v33, %v421_v19  ;;  %v908_v24 = vadd.f32 1.0, %v568_v20  ;;  %v912_v25 = vadd.f32 %v688_v28, %v138_v17  ;;  %v264_v38 = vand.u32 2147483648, %v866_v59 }
  0xbd   :  { %v570_v29 = vpop.eup %569  ;;  %v255_v32 = vsub.f32 1.0, %v254_v23  ;;  %v917_v39 = vadd.f32 %v688_v28, %v134_v1  ;;  %vm259_vm5 = vweird.f32 %v566_v18  ;;  %vm263_vm6 = vcmp.eq.f32.partialorder %v262_v27, 8.507059e+37 }
  0xbe   :  { %v572_v36 = vpop.eup %571  ;;  %v426_v37 = vsel %vm425_vm3, %v562_v33, %v422_v8  ;;  %577 = vrcp.f32 %v908_v24  ;;  %v921_v41 = vadd.f32 1.0, %v570_v29  ;;  %vm260_vm7 = vmor %vm258_vm2, %vm259_vm5  ;;  %v265_v28 = vor.u32 1.1754944e-38, %v264_v38 }
  0xbf   :  { %v431_v46 = vsel %vm902_vm1, %v430_v45, %v426_v37  ;;  %v256_v40 = vmul.f32 %v566_v18, %v255_v32  ;;  %v924_v43 = vadd.f32 1.0, %v572_v36  ;;  %v322_v50 = vand.u32 2147483647, %v891_v15 }
  0xc0   :  { %v574_v42 = vpop.eup %573  ;;  %v476_v30 = vmul.f32 %v431_v46, %v750_v22  ;;  %579 = vrcp.f32 %v921_v41  ;;  %v519_v22 = vmul.f32 -1.442695, %v917_v39  ;;  %v324_v54 = vand.u32 2147483648, %v891_v15 }
  0xc1   :  { %v257_v44 = vadd.f32 %v566_v18, %v256_v40  ;;  %v314_v49 = vmul.f32 %v574_v42, %v891_v15  ;;  %v576_v51 = vpop.eup %575  ;;  %581 = vrcp.f32 %v924_v43  ;;  %vm318_vm8 = vweird.f32 %v891_v15 }
  0xc2   :  { %493 = vst.msk [vmem:[%s1013_s4 + $0x68] sm:$0xff] %vm479_vm4, %v476_v30  ;;  %v382_v31 = vand.u32 2147483647, %v908_v24  ;;  %vm319_vm9 = vweird.f32 %v574_v42  ;;  %v384_v60 = vand.u32 2147483648, %v908_v24  ;;  %v943_v63 = vadd.f32 1.0, %v576_v51 }
  0xc3   :  { %v261_v52 = vsel %vm260_vm7, %v566_v18, %v257_v44  ;;  %v315_v53 = vsub.f32 1.0, %v314_v49  ;;  %583 = vpow2.f32 %v519_v22  ;;  %vm323_vm10 = vcmp.eq.f32.partialorder %v322_v50, 8.507059e+37  ;;  %vm320_vm11 = vmor %vm318_vm8, %vm319_vm9 }
  0xc4   :  { %v578_v56 = vpop.eup %577  ;;  %v266_v57 = vsel %vm263_vm6, %v265_v28, %v261_v52  ;;  %v325_v33 = vor.u32 1.1754944e-38, %v324_v54  ;;  %vm378_vm12 = vweird.f32 %v908_v24  ;;  %vm952_vm13 = vcmp.eq.f32.partialorder %v382_v31, 8.507059e+37 }
  0xc5   :  { %v465_v47 = vmul.f32 %v266_v57, %v755_v26  ;;  %v316_v58 = vmul.f32 %v574_v42, %v315_v53  ;;  %v374_v59 = vmul.f32 %v578_v56, %v908_v24  ;;  %585 = vrcp.f32 %v943_v63 }
  0xc6   :  { %v580_v2 = vpop.eup %579  ;;  %v523_v3 = vmul.f32 -1.442695, %v912_v25  ;;  %vm379_vm14 = vweird.f32 %v578_v56  ;;  %v385_v11 = vor.u32 1.1754944e-38, %v384_v60  ;;  %v442_v0 = vand.u32 2147483647, %v921_v41 }
  0xc7   :  { %482 = vst.msk [vmem:[%s1013_s4 + $0x10] sm:$0xff] %vm479_vm4, %v465_v47  ;;  %v317_v48 = vadd.f32 %v574_v42, %v316_v58  ;;  %v375_v34 = vsub.f32 1.0, %v374_v59  ;;  %v582_v5 = vpop.eup %581  ;;  %v434_v9 = vmul.f32 %v580_v2, %v921_v41  ;;  %v444_v16 = vand.u32 2147483648, %v921_v41  ;;  %vm380_vm15 = vmor %vm378_vm12, %vm379_vm14 }
  0xc8   :  { %v269_v13 = vmul.f32 %v582_v5, %v924_v43  ;;  %v277_v19 = vand.u32 2147483647, %v924_v43  ;;  %v279_v1 = vand.u32 2147483648, %v924_v43  ;;  %587 = vpow2.f32 %v523_v3 }
  0xc9   :  { %v321_v6 = vsel %vm320_vm11, %v574_v42, %v317_v48  ;;  %v376_v7 = vmul.f32 %v578_v56, %v375_v34  ;;  %v435_v15 = vsub.f32 1.0, %v434_v9  ;;  %v584_v17 = vpop.eup %583  ;;  %vm439_vm0 = vweird.f32 %v580_v2 }
  0xca   :  { %v326_v10 = vsel %vm323_vm10, %v325_v33, %v321_v6  ;;  %v270_v18 = vsub.f32 1.0, %v269_v13  ;;  %v218_v21 = vadd.f32 1.0, %v584_v17  ;;  %vm438_vm1 = vweird.f32 %v921_v41 }
  0xcb   :  { %v469_v14 = vmul.f32 %v326_v10, %v762_v35  ;;  %v377_v4 = vadd.f32 %v578_v56, %v376_v7  ;;  %v436_v20 = vmul.f32 %v580_v2, %v435_v15  ;;  %v586_v23 = vpop.eup %585  ;;  %vm274_vm2 = vweird.f32 %v582_v5  ;;  %vm440_vm5 = vmor %vm438_vm1, %vm439_vm0 }
  0xcc   :  { %v271_v45 = vmul.f32 %v582_v5, %v270_v18  ;;  %vm273_vm3 = vweird.f32 %v924_v43  ;;  %v329_v32 = vmul.f32 %v586_v23, %v943_v63  ;;  %vm443_vm6 = vcmp.eq.f32.partialorder %v442_v0, 8.507059e+37 }
  0xcd   :  { %486 = vst.msk [vmem:[%s1013_s4 + $0x30] sm:$0xff] %vm479_vm4, %v469_v14  ;;  %v381_v35 = vsel %vm380_vm15, %v578_v56, %v377_v4  ;;  %v437_v29 = vadd.f32 %v580_v2, %v436_v20  ;;  %v445_v27 = vor.u32 1.1754944e-38, %v444_v16  ;;  %589 = vrcp.f32 %v218_v21  ;;  %vm275_vm7 = vmor %vm273_vm3, %vm274_vm2 }
  0xce   :  { %v386_v8 = vsel %vm952_vm13, %v385_v11, %v381_v35  ;;  %v272_v36 = vadd.f32 %v582_v5, %v271_v45  ;;  %vm278_vm8 = vcmp.eq.f32.partialorder %v277_v19, 8.507059e+37  ;;  %v280_v38 = vor.u32 1.1754944e-38, %v279_v1  ;;  %v588_v46 = vpop.eup %587 }
  0xcf   :  { %v473_v24 = vmul.f32 %v386_v8, %v859_v55  ;;  %v441_v37 = vsel %vm440_vm5, %v580_v2, %v437_v29  ;;  %v330_v55 = vsub.f32 1.0, %v329_v32  ;;  %v337_v42 = vand.u32 2147483647, %v943_v63 }
  0xd0   :  { %v446_v40 = vsel %vm443_vm6, %v445_v27, %v441_v37  ;;  %v276_v41 = vsel %vm275_vm7, %v582_v5, %v272_v36  ;;  %v339_v30 = vand.u32 2147483648, %v943_v63  ;;  %vm334_vm9 = vweird.f32 %v586_v23 }
  0xd1   :  { %490 = vst.msk [vmem:[%s1013_s4 + $0x50] sm:$0xff] %vm479_vm4, %v473_v24  ;;  %v477_v43 = vmul.f32 %v446_v40, %v870_v61  ;;  %v281_v44 = vsel %vm278_vm8, %v280_v38, %v276_v41  ;;  %v331_v49 = vmul.f32 %v586_v23, %v330_v55  ;;  %v222_v50 = vadd.f32 1.0, %v588_v46 }
  0xd2   :  { %v466_v28 = vmul.f32 %v281_v44, %v873_v62  ;;  %vm333_vm10 = vweird.f32 %v943_v63  ;;  %v340_v61 = vor.u32 1.1754944e-38, %v339_v30  ;;  %vm338_vm12 = vcmp.eq.f32.partialorder %v337_v42, 8.507059e+37 }
  0xd3   :  { %494 = vst.msk [vmem:[%s1013_s4 + $0x70] sm:$0xff] %vm479_vm4, %v477_v43  ;;  %v332_v22 = vadd.f32 %v586_v23, %v331_v49  ;;  %v590_v51 = vpop.eup %589  ;;  %vm335_vm11 = vmor %vm333_vm10, %vm334_vm9  ;;  %591 = vrcp.f32 %v222_v50  ;;  %v399_v57 = vand.u32 2147483648, %v218_v21  ;;  %v397_v47 = vand.u32 2147483647, %v218_v21 }
  0xd4   :  { %483 = vst.msk [vmem:[%s1013_s4 + $0x18] sm:$0xff] %vm479_vm4, %v466_v28  ;;  %v389_v62 = vmul.f32 %v590_v51, %v218_v21  ;;  %vm394_vm13 = vweird.f32 %v590_v51  ;;  %vm393_vm14 = vweird.f32 %v218_v21  ;;  %v459_v34 = vand.u32 2147483648, %v222_v50 }
  0xd5   :  { %v336_v52 = vsel %vm335_vm11, %v586_v23, %v332_v22  ;;  %vm395_vm15 = vmor %vm393_vm14, %vm394_vm13  ;;  %v400_v63 = vor.u32 1.1754944e-38, %v399_v57  ;;  %vm398_vm0 = vcmp.eq.f32.partialorder %v397_v47, 8.507059e+37  ;;  %v457_v3 = vand.u32 2147483647, %v222_v50 }
  0xd6   :  { %v341_v53 = vsel %vm338_vm12, %v340_v61, %v336_v52  ;;  %v390_v56 = vsub.f32 1.0, %v389_v62  ;;  %vm453_vm2 = vweird.f32 %v222_v50  ;;  %v460_v6 = vor.u32 1.1754944e-38, %v459_v34 }
  0xd7   :  { %v470_v54 = vmul.f32 %v341_v53, %v888_v12  ;;  %vm458_vm5 = vcmp.eq.f32.partialorder %v457_v3, 8.507059e+37 }
  0xd8   :  { %v391_v31 = vmul.f32 %v590_v51, %v390_v56 }
  0xd9   :  { %487 = vst.msk [vmem:[%s1013_s4 + $0x38] sm:$0xff] %vm479_vm4, %v470_v54  ;;  %v592_v58 = vpop.eup %591 }
  0xda   :  { %v392_v59 = vadd.f32 %v590_v51, %v391_v31  ;;  %v449_v60 = vmul.f32 %v592_v58, %v222_v50  ;;  %vm454_vm1 = vweird.f32 %v592_v58 }
  0xdb   :  { %vm455_vm3 = vmor %vm453_vm2, %vm454_vm1 }
  0xdc   :  { %v396_v48 = vsel %vm395_vm15, %v590_v51, %v392_v59  ;;  %v450_v33 = vsub.f32 1.0, %v449_v60 }
  0xdd   :  { %v401_v12 = vsel %vm398_vm0, %v400_v63, %v396_v48 }
  0xde   :  { %v474_v2 = vmul.f32 %v401_v12, %v917_v39  ;;  %v451_v26 = vmul.f32 %v592_v58, %v450_v33 }
  0xe0   :  { %491 = vst.msk [vmem:[%s1013_s4 + $0x58] sm:$0xff] %vm479_vm4, %v474_v2  ;;  %v452_v5 = vadd.f32 %v592_v58, %v451_v26 }
  0xe2   :  { %v456_v7 = vsel %vm455_vm3, %v592_v58, %v452_v5 }
  0xe3   :  { %v461_v9 = vsel %vm458_vm5, %v460_v6, %v456_v7 }
  0xe4   :  { %v478_v10 = vmul.f32 %v461_v9, %v912_v25 }
  0xe6   :  { %495 = vst.msk [vmem:[%s1013_s4 + $0x78] sm:$0xff] %vm479_vm4, %v478_v10 }

// kernel: _lambda_.21
= control target key start
LH: loop header
LB: loop body
LE: loop exit
PB: predicated region body
PF: predicated region fallthrough
CT: control target
= control target key end

     0   :  { %s524_s18 = smov 0   ;;  %s526_s19 = smov 0   ;;  %s590_s0 = inlined_call_operand.vmem [shape: f32[2,16,64], index: 0, kind: input, shape index: {}]   ;;  %s591_s1 = inlined_call_operand.vmem [shape: f32[2,1,64], index: 1, kind: input, shape index: {}]   ;;  %s592_s2 = inlined_call_operand.vmem [shape: f32[64,24], index: 2, kind: input, shape index: {}]   ;;  %s593_s3 = inlined_call_operand.vmem [shape: f32[1,24], index: 3, kind: input, shape index: {}]   ;;  %s594_s4 = inlined_call_operand.vmem [shape: f32[1,24], index: 4, kind: input, shape index: {}]   ;;  %s595_s5 = inlined_call_operand.vmem [shape: f32[2,16,24], index: 5, kind: output, shape index: {}]  }
   0x1   :  { %s528_s20 = smov 0  }
   0x2 LB: > { %s27_s21 = sadd.s32 1, %s488_s19  ;;  %p433_p0 = scmp.ge.s32.totalorder %s492_s20, 1  ;;  %s492_s20 = sphi %s528_s20, %s15_s20   ;;  %s488_s19 = sphi %s526_s19, %s597_s19   ;;  %s484_s18 = sphi %s524_s18, %s596_s18  }
   0x3   : > { %p29_p1 = scmp.ge.s32.totalorder %s27_s21, 2  ;;  %p216_p2 = scmp.lt.s32.totalorder %s492_s20, 3 }
   0x5   : > { %s599_s21 = smov (%p29_p1, %s27_s21), 0  ;;  %p217_p3 = pnand %p433_p0, %p216_p2 }
   0x6   : > { %p256_p4 = scmp.lt.s32.totalorder (!%p217_p3), %s484_s18, 1 }
   0x7   : > { %220 = sbr.rel (%p217_p3) target bundleno = 169 (0xa9), region = 40 }
   0xc   : > { %v294_v0 = vld [vmem:[%s592_s2 + $0x30] sm:$0xff]  ;;  %v295_v1 = vld [vmem:[%s592_s2 + $0x38] sm:$0xff]  ;;  %v292_v2 = vld [vmem:[%s592_s2 + $0x20] sm:$0xff]  ;;  %s601_s18 = smov (!%p256_p4, %s484_s18), 1  ;;  %vm300_vm0 = vcmask 523264   ;;  %vm330_vm1 = vcmask 195584  }
   0xd   : > { %v299_v3 = vpack.c.bf16 %v295_v1, %v294_v0  ;;  %v293_v4 = vld [vmem:[%s592_s2 + $0x28] sm:$0xff]  ;;  %v290_v6 = vld [vmem:[%s592_s2 + $0x10] sm:$0xff]  ;;  %v291_v7 = vld [vmem:[%s592_s2 + $0x18] sm:$0xff]  ;;  %s441_s9 = sshll.u32 %s601_s18, 4  ;;  %s267_s12 = scalar_lea.vmem %s591_s1, %s601_s18 }
   0xe   : > { %v298_v5 = vpack.c.bf16 %v293_v4, %v292_v2  ;;  %s263_s15 = scalar_lea.vmem %s590_s0, %s441_s9  ;;  %v467_v8 = vld [vmem:[%s267_s12] ss:$0 sm:$0xff]  ;;  %v297_v9 = vpack.c.bf16 %v291_v7, %v290_v6  ;;  %v289_v13 = vld [vmem:[%s592_s2 + $0x8] sm:$0xff]  ;;  %s276_s29 = scalar_lea.vmem %s595_s5, %s441_s9 }
   0xf   : > { %308 = vmatpush.bf16.msra.mxu0 %v299_v3  ;;  %v279_v10 = vld [vmem:[%s263_s15] sm:$0xff]  ;;  %v280_v11 = vld [vmem:[%s263_s15 + $0x8] sm:$0xff] }
  0x10   : > { %v288_v12 = vld [vmem:[%s592_s2] sm:$0xff]  ;;  %v285_v14 = vmul.f32 %v467_v8, %v279_v10  ;;  %v286_v15 = vmul.f32 %v467_v8, %v280_v11 }
  0x11   : > { %v296_v16 = vpack.c.bf16 %v289_v13, %v288_v12  ;;  %v468_v18 = vld [vmem:[%s593_s3] ss:$0 sm:$0xff] }
  0x12   : > { %v287_v17 = vpack.c.bf16 %v286_v15, %v285_v14  ;;  %v469_v19 = vld [vmem:[%s594_s4] ss:$0 sm:$0xff] }
  0x13   : > { %309 = vmatpush.bf16.msra.mxu0 %v298_v5 }
  0x17   : > { %310 = vmatpush.bf16.msra.mxu0 %v297_v9 }
  0x1b   : > { %311 = vmatpush.bf16.msra.mxu0 %v296_v16 }
  0x1e   : > { %438 = vmatmul.msk.bf16.vlgmr.msra.gmra.mxu0 %vm300_vm0, %v287_v17 }
  0x9b   : > { %v313_v20 = vpop.f32.mrf.mxu0 }
  0x9c   : > { %v322_v21 = vmul.f32 %v468_v18, %v313_v20 }
  0x9e   : > { %v328_v22 = vadd.f32 %v469_v19, %v322_v21 }
  0xa0   : > { %331 = vst.msk [vmem:[%s276_s29] sm:$0xff] %vm330_vm1, %v328_v22 }
  0xa3   : > { %v315_v23 = vpop.f32.mrf.mxu0 }
  0xa4   : > { %v323_v24 = vmul.f32 %v468_v18, %v315_v23 }
  0xa6   : > { %v329_v25 = vadd.f32 %v469_v19, %v323_v24 }
  0xa8   : > { %332 = vst.msk [vmem:[%s276_s29 + $0x8] sm:$0xff] %vm330_vm1, %v329_v25 }
  0xa9 PF: > { %s15_s20 = sadd.s32 1, %s492_s20   ;;  %s596_s18 = smov %s488_s19 }
  0xaa   : > { %p12_p5 = scmp.ge.s32.totalorder %s15_s20, 4   ;;  %s597_s19 = smov %s599_s21 }
  0xac   :  { %14 = sbr.rel (!%p12_p5) target bundleno = 2 (0x2), region = 73 }

// kernel: _lambda_.20
= control target key start
LH: loop header
LB: loop body
LE: loop exit
PB: predicated region body
PF: predicated region fallthrough
CT: control target
= control target key end

     0   :  { %vm18_vm0 = vcmask 517120   ;;  %v175_v2 = vmov 0.0   ;;  %vm25_vm1 = vcmask 523264   ;;  %vm46_vm2 = vcmask 1041409   ;;  %s246_s1 = inlined_call_operand.vmem [shape: f32[64,4], index: 1, kind: input, shape index: {}]   ;;  %s247_s0 = inlined_call_operand.vmem [shape: f32[2,16,64], index: 0, kind: input, shape index: {}]   ;;  %s248_s2 = inlined_call_operand.vmem [shape: f32[4,64], index: 2, kind: input, shape index: {}]   ;;  %s249_s3 = inlined_call_operand.vmem [shape: f32[2,64], index: 3, kind: output, shape index: {}]  }
   0x1   :  { %v64_v0 = vld [vmem:[%s246_s1 + $0x38] sm:$0xff]  ;;  %v63_v1 = vld [vmem:[%s246_s1 + $0x30] sm:$0xff]  ;;  %19 = vst.msk [vmem:[#allocation2] sm:$0x3] %vm18_vm0, %v175_v2  ;;  %v62_v3 = vld [vmem:[%s246_s1 + $0x28] sm:$0xff]  ;;  %vm113_vm3 = vcmask 1043456  }
   0x2   :  { %76 = vmatpush.msra.mxu0 %v64_v0  ;;  %v21_v4 = vld [vmem:[%s247_s0] sm:$0xff]  ;;  %v22_v5 = vld [vmem:[%s247_s0 + $0x8] sm:$0xff]  ;;  %v23_v6 = vld [vmem:[%s247_s0 + $0x10] sm:$0xff]  ;;  %vm109_vm8 = vcmask 31744  }
   0x3   :  { %v24_v7 = vld [vmem:[%s247_s0 + $0x18] sm:$0xff]  ;;  %v26_v8 = vsel %vm25_vm1, %v21_v4, 0.0  ;;  %v61_v9 = vld [vmem:[%s246_s1 + $0x20] sm:$0xff]  ;;  %v27_v10 = vsel %vm25_vm1, %v22_v5, 0.0  ;;  %v35_v11 = vsel %vm25_vm1, %v23_v6, 0.0  ;;  %v59_v18 = vld [vmem:[%s246_s1 + $0x10] sm:$0xff] }
   0x4   :  { %77 = vmatpush.msra.mxu0 %v63_v1  ;;  %v36_v12 = vsel %vm25_vm1, %v24_v7, 0.0  ;;  %v28_v13 = vadd.f32 %v27_v10, %v26_v8  ;;  %v60_v15 = vld [vmem:[%s246_s1 + $0x18] sm:$0xff]  ;;  %v58_v21 = vld [vmem:[%s246_s1 + $0x8] sm:$0xff]  ;;  %v57_v24 = vld [vmem:[%s246_s1] sm:$0xff] }
   0x5   :  { %v37_v14 = vadd.f32 %v36_v12, %v35_v11  ;;  %v108_v36 = vld [vmem:[%s248_s2] sm:$0xf] }
   0x6   :  { %78 = vmatpush.msra.mxu0 %v62_v3  ;;  %v29_v16 = vrot.slane %v28_v13, 4  ;;  %163 = vmatpush.msk.msra.mxu1 %vm113_vm3, %v108_v36 }
   0x7   :  { %v38_v17 = vrot.slane %v37_v14, 4 }
   0x8   :  { %79 = vmatpush.msra.mxu0 %v61_v9  ;;  %v30_v19 = vadd.f32 %v29_v16, %v28_v13  ;;  %v20_v29 = vld [vmem:[#allocation2] sm:$0x3] }
   0x9   :  { %v39_v20 = vadd.f32 %v38_v17, %v37_v14 }
   0xa   :  { %80 = vmatpush.msra.mxu0 %v60_v15  ;;  %v31_v22 = vrot.slane %v30_v19, 2 }
   0xb   :  { %v40_v23 = vrot.slane %v39_v20, 2 }
   0xc   :  { %81 = vmatpush.msra.mxu0 %v59_v18  ;;  %v32_v25 = vadd.f32 %v31_v22, %v30_v19 }
   0xd   :  { %v41_v26 = vadd.f32 %v40_v23, %v39_v20 }
   0xe   :  { %82 = vmatpush.msra.mxu0 %v58_v21  ;;  %v33_v27 = vrot.slane %v32_v25, 1 }
   0xf   :  { %v42_v28 = vrot.slane %v41_v26, 1 }
  0x10   :  { %83 = vmatpush.msra.mxu0 %v57_v24  ;;  %v34_v30 = vadd.f32 %v33_v27, %v32_v25 }
  0x11   :  { %v43_v31 = vadd.f32 %v42_v28, %v41_v26 }
  0x13   :  { %v47_v32 = vsel %vm46_vm2, %v43_v31, %v34_v30 }
  0x14   :  { %v49_v33 = vadd.f32 %v47_v32, %v20_v29 }
  0x16   :  { %51 = vst.msk [vmem:[#allocation2] sm:$0x3] %vm18_vm0, %v49_v33 }
  0x1d   :  { %v55_v34 = vld [vmem:[#allocation2] sm:$0x3] }
  0x1e   :  { %v56_v35 = vmul.f32 0.0625, %v55_v34 }
  0x20   :  { %161 = vmatmul.msk.f32.vlgmr.msra.gmra.mxu0 %vm25_vm1, %v56_v35 }
  0x9d   :  { %v85_v37 = vpop.f32.mrf.mxu0 }
  0x9e   :  { %v162_v38 = vmul.f32 -1.442695, %v85_v37 }
  0xa0   :  { %167 = vpow2.f32 %v162_v38 }
  0xa6   :  { %v168_v39 = vpop.eup %167 }
  0xa7   :  { %v91_v40 = vadd.f32 1.0, %v168_v39 }
  0xa9   :  { %169 = vrcp.f32 %v91_v40  ;;  %v103_v44 = vand.u32 2147483648, %v91_v40  ;;  %v101_v46 = vand.u32 2147483647, %v91_v40  ;;  %vm97_vm5 = vweird.f32 %v91_v40 }
  0xab   :  { %v104_v48 = vor.u32 1.1754944e-38, %v103_v44  ;;  %vm102_vm7 = vcmp.eq.f32.partialorder %v101_v46, 8.507059e+37 }
  0xaf   :  { %v170_v41 = vpop.eup %169 }
  0xb0   :  { %v93_v42 = vmul.f32 %v170_v41, %v91_v40  ;;  %vm98_vm4 = vweird.f32 %v170_v41 }
  0xb1   :  { %vm99_vm6 = vmor %vm97_vm5, %vm98_vm4 }
  0xb2   :  { %v94_v43 = vsub.f32 1.0, %v93_v42 }
  0xb4   :  { %v95_v45 = vmul.f32 %v170_v41, %v94_v43 }
  0xb6   :  { %v96_v47 = vadd.f32 %v170_v41, %v95_v45 }
  0xb8   :  { %v100_v49 = vsel %vm99_vm6, %v170_v41, %v96_v47 }
  0xb9   :  { %v105_v50 = vsel %vm102_vm7, %v104_v48, %v100_v49 }
  0xba   :  { %v107_v51 = vmul.f32 %v105_v50, %v85_v37 }
  0xbc   :  { %164 = vmatmul.msk.f32.vlgmr.msra.gmra.mxu1 %vm109_vm8, %v107_v51 }
 0x139   :  { %v134_v52 = vpop.f32.mrf.mxu1 }
 0x13a   :  { %v165_v53 = vmul.f32 -1.442695, %v134_v52 }
 0x13c   :  { %171 = vpow2.f32 %v165_v53 }
 0x142   :  { %v172_v54 = vpop.eup %171 }
 0x143   :  { %v140_v55 = vadd.f32 1.0, %v172_v54 }
 0x145   :  { %173 = vrcp.f32 %v140_v55  ;;  %v152_v59 = vand.u32 2147483648, %v140_v55  ;;  %v150_v61 = vand.u32 2147483647, %v140_v55  ;;  %vm146_vm10 = vweird.f32 %v140_v55 }
 0x147   :  { %v153_v63 = vor.u32 1.1754944e-38, %v152_v59  ;;  %vm151_vm12 = vcmp.eq.f32.partialorder %v150_v61, 8.507059e+37 }
 0x14b   :  { %v174_v56 = vpop.eup %173 }
 0x14c   :  { %v142_v57 = vmul.f32 %v174_v56, %v140_v55  ;;  %vm147_vm9 = vweird.f32 %v174_v56 }
 0x14d   :  { %vm148_vm11 = vmor %vm146_vm10, %vm147_vm9 }
 0x14e   :  { %v143_v58 = vsub.f32 1.0, %v142_v57 }
 0x150   :  { %v144_v60 = vmul.f32 %v174_v56, %v143_v58 }
 0x152   :  { %v145_v62 = vadd.f32 %v174_v56, %v144_v60 }
 0x154   :  { %v149_v0 = vsel %vm148_vm11, %v174_v56, %v145_v62 }
 0x155   :  { %v154_v1 = vsel %vm151_vm12, %v153_v63, %v149_v0 }
 0x156   :  { %156 = vst.msk [vmem:[%s249_s3] sm:$0x3] %vm18_vm0, %v154_v1 }

// kernel: _lambda_.19
= control target key start
LH: loop header
LB: loop body
LE: loop exit
PB: predicated region body
PF: predicated region fallthrough
CT: control target
= control target key end

     0   :  { %s563_s15 = smov 0   ;;  %s692_s0 = inlined_call_operand.vmem [shape: f32[2,20,5,64], index: 0, kind: input, shape index: {}]   ;;  %s693_s1 = inlined_call_operand.vmem [shape: f32[9,64], index: 1, kind: input, shape index: {}]   ;;  %s694_s2 = inlined_call_operand.vmem [shape: f32[1,64], index: 2, kind: input, shape index: {}]   ;;  %s695_s3 = inlined_call_operand.vmem [shape: f32[1,64], index: 3, kind: input, shape index: {}]   ;;  %s696_s4 = inlined_call_operand.vmem [shape: f32[2,4,4,64], index: 4, kind: output, shape index: {}]  }
   0x1 LB: > { %s487_s16 = sadd.s32 4294967295, %s536_s15   ;;  %p491_p0 = scmp.ge.s32.totalorder %s536_s15, 1  ;;  %s536_s15 = sphi %s563_s15, %s14_s15  }
   0x2   : > { %p162_p1 = scmp.lt.s32.totalorder %s536_s15, 3 }
   0x4   : > { %p163_p2 = pnand %p491_p0, %p162_p1 }
   0x5   : > { %p188_p3 = scmp.lt.s32.totalorder (!%p163_p2), %s487_s16, 1 }
   0x6   : > { %166 = sbr.rel (%p163_p2) target bundleno = 81 (0x51), region = 36 }
   0xb   : > { %v216_v0 = vld [vmem:[%s693_s1] sm:$0xff]  ;;  %s702_s16 = smov (!%p188_p3, %s487_s16), 1  ;;  %v595_v9 = vld [vmem:[%s693_s1 + $0x8] ss:$0 sm:$0xff]  ;;  %vm427_vm10 = vcmask 519168  }
   0xc   : > { %s502_s19 = smul.u32 160, %s702_s16  ;;  %v218_v1 = vperm.slane %v216_v0, 0  ;;  %v223_v2 = vperm.slane %v216_v0, 1  ;;  %v232_v3 = vperm.slane %v216_v0, 2  ;;  %v577_v4 = vperm.slane %v216_v0, 3  ;;  %s501_s29 = sshll.u32 %s702_s16, 4 }
   0xd   : > { %v584_v5 = vperm.slane %v216_v0, 4  ;;  %v586_v6 = vperm.slane %v216_v0, 5  ;;  %v588_v7 = vperm.slane %v216_v0, 6  ;;  %v590_v8 = vperm.slane %v216_v0, 7  ;;  %s672_s6 = scalar_lea.vmem %s696_s4, %s501_s29 }
   0xe   : > { %s582_s22 = scalar_lea.vmem %s692_s0, %s502_s19 }
   0xf   : > { %v198_v10 = vld [vmem:[%s582_s22] sm:$0x1f]  ;;  %v199_v11 = vld [vmem:[%s582_s22 + $0x8] sm:$0x1f]  ;;  %v204_v13 = vld [vmem:[%s582_s22 + $0x30] sm:$0x1f] }
  0x10   : > { %v203_v12 = vld [vmem:[%s582_s22 + $0x28] sm:$0x1f]  ;;  %v208_v14 = vld [vmem:[%s582_s22 + $0x50] sm:$0x1f]  ;;  %v212_v15 = vld [vmem:[%s582_s22 + $0x78] sm:$0x1f]  ;;  %v219_v16 = vmul.f32 %v218_v1, %v198_v10  ;;  %v220_v17 = vmul.f32 %v218_v1, %v199_v11  ;;  %v233_v19 = vmul.f32 %v232_v3, %v198_v10  ;;  %v225_v20 = vmul.f32 %v223_v2, %v204_v13 }
  0x11   : > { %v224_v18 = vmul.f32 %v223_v2, %v203_v12  ;;  %v234_v21 = vmul.f32 %v232_v3, %v199_v11  ;;  %v254_v22 = vmul.f32 %v577_v4, %v208_v14  ;;  %v200_v23 = vld [vmem:[%s582_s22 + $0x10] sm:$0x1f]  ;;  %v205_v24 = vld [vmem:[%s582_s22 + $0x38] sm:$0x1f]  ;;  %v263_v27 = vmul.f32 %v584_v5, %v212_v15  ;;  %v213_v34 = vld [vmem:[%s582_s22 + $0x80] sm:$0x1f] }
  0x12   : > { %v241_v26 = vrot.slane %v233_v19, 1  ;;  %v272_v28 = vmul.f32 %v586_v6, %v208_v14  ;;  %v209_v29 = vld [vmem:[%s582_s22 + $0x58] sm:$0x1f]  ;;  %v229_v30 = vadd.f32 %v225_v20, %v220_v17  ;;  %v293_v32 = vmul.f32 %v588_v7, %v199_v11  ;;  %v206_v48 = vld [vmem:[%s582_s22 + $0x40] sm:$0x1f] }
  0x13   : > { %v228_v25 = vadd.f32 %v224_v18, %v219_v16  ;;  %v242_v31 = vrot.slane %v234_v21, 1  ;;  %v311_v33 = vmul.f32 %v595_v9, %v199_v11  ;;  %v302_v36 = vmul.f32 %v590_v8, %v204_v13  ;;  %v201_v43 = vld [vmem:[%s582_s22 + $0x18] sm:$0x1f]  ;;  %v210_v53 = vld [vmem:[%s582_s22 + $0x60] sm:$0x1f] }
  0x14   : > { %v221_v37 = vmul.f32 %v218_v1, %v200_v23  ;;  %v226_v38 = vmul.f32 %v223_v2, %v205_v24  ;;  %v280_v40 = vrot.slane %v272_v28, 1  ;;  %v235_v41 = vmul.f32 %v232_v3, %v200_v23  ;;  %v214_v54 = vld [vmem:[%s582_s22 + $0x88] sm:$0x1f]  ;;  %v215_v17 = vld [vmem:[%s582_s22 + $0x90] sm:$0x1f] }
  0x15   : > { %v249_v35 = vadd.f32 %v241_v26, %v228_v25  ;;  %v250_v39 = vadd.f32 %v242_v31, %v229_v30  ;;  %v255_v42 = vmul.f32 %v577_v4, %v209_v29  ;;  %v264_v46 = vmul.f32 %v584_v5, %v213_v34  ;;  %v211_v16 = vld [vmem:[%s582_s22 + $0x68] sm:$0x1f]  ;;  %v202_v26 = vld [vmem:[%s582_s22 + $0x20] sm:$0x1f] }
  0x16   : > { %v230_v45 = vadd.f32 %v226_v38, %v221_v37  ;;  %v273_v47 = vmul.f32 %v586_v6, %v209_v29  ;;  %v319_v49 = vrot.slane %v311_v33, 1  ;;  %v243_v50 = vrot.slane %v235_v41, 1  ;;  %v207_v38 = vld [vmem:[%s582_s22 + $0x48] sm:$0x1f] }
  0x17   : > { %v258_v44 = vadd.f32 %v254_v22, %v249_v35  ;;  %v259_v51 = vadd.f32 %v255_v42, %v250_v39  ;;  %v294_v52 = vmul.f32 %v588_v7, %v200_v23  ;;  %v312_v57 = vmul.f32 %v595_v9, %v200_v23 }
  0x18   : > { %v281_v56 = vrot.slane %v273_v47, 1  ;;  %v222_v58 = vmul.f32 %v218_v1, %v201_v43  ;;  %v251_v59 = vadd.f32 %v243_v50, %v230_v45  ;;  %v227_v61 = vmul.f32 %v223_v2, %v206_v48 }
  0x19   : > { %v267_v55 = vadd.f32 %v263_v27, %v258_v44  ;;  %v268_v60 = vadd.f32 %v264_v46, %v259_v51  ;;  %v236_v62 = vmul.f32 %v232_v3, %v201_v43  ;;  %v303_v0 = vmul.f32 %v590_v8, %v205_v24  ;;  %v512_v24 = vld [vmem:[%s694_s2] ss:$0 sm:$0xff] }
  0x1a   : > { %v256_v10 = vmul.f32 %v577_v4, %v210_v53  ;;  %v265_v11 = vmul.f32 %v584_v5, %v214_v54  ;;  %v231_v13 = vadd.f32 %v227_v61, %v222_v58  ;;  %v274_v15 = vmul.f32 %v586_v6, %v210_v53 }
  0x1b   : > { %v288_v63 = vadd.f32 %v280_v40, %v267_v55  ;;  %v289_v12 = vadd.f32 %v281_v56, %v268_v60  ;;  %v244_v14 = vrot.slane %v236_v62, 1  ;;  %v320_v18 = vrot.slane %v312_v57, 1 }
  0x1c   : > { %v260_v19 = vadd.f32 %v256_v10, %v251_v59  ;;  %v295_v2 = vmul.f32 %v588_v7, %v201_v43  ;;  %v282_v21 = vrot.slane %v274_v15, 1  ;;  %v313_v22 = vmul.f32 %v595_v9, %v201_v43 }
  0x1d   : > { %v297_v1 = vadd.f32 %v293_v32, %v288_v63  ;;  %v298_v3 = vadd.f32 %v294_v52, %v289_v12  ;;  %v252_v20 = vadd.f32 %v244_v14, %v231_v13  ;;  %v257_v27 = vmul.f32 %v577_v4, %v211_v16  ;;  %v513_v32 = vld [vmem:[%s695_s3] ss:$0 sm:$0xff] }
  0x1e   : > { %v269_v25 = vadd.f32 %v265_v11, %v260_v19  ;;  %v266_v28 = vmul.f32 %v584_v5, %v215_v17  ;;  %v275_v30 = vmul.f32 %v586_v6, %v211_v16  ;;  %v304_v34 = vmul.f32 %v590_v8, %v206_v48 }
  0x1f   : > { %v306_v23 = vadd.f32 %v302_v36, %v297_v1  ;;  %v307_v29 = vadd.f32 %v303_v0, %v298_v3  ;;  %v261_v35 = vadd.f32 %v257_v27, %v252_v20  ;;  %v321_v37 = vrot.slane %v313_v22, 1 }
  0x20   : > { %v290_v33 = vadd.f32 %v282_v21, %v269_v25  ;;  %v283_v39 = vrot.slane %v275_v30, 1  ;;  %v296_v4 = vmul.f32 %v588_v7, %v202_v26  ;;  %v314_v6 = vmul.f32 %v595_v9, %v202_v26 }
  0x21   : > { %v327_v31 = vadd.f32 %v319_v49, %v306_v23  ;;  %v328_v36 = vadd.f32 %v320_v18, %v307_v29  ;;  %v270_v41 = vadd.f32 %v266_v28, %v261_v35  ;;  %v305_v46 = vmul.f32 %v590_v8, %v207_v38 }
  0x22   : > { %v299_v5 = vadd.f32 %v295_v2, %v290_v33  ;;  %v322_v51 = vrot.slane %v314_v6, 1 }
  0x23   : > { %v335_v40 = vmul.f32 %v512_v24, %v327_v31  ;;  %v336_v42 = vmul.f32 %v512_v24, %v328_v36  ;;  %v291_v45 = vadd.f32 %v283_v39, %v270_v41 }
  0x24   : > { %v308_v44 = vadd.f32 %v304_v34, %v299_v5 }
  0x25   : > { %v644_v43 = vadd.f32 %v513_v32, %v335_v40  ;;  %v647_v47 = vadd.f32 %v513_v32, %v336_v42  ;;  %v300_v50 = vadd.f32 %v296_v4, %v291_v45 }
  0x26   : > { %v329_v49 = vadd.f32 %v321_v37, %v308_v44 }
  0x27   : > { %v495_v48 = vmul.f32 -1.442695, %v644_v43  ;;  %v496_v7 = vmul.f32 -1.442695, %v647_v47  ;;  %v309_v53 = vadd.f32 %v305_v46, %v300_v50 }
  0x28   : > { %v337_v52 = vmul.f32 %v512_v24, %v329_v49 }
  0x29   : > { %514 = vpow2.f32 %v495_v48  ;;  %v330_v54 = vadd.f32 %v322_v51, %v309_v53 }
  0x2a   : > { %516 = vpow2.f32 %v496_v7  ;;  %v651_v9 = vadd.f32 %v513_v32, %v337_v52 }
  0x2b   : > { %v338_v56 = vmul.f32 %v512_v24, %v330_v54 }
  0x2c   : > { %v497_v55 = vmul.f32 -1.442695, %v651_v9 }
  0x2d   : > { %v654_v57 = vadd.f32 %v513_v32, %v338_v56 }
  0x2e   : > { %518 = vpow2.f32 %v497_v55 }
  0x2f   : > { %v515_v8 = vpop.eup %514  ;;  %v498_v61 = vmul.f32 -1.442695, %v654_v57 }
  0x30   : > { %v517_v58 = vpop.eup %516  ;;  %v359_v59 = vadd.f32 1.0, %v515_v8 }
  0x31   : > { %v360_v60 = vadd.f32 1.0, %v517_v58 }
  0x32   : > { %520 = vrcp.f32 %v359_v59  ;;  %vm368_vm0 = vweird.f32 %v359_v59  ;;  %v372_v13 = vand.u32 2147483647, %v359_v59  ;;  %v374_v14 = vand.u32 2147483648, %v359_v59 }
  0x33   : > { %522 = vrcp.f32 %v360_v60  ;;  %v389_v17 = vand.u32 2147483648, %v360_v60  ;;  %vm383_vm2 = vweird.f32 %v360_v60  ;;  %v387_v19 = vand.u32 2147483647, %v360_v60 }
  0x34   : > { %524 = vpow2.f32 %v498_v61  ;;  %v519_v62 = vpop.eup %518  ;;  %v375_v21 = vor.u32 1.1754944e-38, %v374_v14  ;;  %vm373_vm5 = vcmp.eq.f32.partialorder %v372_v13, 8.507059e+37 }
  0x35   : > { %v361_v63 = vadd.f32 1.0, %v519_v62  ;;  %v390_v25 = vor.u32 1.1754944e-38, %v389_v17  ;;  %vm388_vm7 = vcmp.eq.f32.partialorder %v387_v19, 8.507059e+37 }
  0x37   : > { %526 = vrcp.f32 %v361_v63  ;;  %vm398_vm8 = vweird.f32 %v361_v63  ;;  %v404_v28 = vand.u32 2147483648, %v361_v63  ;;  %v402_v31 = vand.u32 2147483647, %v361_v63 }
  0x38   : > { %v521_v0 = vpop.eup %520 }
  0x39   : > { %v523_v10 = vpop.eup %522  ;;  %v364_v11 = vmul.f32 %v521_v0, %v359_v59  ;;  %vm369_vm1 = vweird.f32 %v521_v0  ;;  %v405_v39 = vor.u32 1.1754944e-38, %v404_v28  ;;  %vm403_vm12 = vcmp.eq.f32.partialorder %v402_v31, 8.507059e+37 }
  0x3a   : > { %v525_v12 = vpop.eup %524  ;;  %v379_v15 = vmul.f32 %v523_v10, %v360_v60  ;;  %vm384_vm3 = vweird.f32 %v523_v10  ;;  %vm658_vm4 = vmor %vm368_vm0, %vm369_vm1 }
  0x3b   : > { %v365_v16 = vsub.f32 1.0, %v364_v11  ;;  %v362_v1 = vadd.f32 1.0, %v525_v12  ;;  %vm663_vm6 = vmor %vm383_vm2, %vm384_vm3 }
  0x3c   : > { %v380_v18 = vsub.f32 1.0, %v379_v15 }
  0x3d   : > { %v366_v2 = vmul.f32 %v521_v0, %v365_v16  ;;  %528 = vrcp.f32 %v362_v1  ;;  %v527_v3 = vpop.eup %526  ;;  %v419_v5 = vand.u32 2147483648, %v362_v1  ;;  %vm413_vm13 = vweird.f32 %v362_v1 }
  0x3e   : > { %v381_v22 = vmul.f32 %v523_v10, %v380_v18  ;;  %v394_v26 = vmul.f32 %v527_v3, %v361_v63  ;;  %vm399_vm9 = vweird.f32 %v527_v3  ;;  %v417_v6 = vand.u32 2147483647, %v362_v1 }
  0x3f   : > { %v367_v23 = vadd.f32 %v521_v0, %v366_v2  ;;  %vm400_vm11 = vmor %vm398_vm8, %vm399_vm9  ;;  %v420_v46 = vor.u32 1.1754944e-38, %v419_v5 }
  0x40   : > { %v382_v27 = vadd.f32 %v523_v10, %v381_v22  ;;  %v395_v30 = vsub.f32 1.0, %v394_v26  ;;  %vm418_vm0 = vcmp.eq.f32.partialorder %v417_v6, 8.507059e+37 }
  0x41   : > { %v371_v29 = vsel %vm658_vm4, %v521_v0, %v367_v23 }
  0x42   : > { %v376_v32 = vsel %vm373_vm5, %v375_v21, %v371_v29  ;;  %v386_v33 = vsel %vm663_vm6, %v523_v10, %v382_v27  ;;  %v396_v37 = vmul.f32 %v527_v3, %v395_v30 }
  0x43   : > { %v529_v34 = vpop.eup %528  ;;  %v423_v35 = vmul.f32 %v376_v32, %v644_v43  ;;  %v391_v36 = vsel %vm388_vm7, %v390_v25, %v386_v33 }
  0x44   : > { %v424_v38 = vmul.f32 %v391_v36, %v647_v47  ;;  %v409_v4 = vmul.f32 %v529_v34, %v362_v1  ;;  %v397_v40 = vadd.f32 %v527_v3, %v396_v37  ;;  %vm414_vm14 = vweird.f32 %v529_v34 }
  0x45   : > { %428 = vst.msk [vmem:[%s672_s6] sm:$0xf] %vm427_vm10, %v423_v35  ;;  %vm415_vm15 = vmor %vm413_vm13, %vm414_vm14 }
  0x46   : > { %429 = vst.msk [vmem:[%s672_s6 + $0x4] sm:$0xf] %vm427_vm10, %v424_v38  ;;  %v410_v41 = vsub.f32 1.0, %v409_v4  ;;  %v401_v42 = vsel %vm400_vm11, %v527_v3, %v397_v40 }
  0x47   : > { %v406_v43 = vsel %vm403_vm12, %v405_v39, %v401_v42 }
  0x48   : > { %v411_v44 = vmul.f32 %v529_v34, %v410_v41  ;;  %v425_v45 = vmul.f32 %v406_v43, %v651_v9 }
  0x4a   : > { %v412_v47 = vadd.f32 %v529_v34, %v411_v44  ;;  %430 = vst.msk [vmem:[%s672_s6 + $0x8] sm:$0xf] %vm427_vm10, %v425_v45 }
  0x4c   : > { %v416_v48 = vsel %vm415_vm15, %v529_v34, %v412_v47 }
  0x4d   : > { %v421_v49 = vsel %vm418_vm0, %v420_v46, %v416_v48 }
  0x4e   : > { %v426_v50 = vmul.f32 %v421_v49, %v654_v57 }
  0x50   : > { %431 = vst.msk [vmem:[%s672_s6 + $0xc] sm:$0xf] %vm427_vm10, %v426_v50 }
  0x51 PF: > { %s14_s15 = sadd.s32 1, %s536_s15  }
  0x52   : > { %p11_p4 = scmp.ge.s32.totalorder %s14_s15, 4  }
  0x54   :  { %13 = sbr.rel (!%p11_p4) target bundleno = 1 (0x1), region = 66 }

// kernel: _lambda_.22
= control target key start
LH: loop header
LB: loop body
LE: loop exit
PB: predicated region body
PF: predicated region fallthrough
CT: control target
= control target key end

     0   :  { %vm36_vm0 = vcmask 1043456   ;;  %vm29_vm1 = vcmask 195584   ;;  %vm155_vm9 = vcmask 785408   ;;  %s266_s1 = inlined_call_operand.vmem [shape: f32[24,96], index: 1, kind: input, shape index: {}]   ;;  %s267_s0 = inlined_call_operand.vmem [shape: f32[32,24], index: 0, kind: input, shape index: {}]   ;;  %s268_s2 = inlined_call_operand.vmem [shape: f32[1,96], index: 2, kind: input, shape index: {}]   ;;  %s269_s3 = inlined_call_operand.vmem [shape: f32[1,96], index: 3, kind: input, shape index: {}]   ;;  %s270_s4 = inlined_call_operand.vmem [shape: f32[32,96], index: 4, kind: output, shape index: {}]  }
   0x1   :  { %v26_v0 = vld [vmem:[%s266_s1 + $0x10] sm:$0xff]  ;;  %v24_v2 = vld [vmem:[%s266_s1] sm:$0xff]  ;;  %v25_v3 = vld [vmem:[%s266_s1 + $0x8] sm:$0xff] }
   0x2   :  { %v28_v1 = vpack.c.bf16 %v26_v0, %v26_v0  ;;  %v18_v5 = vld [vmem:[%s267_s0] sm:$0xff]  ;;  %v27_v6 = vpack.c.bf16 %v25_v3, %v24_v2  ;;  %v19_v7 = vld [vmem:[%s267_s0 + $0x8] sm:$0xff]  ;;  %v20_v8 = vld [vmem:[%s267_s0 + $0x10] sm:$0xff] }
   0x3   :  { %v21_v9 = vld [vmem:[%s267_s0 + $0x18] sm:$0xff]  ;;  %v22_v10 = vpack.c.bf16 %v19_v7, %v18_v5  ;;  %v172_v12 = vld [vmem:[%s268_s2] ss:$0 sm:$0xff] }
   0x4   :  { %v38_v4 = vsel %vm36_vm0, %v28_v1, 0  ;;  %v23_v11 = vpack.c.bf16 %v21_v9, %v20_v8  ;;  %v173_v13 = vld [vmem:[%s269_s3] ss:$0 sm:$0xff] }
   0x5   :  { %46 = vmatpush.bf16.msra.mxu0 %v38_v4  ;;  %170 = vmatpush.bf16.msra.mxu1 %v38_v4 }
   0x9   :  { %47 = vmatpush.bf16.msra.mxu0 %v27_v6  ;;  %171 = vmatpush.bf16.msra.mxu1 %v27_v6 }
   0xc   :  { %164 = vmatmul.msk.bf16.vlgmr.msra.gmra.mxu0 %vm29_vm1, %v22_v10  ;;  %165 = vmatmul.msk.bf16.vlgmr.msra.gmra.mxu1 %vm29_vm1, %v23_v11 }
  0x89   :  { %v49_v14 = vpop.f32.mrf.mxu0  ;;  %v54_v15 = vpop.f32.mrf.mxu1 }
  0x8a   :  { %v63_v16 = vmul.f32 %v172_v12, %v49_v14  ;;  %v65_v17 = vmul.f32 %v172_v12, %v54_v15 }
  0x8c   :  { %v71_v18 = vadd.f32 %v173_v13, %v63_v16  ;;  %v73_v19 = vadd.f32 %v173_v13, %v65_v17 }
  0x8e   :  { %v166_v20 = vmul.f32 -1.442695, %v71_v18  ;;  %v168_v21 = vmul.f32 -1.442695, %v73_v19 }
  0x90   :  { %174 = vpow2.f32 %v166_v20 }
  0x91   :  { %176 = vpow2.f32 %v168_v21  ;;  %v51_v22 = vpop.f32.mrf.mxu0  ;;  %v56_v23 = vpop.f32.mrf.mxu1 }
  0x92   :  { %v64_v24 = vmul.f32 %v172_v12, %v51_v22  ;;  %v66_v25 = vmul.f32 %v172_v12, %v56_v23 }
  0x94   :  { %v242_v26 = vadd.f32 %v173_v13, %v64_v24  ;;  %v244_v27 = vadd.f32 %v173_v13, %v66_v25 }
  0x96   :  { %v175_v28 = vpop.eup %174  ;;  %v167_v29 = vmul.f32 -1.442695, %v242_v26  ;;  %v169_v32 = vmul.f32 -1.442695, %v244_v27 }
  0x97   :  { %v177_v30 = vpop.eup %176  ;;  %v87_v31 = vadd.f32 1.0, %v175_v28 }
  0x98   :  { %v89_v33 = vadd.f32 1.0, %v177_v30  ;;  %178 = vpow2.f32 %v167_v29 }
  0x99   :  { %180 = vrcp.f32 %v87_v31  ;;  %v100_v43 = vand.u32 2147483647, %v87_v31  ;;  %v102_v44 = vand.u32 2147483648, %v87_v31  ;;  %vm96_vm4 = vweird.f32 %v87_v31 }
  0x9a   :  { %182 = vrcp.f32 %v89_v33  ;;  %v132_v47 = vand.u32 2147483648, %v89_v33  ;;  %v130_v49 = vand.u32 2147483647, %v89_v33  ;;  %vm126_vm6 = vweird.f32 %v89_v33 }
  0x9b   :  { %184 = vpow2.f32 %v169_v32  ;;  %v103_v52 = vor.u32 1.1754944e-38, %v102_v44  ;;  %vm101_vm7 = vcmp.eq.f32.partialorder %v100_v43, 8.507059e+37 }
  0x9c   :  { %v133_v55 = vor.u32 1.1754944e-38, %v132_v47  ;;  %vm131_vm10 = vcmp.eq.f32.partialorder %v130_v49, 8.507059e+37 }
  0x9e   :  { %v179_v34 = vpop.eup %178 }
  0x9f   :  { %v181_v35 = vpop.eup %180  ;;  %v88_v36 = vadd.f32 1.0, %v179_v34 }
  0xa0   :  { %v183_v37 = vpop.eup %182  ;;  %v92_v38 = vmul.f32 %v181_v35, %v87_v31  ;;  %vm97_vm2 = vweird.f32 %v181_v35 }
  0xa1   :  { %v185_v39 = vpop.eup %184  ;;  %v122_v40 = vmul.f32 %v183_v37, %v89_v33  ;;  %186 = vrcp.f32 %v88_v36  ;;  %vm127_vm3 = vweird.f32 %v183_v37  ;;  %vm98_vm5 = vmor %vm96_vm4, %vm97_vm2  ;;  %v117_v0 = vand.u32 2147483648, %v88_v36 }
  0xa2   :  { %v93_v41 = vsub.f32 1.0, %v92_v38  ;;  %v90_v42 = vadd.f32 1.0, %v185_v39  ;;  %vm128_vm8 = vmor %vm126_vm6, %vm127_vm3  ;;  %v115_v3 = vand.u32 2147483647, %v88_v36  ;;  %vm111_vm12 = vweird.f32 %v88_v36 }
  0xa3   :  { %v123_v45 = vsub.f32 1.0, %v122_v40  ;;  %v118_v7 = vor.u32 1.1754944e-38, %v117_v0 }
  0xa4   :  { %v94_v46 = vmul.f32 %v181_v35, %v93_v41  ;;  %188 = vrcp.f32 %v90_v42  ;;  %v147_v6 = vand.u32 2147483648, %v90_v42  ;;  %v145_v9 = vand.u32 2147483647, %v90_v42 }
  0xa5   :  { %v124_v48 = vmul.f32 %v183_v37, %v123_v45  ;;  %vm116_vm15 = vcmp.eq.f32.partialorder %v115_v3, 8.507059e+37  ;;  %vm141_vm0 = vweird.f32 %v90_v42 }
  0xa6   :  { %v95_v50 = vadd.f32 %v181_v35, %v94_v46  ;;  %v148_v14 = vor.u32 1.1754944e-38, %v147_v6  ;;  %vm146_vm2 = vcmp.eq.f32.partialorder %v145_v9, 8.507059e+37 }
  0xa7   :  { %v187_v51 = vpop.eup %186  ;;  %v125_v53 = vadd.f32 %v183_v37, %v124_v48 }
  0xa8   :  { %v99_v54 = vsel %vm98_vm5, %v181_v35, %v95_v50  ;;  %v107_v56 = vmul.f32 %v187_v51, %v88_v36  ;;  %vm112_vm11 = vweird.f32 %v187_v51 }
  0xa9   :  { %v104_v57 = vsel %vm101_vm7, %v103_v52, %v99_v54  ;;  %v129_v58 = vsel %vm128_vm8, %v183_v37, %v125_v53  ;;  %vm113_vm13 = vmor %vm111_vm12, %vm112_vm11 }
  0xaa   :  { %v189_v59 = vpop.eup %188  ;;  %v151_v60 = vmul.f32 %v104_v57, %v71_v18  ;;  %v134_v61 = vsel %vm131_vm10, %v133_v55, %v129_v58  ;;  %v108_v62 = vsub.f32 1.0, %v107_v56 }
  0xab   :  { %v153_v63 = vmul.f32 %v134_v61, %v73_v19  ;;  %v137_v1 = vmul.f32 %v189_v59, %v90_v42  ;;  %vm142_vm14 = vweird.f32 %v189_v59 }
  0xac   :  { %156 = vst.msk [vmem:[%s270_s4] sm:$0xff] %vm155_vm9, %v151_v60  ;;  %v109_v2 = vmul.f32 %v187_v51, %v108_v62  ;;  %vm143_vm1 = vmor %vm141_vm0, %vm142_vm14 }
  0xad   :  { %158 = vst.msk [vmem:[%s270_s4 + $0x10] sm:$0xff] %vm155_vm9, %v153_v63  ;;  %v138_v4 = vsub.f32 1.0, %v137_v1 }
  0xae   :  { %v110_v5 = vadd.f32 %v187_v51, %v109_v2 }
  0xaf   :  { %v139_v8 = vmul.f32 %v189_v59, %v138_v4 }
  0xb0   :  { %v114_v10 = vsel %vm113_vm13, %v187_v51, %v110_v5 }
  0xb1   :  { %v119_v11 = vsel %vm116_vm15, %v118_v7, %v114_v10  ;;  %v140_v12 = vadd.f32 %v189_v59, %v139_v8 }
  0xb2   :  { %v152_v13 = vmul.f32 %v119_v11, %v242_v26 }
  0xb3   :  { %v144_v15 = vsel %vm143_vm1, %v189_v59, %v140_v12 }
  0xb4   :  { %157 = vst.msk [vmem:[%s270_s4 + $0x8] sm:$0xff] %vm155_vm9, %v152_v13  ;;  %v149_v16 = vsel %vm146_vm2, %v148_v14, %v144_v15 }
  0xb5   :  { %v154_v17 = vmul.f32 %v149_v16, %v244_v27 }
  0xb7   :  { %159 = vst.msk [vmem:[%s270_s4 + $0x18] sm:$0xff] %vm155_vm9, %v154_v17 }

// kernel: _lambda_.23
= control target key start
LH: loop header
LB: loop body
LE: loop exit
PB: predicated region body
PF: predicated region fallthrough
CT: control target
= control target key end

     0   :  { %s587_s15 = smov 0   ;;  %s726_s0 = inlined_call_operand.vmem [shape: f32[2,6,6,96], index: 0, kind: input, shape index: {}]   ;;  %s727_s1 = inlined_call_operand.vmem [shape: f32[9,96], index: 1, kind: input, shape index: {}]   ;;  %s728_s2 = inlined_call_operand.vmem [shape: f32[1,96], index: 2, kind: input, shape index: {}]   ;;  %s729_s3 = inlined_call_operand.vmem [shape: f32[1,96], index: 3, kind: input, shape index: {}]   ;;  %s730_s4 = inlined_call_operand.vmem [shape: f32[2,4,4,96], index: 4, kind: output, shape index: {}]  }
   0x1 LB: > { %s511_s16 = sadd.s32 4294967295, %s560_s15   ;;  %p515_p0 = scmp.ge.s32.totalorder %s560_s15, 1  ;;  %s560_s15 = sphi %s587_s15, %s14_s15  }
   0x2   : > { %p162_p1 = scmp.lt.s32.totalorder %s560_s15, 3 }
   0x4   : > { %p163_p2 = pnand %p515_p0, %p162_p1 }
   0x5   : > { %p188_p3 = scmp.lt.s32.totalorder (!%p163_p2), %s511_s16, 1 }
   0x6   : > { %166 = sbr.rel (%p163_p2) target bundleno = 83 (0x53), region = 36 }
   0xb   : > { %v204_v0 = vld [vmem:[%s727_s1] sm:$0xff]  ;;  %s738_s16 = smov (!%p188_p3, %s511_s16), 1  ;;  %v632_v16 = vld [vmem:[%s727_s1 + $0x8] ss:$0 sm:$0xff]  ;;  %vm451_vm6 = vcmask 781312  }
   0xc   : > { %s526_s19 = smul.u32 48, %s738_s16  ;;  %v601_v1 = vperm.slane %v204_v0, 0  ;;  %v603_v2 = vperm.slane %v204_v0, 1  ;;  %v605_v3 = vperm.slane %v204_v0, 2  ;;  %v607_v4 = vperm.slane %v204_v0, 4  ;;  %s525_s29 = sshll.u32 %s738_s16, 4 }
   0xd   : > { %v614_v5 = vperm.slane %v204_v0, 3  ;;  %v616_v6 = vperm.slane %v204_v0, 5  ;;  %v620_v9 = vperm.slane %v204_v0, 6  ;;  %v622_v10 = vperm.slane %v204_v0, 7  ;;  %s705_s6 = scalar_lea.vmem %s730_s4, %s525_s29 }
   0xe   : > { %s612_s22 = scalar_lea.vmem %s726_s0, %s526_s19 }
   0xf   : > { %v198_v7 = vld [vmem:[%s612_s22] sm:$0x3f]  ;;  %v199_v8 = vld [vmem:[%s612_s22 + $0x8] sm:$0x3f]  ;;  %v200_v17 = vld [vmem:[%s612_s22 + $0x10] sm:$0x3f] }
  0x10   : > { %v207_v11 = vmul.f32 %v601_v1, %v198_v7  ;;  %v212_v12 = vmul.f32 %v603_v2, %v198_v7  ;;  %v213_v13 = vmul.f32 %v603_v2, %v199_v8  ;;  %v233_v14 = vmul.f32 %v605_v3, %v198_v7  ;;  %v201_v32 = vld [vmem:[%s612_s22 + $0x18] sm:$0x3f]  ;;  %v202_v57 = vld [vmem:[%s612_s22 + $0x20] sm:$0x3f] }
  0x11   : > { %v263_v15 = vmul.f32 %v607_v4, %v199_v8  ;;  %v284_v20 = vmul.f32 %v616_v6, %v199_v8  ;;  %v314_v21 = vmul.f32 %v622_v10, %v200_v17  ;;  %v208_v22 = vmul.f32 %v601_v1, %v199_v8 }
  0x12   : > { %v220_v18 = vrot.slane %v212_v12, 1  ;;  %v241_v19 = vrot.slane %v233_v14, 2  ;;  %v221_v23 = vrot.slane %v213_v13, 1  ;;  %v254_v25 = vmul.f32 %v614_v5, %v199_v8 }
  0x13   : > { %v305_v26 = vmul.f32 %v620_v9, %v200_v17  ;;  %v234_v27 = vmul.f32 %v605_v3, %v199_v8  ;;  %v271_v28 = vrot.slane %v263_v15, 1  ;;  %v335_v29 = vmul.f32 %v632_v16, %v200_v17 }
  0x14   : > { %v228_v24 = vadd.f32 %v220_v18, %v207_v11  ;;  %v229_v30 = vadd.f32 %v221_v23, %v208_v22  ;;  %v264_v31 = vmul.f32 %v607_v4, %v200_v17  ;;  %v255_v35 = vmul.f32 %v614_v5, %v200_v17 }
  0x15   : > { %v242_v34 = vrot.slane %v234_v27, 2  ;;  %v285_v36 = vmul.f32 %v616_v6, %v200_v17  ;;  %v292_v37 = vrot.slane %v284_v20, 2  ;;  %v322_v38 = vrot.slane %v314_v21, 1  ;;  %v536_v20 = vld [vmem:[%s728_s2] ss:$0 sm:$0xff] }
  0x16   : > { %v249_v33 = vadd.f32 %v241_v19, %v228_v24  ;;  %v272_v39 = vrot.slane %v264_v31, 1  ;;  %v315_v40 = vmul.f32 %v622_v10, %v201_v32  ;;  %v209_v43 = vmul.f32 %v601_v1, %v200_v17 }
  0x17   : > { %v250_v42 = vadd.f32 %v242_v34, %v229_v30  ;;  %v214_v44 = vmul.f32 %v603_v2, %v200_v17  ;;  %v343_v45 = vrot.slane %v335_v29, 2  ;;  %v336_v46 = vmul.f32 %v632_v16, %v201_v32  ;;  %v203_v29 = vld [vmem:[%s612_s22 + $0x28] sm:$0x3f] }
  0x18   : > { %v258_v41 = vadd.f32 %v254_v25, %v249_v33  ;;  %v235_v47 = vmul.f32 %v605_v3, %v200_v17  ;;  %v265_v48 = vmul.f32 %v607_v4, %v201_v32  ;;  %v293_v51 = vrot.slane %v285_v36, 2 }
  0x19   : > { %v259_v50 = vadd.f32 %v255_v35, %v250_v42  ;;  %v222_v52 = vrot.slane %v214_v44, 1  ;;  %v306_v53 = vmul.f32 %v620_v9, %v201_v32  ;;  %v323_v54 = vrot.slane %v315_v40, 1 }
  0x1a   : > { %v279_v49 = vadd.f32 %v271_v28, %v258_v41  ;;  %v243_v55 = vrot.slane %v235_v47, 2  ;;  %v286_v56 = vmul.f32 %v616_v6, %v201_v32  ;;  %v256_v61 = vmul.f32 %v614_v5, %v201_v32 }
  0x1b   : > { %v280_v59 = vadd.f32 %v272_v39, %v259_v50  ;;  %v230_v60 = vadd.f32 %v222_v52, %v209_v43  ;;  %v344_v62 = vrot.slane %v336_v46, 2  ;;  %v273_v63 = vrot.slane %v265_v48, 1 }
  0x1c   : > { %v300_v58 = vadd.f32 %v292_v37, %v279_v49  ;;  %v210_v0 = vmul.f32 %v601_v1, %v201_v32  ;;  %v215_v7 = vmul.f32 %v603_v2, %v201_v32  ;;  %v236_v13 = vmul.f32 %v605_v3, %v201_v32 }
  0x1d   : > { %v301_v11 = vadd.f32 %v293_v51, %v280_v59  ;;  %v251_v12 = vadd.f32 %v243_v55, %v230_v60  ;;  %v294_v14 = vrot.slane %v286_v56, 2  ;;  %v316_v15 = vmul.f32 %v622_v10, %v202_v57 }
  0x1e   : > { %v309_v8 = vadd.f32 %v305_v26, %v300_v58  ;;  %v223_v17 = vrot.slane %v215_v7, 1  ;;  %v266_v18 = vmul.f32 %v607_v4, %v202_v57  ;;  %v244_v2 = vrot.slane %v236_v13, 2  ;;  %v537_v4 = vld [vmem:[%s729_s3] ss:$0 sm:$0xff] }
  0x1f   : > { %v310_v1 = vadd.f32 %v306_v53, %v301_v11  ;;  %v260_v21 = vadd.f32 %v256_v61, %v251_v12  ;;  %v307_v22 = vmul.f32 %v620_v9, %v202_v57  ;;  %v257_v3 = vmul.f32 %v614_v5, %v202_v57 }
  0x20   : > { %v330_v19 = vadd.f32 %v322_v38, %v309_v8  ;;  %v231_v23 = vadd.f32 %v223_v17, %v210_v0  ;;  %v287_v24 = vmul.f32 %v616_v6, %v202_v57  ;;  %v337_v28 = vmul.f32 %v632_v16, %v202_v57 }
  0x21   : > { %v331_v26 = vadd.f32 %v323_v54, %v310_v1  ;;  %v281_v27 = vadd.f32 %v273_v63, %v260_v21  ;;  %v274_v31 = vrot.slane %v266_v18, 1  ;;  %v324_v35 = vrot.slane %v316_v15, 1 }
  0x22   : > { %v351_v25 = vadd.f32 %v343_v45, %v330_v19  ;;  %v252_v30 = vadd.f32 %v244_v2, %v231_v23  ;;  %v295_v5 = vrot.slane %v287_v24, 2  ;;  %v317_v6 = vmul.f32 %v622_v10, %v203_v29 }
  0x23   : > { %v352_v33 = vadd.f32 %v344_v62, %v331_v26  ;;  %v302_v34 = vadd.f32 %v294_v14, %v281_v27  ;;  %v345_v40 = vrot.slane %v337_v28, 2  ;;  %v308_v42 = vmul.f32 %v620_v9, %v203_v29 }
  0x24   : > { %v359_v32 = vmul.f32 %v536_v20, %v351_v25  ;;  %v261_v36 = vadd.f32 %v257_v3, %v252_v30  ;;  %v338_v43 = vmul.f32 %v632_v16, %v203_v29  ;;  %v325_v48 = vrot.slane %v317_v6, 1 }
  0x25   : > { %v360_v38 = vmul.f32 %v536_v20, %v352_v33  ;;  %v311_v39 = vadd.f32 %v307_v22, %v302_v34 }
  0x26   : > { %v673_v37 = vadd.f32 %v537_v4, %v359_v32  ;;  %v282_v41 = vadd.f32 %v274_v31, %v261_v36  ;;  %v346_v51 = vrot.slane %v338_v43, 2 }
  0x27   : > { %v678_v45 = vadd.f32 %v537_v4, %v360_v38  ;;  %v332_v46 = vadd.f32 %v324_v35, %v311_v39 }
  0x28   : > { %v519_v44 = vmul.f32 -1.442695, %v673_v37  ;;  %v303_v47 = vadd.f32 %v295_v5, %v282_v41 }
  0x29   : > { %v520_v10 = vmul.f32 -1.442695, %v678_v45  ;;  %v353_v49 = vadd.f32 %v345_v40, %v332_v46 }
  0x2a   : > { %538 = vpow2.f32 %v519_v44  ;;  %v312_v50 = vadd.f32 %v308_v42, %v303_v47 }
  0x2b   : > { %540 = vpow2.f32 %v520_v10  ;;  %v361_v52 = vmul.f32 %v536_v20, %v353_v49 }
  0x2c   : > { %v333_v53 = vadd.f32 %v325_v48, %v312_v50 }
  0x2d   : > { %v681_v54 = vadd.f32 %v537_v4, %v361_v52 }
  0x2e   : > { %v354_v9 = vadd.f32 %v346_v51, %v333_v53 }
  0x2f   : > { %v521_v55 = vmul.f32 -1.442695, %v681_v54 }
  0x30   : > { %v539_v16 = vpop.eup %538  ;;  %v362_v57 = vmul.f32 %v536_v20, %v354_v9 }
  0x31   : > { %v383_v56 = vadd.f32 1.0, %v539_v16  ;;  %v541_v58 = vpop.eup %540  ;;  %542 = vpow2.f32 %v521_v55 }
  0x32   : > { %v384_v59 = vadd.f32 1.0, %v541_v58  ;;  %v684_v60 = vadd.f32 %v537_v4, %v362_v57 }
  0x33   : > { %544 = vrcp.f32 %v383_v56  ;;  %v398_v8 = vand.u32 2147483648, %v383_v56  ;;  %vm392_vm0 = vweird.f32 %v383_v56  ;;  %v396_v13 = vand.u32 2147483647, %v383_v56 }
  0x34   : > { %546 = vrcp.f32 %v384_v59  ;;  %v522_v61 = vmul.f32 -1.442695, %v684_v60  ;;  %v411_v15 = vand.u32 2147483647, %v384_v59  ;;  %v413_v18 = vand.u32 2147483648, %v384_v59 }
  0x35   : > { %v399_v1 = vor.u32 1.1754944e-38, %v398_v8  ;;  %vm407_vm3 = vweird.f32 %v384_v59  ;;  %vm397_vm5 = vcmp.eq.f32.partialorder %v396_v13, 8.507059e+37 }
  0x36   : > { %548 = vpow2.f32 %v522_v61  ;;  %vm692_vm7 = vcmp.eq.f32.partialorder %v411_v15, 8.507059e+37  ;;  %v414_v26 = vor.u32 1.1754944e-38, %v413_v18 }
  0x37   : > { %v543_v62 = vpop.eup %542 }
  0x38   : > { %v385_v0 = vadd.f32 1.0, %v543_v62 }
  0x39   : > { %v545_v63 = vpop.eup %544 }
  0x3a   : > { %v388_v7 = vmul.f32 %v545_v63, %v383_v56  ;;  %550 = vrcp.f32 %v385_v0  ;;  %v547_v11 = vpop.eup %546  ;;  %vm393_vm1 = vweird.f32 %v545_v63  ;;  %vm422_vm9 = vweird.f32 %v385_v0 }
  0x3b   : > { %v403_v14 = vmul.f32 %v547_v11, %v384_v59  ;;  %vm687_vm2 = vmor %vm392_vm0, %vm393_vm1  ;;  %vm408_vm4 = vweird.f32 %v547_v11  ;;  %v428_v30 = vand.u32 2147483648, %v385_v0  ;;  %v426_v33 = vand.u32 2147483647, %v385_v0 }
  0x3c   : > { %v389_v12 = vsub.f32 1.0, %v388_v7  ;;  %v549_v19 = vpop.eup %548  ;;  %vm698_vm8 = vmor %vm407_vm3, %vm408_vm4 }
  0x3d   : > { %v404_v21 = vsub.f32 1.0, %v403_v14  ;;  %v386_v22 = vadd.f32 1.0, %v549_v19  ;;  %v429_v6 = vor.u32 1.1754944e-38, %v428_v30  ;;  %vm427_vm12 = vcmp.eq.f32.partialorder %v426_v33, 8.507059e+37 }
  0x3e   : > { %v390_v17 = vmul.f32 %v545_v63, %v389_v12 }
  0x3f   : > { %v405_v3 = vmul.f32 %v547_v11, %v404_v21  ;;  %552 = vrcp.f32 %v386_v22  ;;  %vm437_vm13 = vweird.f32 %v386_v22  ;;  %v443_v41 = vand.u32 2147483648, %v386_v22 }
  0x40   : > { %v391_v2 = vadd.f32 %v545_v63, %v390_v17  ;;  %v551_v23 = vpop.eup %550  ;;  %v441_v44 = vand.u32 2147483647, %v386_v22 }
  0x41   : > { %v418_v27 = vmul.f32 %v551_v23, %v385_v0  ;;  %v406_v29 = vadd.f32 %v547_v11, %v405_v3  ;;  %vm423_vm10 = vweird.f32 %v551_v23  ;;  %v444_v47 = vor.u32 1.1754944e-38, %v443_v41 }
  0x42   : > { %v395_v25 = vsel %vm687_vm2, %v545_v63, %v391_v2  ;;  %vm424_vm11 = vmor %vm422_vm9, %vm423_vm10  ;;  %vm442_vm0 = vcmp.eq.f32.partialorder %v441_v44, 8.507059e+37 }
  0x43   : > { %v400_v28 = vsel %vm397_vm5, %v399_v1, %v395_v25  ;;  %v419_v32 = vsub.f32 1.0, %v418_v27  ;;  %v410_v34 = vsel %vm698_vm8, %v547_v11, %v406_v29 }
  0x44   : > { %v447_v31 = vmul.f32 %v400_v28, %v673_v37  ;;  %v415_v35 = vsel %vm692_vm7, %v414_v26, %v410_v34 }
  0x45   : > { %v420_v36 = vmul.f32 %v551_v23, %v419_v32  ;;  %v448_v5 = vmul.f32 %v415_v35, %v678_v45  ;;  %v553_v38 = vpop.eup %552 }
  0x46   : > { %452 = vst.msk [vmem:[%s705_s6] sm:$0xf] %vm451_vm6, %v447_v31  ;;  %v433_v37 = vmul.f32 %v553_v38, %v386_v22  ;;  %vm438_vm14 = vweird.f32 %v553_v38 }
  0x47   : > { %v421_v39 = vadd.f32 %v551_v23, %v420_v36  ;;  %453 = vst.msk [vmem:[%s705_s6 + $0x4] sm:$0xf] %vm451_vm6, %v448_v5  ;;  %vm439_vm15 = vmor %vm437_vm13, %vm438_vm14 }
  0x48   : > { %v434_v43 = vsub.f32 1.0, %v433_v37 }
  0x49   : > { %v425_v40 = vsel %vm424_vm11, %v551_v23, %v421_v39 }
  0x4a   : > { %v430_v42 = vsel %vm427_vm12, %v429_v6, %v425_v40  ;;  %v435_v45 = vmul.f32 %v553_v38, %v434_v43 }
  0x4b   : > { %v449_v46 = vmul.f32 %v430_v42, %v681_v54 }
  0x4c   : > { %v436_v48 = vadd.f32 %v553_v38, %v435_v45 }
  0x4d   : > { %454 = vst.msk [vmem:[%s705_s6 + $0x8] sm:$0xf] %vm451_vm6, %v449_v46 }
  0x4e   : > { %v440_v10 = vsel %vm439_vm15, %v553_v38, %v436_v48 }
  0x4f   : > { %v445_v49 = vsel %vm442_vm0, %v444_v47, %v440_v10 }
  0x50   : > { %v450_v50 = vmul.f32 %v445_v49, %v684_v60 }
  0x52   : > { %455 = vst.msk [vmem:[%s705_s6 + $0xc] sm:$0xf] %vm451_vm6, %v450_v50 }
  0x53 PF: > { %s14_s15 = sadd.s32 1, %s560_s15  }
  0x54   : > { %p11_p4 = scmp.ge.s32.totalorder %s14_s15, 4  }
  0x56   :  { %13 = sbr.rel (!%p11_p4) target bundleno = 1 (0x1), region = 66 }

// kernel: _lambda_.24
= control target key start
LH: loop header
LB: loop body
LE: loop exit
PB: predicated region body
PF: predicated region fallthrough
CT: control target
= control target key end

     0   :  { %vm18_vm0 = vcmask 779264   ;;  %v179_v2 = vmov 0.0   ;;  %vm25_vm1 = vcmask 785408   ;;  %vm46_vm2 = vcmask 1041409   ;;  %s262_s1 = inlined_call_operand.vmem [shape: f32[96,6], index: 1, kind: input, shape index: {}]   ;;  %s263_s0 = inlined_call_operand.vmem [shape: f32[2,16,96], index: 0, kind: input, shape index: {}]   ;;  %s264_s2 = inlined_call_operand.vmem [shape: f32[6,96], index: 2, kind: input, shape index: {}]   ;;  %s265_s3 = inlined_call_operand.vmem [shape: f32[2,96], index: 3, kind: output, shape index: {}]  }
   0x1   :  { %v68_v0 = vld [vmem:[%s262_s1 + $0x58] sm:$0xff]  ;;  %v67_v1 = vld [vmem:[%s262_s1 + $0x50] sm:$0xff]  ;;  %19 = vst.msk [vmem:[#allocation2] sm:$0x3] %vm18_vm0, %v179_v2  ;;  %v66_v3 = vld [vmem:[%s262_s1 + $0x48] sm:$0xff]  ;;  %vm117_vm3 = vcmask 1045504  }
   0x2   :  { %76 = vmatpush.msra.mxu0 %v68_v0  ;;  %v65_v4 = vld [vmem:[%s262_s1 + $0x40] sm:$0xff]  ;;  %v22_v6 = vld [vmem:[%s263_s0 + $0x8] sm:$0xff]  ;;  %v23_v7 = vld [vmem:[%s263_s0 + $0x10] sm:$0xff]  ;;  %vm113_vm8 = vcmask 48128  }
   0x3   :  { %v21_v5 = vld [vmem:[%s263_s0] sm:$0xff]  ;;  %v24_v8 = vld [vmem:[%s263_s0 + $0x18] sm:$0xff]  ;;  %v27_v10 = vsel %vm25_vm1, %v22_v6, 0.0  ;;  %v35_v11 = vsel %vm25_vm1, %v23_v7, 0.0  ;;  %v63_v16 = vld [vmem:[%s262_s1 + $0x30] sm:$0xff] }
   0x4   :  { %77 = vmatpush.msra.mxu0 %v67_v1  ;;  %v26_v9 = vsel %vm25_vm1, %v21_v5, 0.0  ;;  %v64_v12 = vld [vmem:[%s262_s1 + $0x38] sm:$0xff]  ;;  %v36_v14 = vsel %vm25_vm1, %v24_v8, 0.0  ;;  %v62_v19 = vld [vmem:[%s262_s1 + $0x28] sm:$0xff]  ;;  %v61_v22 = vld [vmem:[%s262_s1 + $0x20] sm:$0xff] }
   0x5   :  { %v28_v13 = vadd.f32 %v27_v10, %v26_v9  ;;  %v37_v15 = vadd.f32 %v36_v14, %v35_v11  ;;  %v60_v25 = vld [vmem:[%s262_s1 + $0x18] sm:$0xff]  ;;  %v59_v28 = vld [vmem:[%s262_s1 + $0x10] sm:$0xff]  ;;  %v58_v31 = vld [vmem:[%s262_s1 + $0x8] sm:$0xff] }
   0x6   :  { %78 = vmatpush.msra.mxu0 %v66_v3  ;;  %v57_v35 = vld [vmem:[%s262_s1] sm:$0xff] }
   0x7   :  { %v29_v17 = vrot.slane %v28_v13, 4  ;;  %v38_v18 = vrot.slane %v37_v15, 4  ;;  %v112_v40 = vld [vmem:[%s264_s2] sm:$0x3f] }
   0x8   :  { %79 = vmatpush.msra.mxu0 %v65_v4  ;;  %v20_v33 = vld [vmem:[#allocation2] sm:$0x3]  ;;  %167 = vmatpush.msk.msra.mxu1 %vm117_vm3, %v112_v40 }
   0x9   :  { %v30_v20 = vadd.f32 %v29_v17, %v28_v13  ;;  %v39_v21 = vadd.f32 %v38_v18, %v37_v15 }
   0xa   :  { %80 = vmatpush.msra.mxu0 %v64_v12 }
   0xb   :  { %v31_v23 = vrot.slane %v30_v20, 2  ;;  %v40_v24 = vrot.slane %v39_v21, 2 }
   0xc   :  { %81 = vmatpush.msra.mxu0 %v63_v16 }
   0xd   :  { %v32_v26 = vadd.f32 %v31_v23, %v30_v20  ;;  %v41_v27 = vadd.f32 %v40_v24, %v39_v21 }
   0xe   :  { %82 = vmatpush.msra.mxu0 %v62_v19 }
   0xf   :  { %v33_v29 = vrot.slane %v32_v26, 1  ;;  %v42_v30 = vrot.slane %v41_v27, 1 }
  0x10   :  { %83 = vmatpush.msra.mxu0 %v61_v22 }
  0x11   :  { %v34_v32 = vadd.f32 %v33_v29, %v32_v26  ;;  %v43_v34 = vadd.f32 %v42_v30, %v41_v27 }
  0x12   :  { %84 = vmatpush.msra.mxu0 %v60_v25 }
  0x13   :  { %v47_v36 = vsel %vm46_vm2, %v43_v34, %v34_v32 }
  0x14   :  { %85 = vmatpush.msra.mxu0 %v59_v28  ;;  %v49_v37 = vadd.f32 %v47_v36, %v20_v33 }
  0x16   :  { %86 = vmatpush.msra.mxu0 %v58_v31  ;;  %51 = vst.msk [vmem:[#allocation2] sm:$0x3] %vm18_vm0, %v49_v37 }
  0x18   :  { %87 = vmatpush.msra.mxu0 %v57_v35 }
  0x1d   :  { %v55_v38 = vld [vmem:[#allocation2] sm:$0x3] }
  0x1e   :  { %v56_v39 = vmul.f32 0.0625, %v55_v38 }
  0x20   :  { %165 = vmatmul.msk.f32.vlgmr.msra.gmra.mxu0 %vm25_vm1, %v56_v39 }
  0x9d   :  { %v89_v41 = vpop.f32.mrf.mxu0 }
  0x9e   :  { %v166_v42 = vmul.f32 -1.442695, %v89_v41 }
  0xa0   :  { %171 = vpow2.f32 %v166_v42 }
  0xa6   :  { %v172_v43 = vpop.eup %171 }
  0xa7   :  { %v95_v44 = vadd.f32 1.0, %v172_v43 }
  0xa9   :  { %173 = vrcp.f32 %v95_v44  ;;  %v107_v48 = vand.u32 2147483648, %v95_v44  ;;  %v105_v50 = vand.u32 2147483647, %v95_v44  ;;  %vm101_vm5 = vweird.f32 %v95_v44 }
  0xab   :  { %v108_v52 = vor.u32 1.1754944e-38, %v107_v48  ;;  %vm106_vm7 = vcmp.eq.f32.partialorder %v105_v50, 8.507059e+37 }
  0xaf   :  { %v174_v45 = vpop.eup %173 }
  0xb0   :  { %v97_v46 = vmul.f32 %v174_v45, %v95_v44  ;;  %vm102_vm4 = vweird.f32 %v174_v45 }
  0xb1   :  { %vm103_vm6 = vmor %vm101_vm5, %vm102_vm4 }
  0xb2   :  { %v98_v47 = vsub.f32 1.0, %v97_v46 }
  0xb4   :  { %v99_v49 = vmul.f32 %v174_v45, %v98_v47 }
  0xb6   :  { %v100_v51 = vadd.f32 %v174_v45, %v99_v49 }
  0xb8   :  { %v104_v53 = vsel %vm103_vm6, %v174_v45, %v100_v51 }
  0xb9   :  { %v109_v54 = vsel %vm106_vm7, %v108_v52, %v104_v53 }
  0xba   :  { %v111_v55 = vmul.f32 %v109_v54, %v89_v41 }
  0xbc   :  { %168 = vmatmul.msk.f32.vlgmr.msra.gmra.mxu1 %vm113_vm8, %v111_v55 }
 0x139   :  { %v138_v56 = vpop.f32.mrf.mxu1 }
 0x13a   :  { %v169_v57 = vmul.f32 -1.442695, %v138_v56 }
 0x13c   :  { %175 = vpow2.f32 %v169_v57 }
 0x142   :  { %v176_v58 = vpop.eup %175 }
 0x143   :  { %v144_v59 = vadd.f32 1.0, %v176_v58 }
 0x145   :  { %177 = vrcp.f32 %v144_v59  ;;  %v156_v63 = vand.u32 2147483648, %v144_v59  ;;  %v154_v1 = vand.u32 2147483647, %v144_v59  ;;  %vm150_vm10 = vweird.f32 %v144_v59 }
 0x147   :  { %v157_v3 = vor.u32 1.1754944e-38, %v156_v63  ;;  %vm155_vm12 = vcmp.eq.f32.partialorder %v154_v1, 8.507059e+37 }
 0x14b   :  { %v178_v60 = vpop.eup %177 }
 0x14c   :  { %v146_v61 = vmul.f32 %v178_v60, %v144_v59  ;;  %vm151_vm9 = vweird.f32 %v178_v60 }
 0x14d   :  { %vm152_vm11 = vmor %vm150_vm10, %vm151_vm9 }
 0x14e   :  { %v147_v62 = vsub.f32 1.0, %v146_v61 }
 0x150   :  { %v148_v0 = vmul.f32 %v178_v60, %v147_v62 }
 0x152   :  { %v149_v2 = vadd.f32 %v178_v60, %v148_v0 }
 0x154   :  { %v153_v4 = vsel %vm152_vm11, %v178_v60, %v149_v2 }
 0x155   :  { %v158_v5 = vsel %vm155_vm12, %v157_v3, %v153_v4 }
 0x156   :  { %160 = vst.msk [vmem:[%s265_s3] sm:$0x3] %vm18_vm0, %v158_v5 }

// kernel: _lambda_.25
= control target key start
LH: loop header
LB: loop body
LE: loop exit
PB: predicated region body
PF: predicated region fallthrough
CT: control target
= control target key end

     0   :  { %s623_s21 = smov 0   ;;  %s625_s22 = smov 0   ;;  %s704_s0 = inlined_call_operand.vmem [shape: f32[2,16,96], index: 0, kind: input, shape index: {}]   ;;  %s705_s1 = inlined_call_operand.vmem [shape: f32[2,1,96], index: 1, kind: input, shape index: {}]   ;;  %s706_s2 = inlined_call_operand.vmem [shape: f32[96,24], index: 2, kind: input, shape index: {}]   ;;  %s707_s3 = inlined_call_operand.vmem [shape: f32[1,24], index: 3, kind: input, shape index: {}]   ;;  %s708_s4 = inlined_call_operand.vmem [shape: f32[1,24], index: 4, kind: input, shape index: {}]   ;;  %s709_s5 = inlined_call_operand.vmem [shape: f32[2,16,24], index: 5, kind: input, shape index: {}]   ;;  %s710_s6 = inlined_call_operand.vmem [shape: f32[2,16,24], index: 6, kind: output, shape index: {}]  }
   0x1   :  { %s627_s23 = smov 0  }
   0x2 LB: > { %s28_s24 = sadd.s32 1, %s582_s22  ;;  %p524_p0 = scmp.ge.s32.totalorder %s586_s23, 1  ;;  %s586_s23 = sphi %s627_s23, %s16_s23   ;;  %s582_s22 = sphi %s625_s22, %s712_s22   ;;  %s578_s21 = sphi %s623_s21, %s711_s21  }
   0x3   : > { %p30_p1 = scmp.ge.s32.totalorder %s28_s24, 2  ;;  %p258_p2 = scmp.lt.s32.totalorder %s586_s23, 3 }
   0x5   : > { %s714_s24 = smov (%p30_p1, %s28_s24), 0  ;;  %p259_p3 = pnand %p524_p0, %p258_p2 }
   0x6   : > { %p309_p4 = scmp.lt.s32.totalorder (!%p259_p3), %s578_s21, 1 }
   0x7   : > { %262 = sbr.rel (%p259_p3) target bundleno = 179 (0xb3), region = 44 }
   0xc   : > { %v361_v0 = vld [vmem:[%s706_s2 + $0x50] sm:$0xff]  ;;  %v362_v1 = vld [vmem:[%s706_s2 + $0x58] sm:$0xff]  ;;  %v359_v2 = vld [vmem:[%s706_s2 + $0x40] sm:$0xff]  ;;  %s716_s21 = smov (!%p309_p4, %s578_s21), 1  ;;  %vm369_vm0 = vcmask 785408   ;;  %vm403_vm1 = vcmask 195584  }
   0xd   : > { %v368_v3 = vpack.c.bf16 %v362_v1, %v361_v0  ;;  %v360_v4 = vld [vmem:[%s706_s2 + $0x48] sm:$0xff]  ;;  %v357_v6 = vld [vmem:[%s706_s2 + $0x30] sm:$0xff]  ;;  %v358_v7 = vld [vmem:[%s706_s2 + $0x38] sm:$0xff]  ;;  %s320_s15 = scalar_lea.vmem %s705_s1, %s716_s21  ;;  %s534_s20 = sshll.u32 %s716_s21, 4 }
   0xe   : > { %v367_v5 = vpack.c.bf16 %v360_v4, %v359_v2  ;;  %v366_v8 = vpack.c.bf16 %v358_v7, %v357_v6  ;;  %v355_v9 = vld [vmem:[%s706_s2 + $0x20] sm:$0xff]  ;;  %v356_v10 = vld [vmem:[%s706_s2 + $0x28] sm:$0xff]  ;;  %v353_v12 = vld [vmem:[%s706_s2 + $0x10] sm:$0xff]  ;;  %s316_s7 = scalar_lea.vmem %s704_s0, %s534_s20  ;;  %s339_s25 = scalar_lea.vmem %s710_s6, %s534_s20 }
   0xf   : > { %375 = vmatpush.bf16.msra.mxu0 %v368_v3  ;;  %v365_v11 = vpack.c.bf16 %v356_v10, %v355_v9  ;;  %v354_v13 = vld [vmem:[%s706_s2 + $0x18] sm:$0xff]  ;;  %v561_v14 = vld [vmem:[%s320_s15] ss:$0 sm:$0xff]  ;;  %v343_v17 = vld [vmem:[%s316_s7 + $0x8] sm:$0xff]  ;;  %s329_s15 = scalar_lea.vmem %s709_s5, %s534_s20 }
  0x10   : > { %v364_v15 = vpack.c.bf16 %v354_v13, %v353_v12  ;;  %v342_v16 = vld [vmem:[%s316_s7] sm:$0xff]  ;;  %v352_v19 = vld [vmem:[%s706_s2 + $0x8] sm:$0xff]  ;;  %v349_v21 = vmul.f32 %v561_v14, %v343_v17 }
  0x11   : > { %v351_v18 = vld [vmem:[%s706_s2] sm:$0xff]  ;;  %v348_v20 = vmul.f32 %v561_v14, %v342_v16  ;;  %v400_v33 = vld [vmem:[%s329_s15 + $0x8] sm:$0xff] }
  0x12   : > { %v363_v22 = vpack.c.bf16 %v352_v19, %v351_v18  ;;  %v562_v24 = vld [vmem:[%s707_s3] ss:$0 sm:$0xff] }
  0x13   : > { %376 = vmatpush.bf16.msra.mxu0 %v367_v5  ;;  %v350_v23 = vpack.c.bf16 %v349_v21, %v348_v20  ;;  %v563_v25 = vld [vmem:[%s708_s4] ss:$0 sm:$0xff] }
  0x14   : > { %v399_v28 = vld [vmem:[%s329_s15] sm:$0xff] }
  0x17   : > { %377 = vmatpush.bf16.msra.mxu0 %v366_v8 }
  0x1b   : > { %378 = vmatpush.bf16.msra.mxu0 %v365_v11 }
  0x1f   : > { %379 = vmatpush.bf16.msra.mxu0 %v364_v15 }
  0x23   : > { %380 = vmatpush.bf16.msra.mxu0 %v363_v22 }
  0x26   : > { %531 = vmatmul.msk.bf16.vlgmr.msra.gmra.mxu0 %vm369_vm0, %v350_v23 }
  0xa3   : > { %v382_v26 = vpop.f32.mrf.mxu0 }
  0xa4   : > { %v391_v27 = vmul.f32 %v562_v24, %v382_v26 }
  0xa6   : > { %v397_v29 = vadd.f32 %v563_v25, %v391_v27 }
  0xa8   : > { %v401_v30 = vadd.f32 %v399_v28, %v397_v29 }
  0xaa   : > { %404 = vst.msk [vmem:[%s339_s25] sm:$0xff] %vm403_vm1, %v401_v30 }
  0xab   : > { %v384_v31 = vpop.f32.mrf.mxu0 }
  0xac   : > { %v392_v32 = vmul.f32 %v562_v24, %v384_v31 }
  0xae   : > { %v398_v34 = vadd.f32 %v563_v25, %v392_v32 }
  0xb0   : > { %v402_v35 = vadd.f32 %v400_v33, %v398_v34 }
  0xb2   : > { %405 = vst.msk [vmem:[%s339_s25 + $0x8] sm:$0xff] %vm403_vm1, %v402_v35 }
  0xb3 PF: > { %s16_s23 = sadd.s32 1, %s586_s23   ;;  %s711_s21 = smov %s582_s22 }
  0xb4   : > { %p13_p5 = scmp.ge.s32.totalorder %s16_s23, 4   ;;  %s712_s22 = smov %s714_s24 }
  0xb6   :  { %15 = sbr.rel (!%p13_p5) target bundleno = 2 (0x2), region = 80 }

// kernel: _lambda_.27
= control target key start
LH: loop header
LB: loop body
LE: loop exit
PB: predicated region body
PF: predicated region fallthrough
CT: control target
= control target key end

     0   :  { %vm19_vm0 = vcmask 779264   ;;  %v145_v2 = vmov 0.0   ;;  %vm26_vm1 = vcmask 785408   ;;  %s228_s0 = inlined_call_operand.vmem [shape: f32[2,16,96], index: 0, kind: input, shape index: {}]   ;;  %s229_s1 = inlined_call_operand.vmem [shape: f32[96,10], index: 1, kind: input, shape index: {}]   ;;  %s230_s2 = inlined_call_operand.vmem [shape: f32[1,10], index: 2, kind: input, shape index: {}]   ;;  %s231_s3 = inlined_call_operand.hbm [shape: f32[2,10], index: 3, kind: output, shape index: {}]  }
   0x1   :  { %v69_v0 = vld [vmem:[%s229_s1 + $0x58] sm:$0xff]  ;;  %v68_v1 = vld [vmem:[%s229_s1 + $0x50] sm:$0xff]  ;;  %20 = vst.msk [vmem:[#allocation2] sm:$0x3] %vm19_vm0, %v145_v2  ;;  %v67_v3 = vld [vmem:[%s229_s1 + $0x48] sm:$0xff] }
   0x2   :  { %81 = vmatpush.msra.mxu0 %v69_v0  ;;  %v66_v4 = vld [vmem:[%s229_s1 + $0x40] sm:$0xff]  ;;  %v23_v6 = vld [vmem:[%s228_s0 + $0x8] sm:$0xff]  ;;  %v24_v7 = vld [vmem:[%s228_s0 + $0x10] sm:$0xff] }
   0x3   :  { %v22_v5 = vld [vmem:[%s228_s0] sm:$0xff]  ;;  %v25_v8 = vld [vmem:[%s228_s0 + $0x18] sm:$0xff]  ;;  %v28_v10 = vsel %vm26_vm1, %v23_v6, 0.0  ;;  %v36_v11 = vsel %vm26_vm1, %v24_v7, 0.0 }
   0x4   :  { %82 = vmatpush.msra.mxu0 %v68_v1  ;;  %v27_v9 = vsel %vm26_vm1, %v22_v5, 0.0  ;;  %v65_v12 = vld [vmem:[%s229_s1 + $0x38] sm:$0xff]  ;;  %v37_v14 = vsel %vm26_vm1, %v25_v8, 0.0 }
   0x5   :  { %v29_v13 = vadd.f32 %v28_v10, %v27_v9 }
   0x6   :  { %83 = vmatpush.msra.mxu0 %v67_v3 }
   0x7   :  { %8 = vsyncpa [#allocation4], 0  ;;  %v38_v15 = vadd.f32 %v37_v14, %v36_v11  ;;  %v64_v16 = vld [vmem:[%s229_s1 + $0x30] sm:$0xff]  ;;  %v30_v17 = vrot.slane %v29_v13, 4  ;;  %v63_v19 = vld [vmem:[%s229_s1 + $0x28] sm:$0xff]  ;;  %vm47_vm2 = vcmask 1041409  }
   0x8   :  { %84 = vmatpush.msra.mxu0 %v66_v4  ;;  %v62_v22 = vld [vmem:[%s229_s1 + $0x20] sm:$0xff]  ;;  %v61_v25 = vld [vmem:[%s229_s1 + $0x18] sm:$0xff]  ;;  %v60_v28 = vld [vmem:[%s229_s1 + $0x10] sm:$0xff]  ;;  %s146_s18 = smov [#allocation3]   ;;  %vm97_vm3 = vcmask 74752  }
   0x9   :  { %v39_v18 = vrot.slane %v38_v15, 4  ;;  %v31_v20 = vadd.f32 %v30_v17, %v29_v13  ;;  %v59_v31 = vld [vmem:[%s229_s1 + $0x8] sm:$0xff]  ;;  %v21_v33 = vld [vmem:[#allocation2] sm:$0x3]  ;;  %s104_s19 = sshll.u32 %s146_s18, 4  ;;  %s105_s19 = int_to_ptr.vmem [resolvable:$true] %s104_s19 }
   0xa   :  { %85 = vmatpush.msra.mxu0 %v65_v12  ;;  %v58_v35 = vld [vmem:[%s229_s1] sm:$0xff]  ;;  %s106_s1 = sshll.u32 %s231_s3, 4  ;;  %s107_s1 = int_to_ptr.hbm [resolvable:$true] %s106_s1 }
   0xb   :  { %v40_v21 = vadd.f32 %v39_v18, %v38_v15  ;;  %v32_v23 = vrot.slane %v31_v20, 2  ;;  %v118_v40 = vld [vmem:[%s230_s2] ss:$0 sm:$0xff] }
   0xc   :  { %86 = vmatpush.msra.mxu0 %v64_v16 }
   0xd   :  { %v41_v24 = vrot.slane %v40_v21, 2  ;;  %v33_v26 = vadd.f32 %v32_v23, %v31_v20 }
   0xe   :  { %87 = vmatpush.msra.mxu0 %v63_v19 }
   0xf   :  { %v42_v27 = vadd.f32 %v41_v24, %v40_v21  ;;  %v34_v29 = vrot.slane %v33_v26, 1 }
  0x10   :  { %88 = vmatpush.msra.mxu0 %v62_v22 }
  0x11   :  { %v43_v30 = vrot.slane %v42_v27, 1  ;;  %v35_v32 = vadd.f32 %v34_v29, %v33_v26 }
  0x12   :  { %89 = vmatpush.msra.mxu0 %v61_v25 }
  0x13   :  { %v44_v34 = vadd.f32 %v43_v30, %v42_v27 }
  0x14   :  { %90 = vmatpush.msra.mxu0 %v60_v28 }
  0x15   :  { %v48_v36 = vsel %vm47_vm2, %v44_v34, %v35_v32 }
  0x16   :  { %91 = vmatpush.msra.mxu0 %v59_v31  ;;  %v50_v37 = vadd.f32 %v48_v36, %v21_v33 }
  0x18   :  { %92 = vmatpush.msra.mxu0 %v58_v35  ;;  %52 = vst.msk [vmem:[#allocation2] sm:$0x3] %vm19_vm0, %v50_v37 }
  0x1f   :  { %v56_v38 = vld [vmem:[#allocation2] sm:$0x3] }
  0x20   :  { %v57_v39 = vmul.f32 0.0625, %v56_v38 }
  0x22   :  { %115 = vmatmul.msk.f32.vlgmr.msra.gmra.mxu0 %vm26_vm1, %v57_v39 }
  0x9f   :  { %v94_v41 = vpop.f32.mrf.mxu0 }
  0xa0   :  { %v95_v42 = vadd.f32 %v118_v40, %v94_v41 }
  0xa2   :  { %98 = vst.msk [vmem:[#allocation3] sm:$0x3] %vm97_vm3, %v95_v42 }
  0xa3   :  { %109 = dma.vmem_to_hbm [thread:$0]  %s105_s19, 32, %s107_s1, [#allocation4]  }
  0xa4   :  { %143 = dma.done.wait [#allocation4], 32  }
  0xa5   :  { %144 = vsyncadd [#allocation4], 4294967264 }
  0xa6   :  { %114 = vsyncpa [#allocation4], 1 }

</bundles_post_ra>
